<compile_context>
chip_gen: v7x
topology: tpu7x:2x2x1
jax: 0.10.0
libtpu: 0.0.40
codegen_flags: <defaults>
</compile_context>

<pallas_src>
import math
import numpy as np
import jax
import jax.numpy as jnp
from jax import lax
from jax.experimental import pallas as pl
from jax.experimental.pallas import tpu as pltpu

# ----------------------------- config ---------------------------------------
B = 2
HIDDEN = 32
NUM_HEADS = 4
HEAD_SIZE = HIDDEN // NUM_HEADS          # 8
GRID_SIDE = 8                            # spatial side s (reference uses 32)
SEQ = GRID_SIDE * GRID_SIDE              # 64
POOL = 4                                 # AvgPool2d(4,4) / bilinear x4
SP = SEQ // POOL                         # pooled sequence length (16)
DP = HEAD_SIZE // POOL                   # pooled head dim (2)
MLP_DIM = 128                            # 4 * hidden (as 3072 : 768)
INV_SQRT_HEAD = 1.0 / math.sqrt(HEAD_SIZE)
LN_EPS = 1e-6
DCT_THRESHOLD = 0.01

PARALLEL = pltpu.CompilerParams(dimension_semantics=("parallel",))


# ------------------- host-side constant operators ---------------------------
def dct_matrix(n):
    """Orthonormal DCT-II matrix (matches cv2.dct applied to a 2-D array)."""
    k = np.arange(n).reshape(-1, 1).astype(np.float64)
    i = np.arange(n).astype(np.float64)
    m = np.sqrt(2.0 / n) * np.cos(np.pi * (2.0 * i + 1.0) * k / (2.0 * n))
    m[0, :] = np.sqrt(1.0 / n)
    return m.astype(np.float32)


def avgpool_matrix(n_in, k):
    n_out = n_in // k
    m = np.zeros((n_out, n_in), np.float32)
    for i in range(n_out):
        m[i, i * k:(i + 1) * k] = 1.0 / k
    return m


def bilinear_upsample_matrix(n_in, scale):
    # Per-axis weights of F.interpolate(mode='bilinear', align_corners=False),
    # including the edge clamping behaviour.
    n_out = n_in * scale
    m = np.zeros((n_out, n_in), np.float32)
    for i in range(n_out):
        src = max((i + 0.5) / scale - 0.5, 0.0)
        i0 = min(int(np.floor(src)), n_in - 1)
        i1 = min(i0 + 1, n_in - 1)
        frac = src - i0
        m[i, i0] += 1.0 - frac
        m[i, i1] += frac
    return m


def dw_shift_taps(s):
    """Stacked (9*S, S) 0/1 matrices implementing the 9 shifted reads of a 3x3
    conv (stride 1, padding 1) on the flattened s*s token grid; the zero padding
    at the image border is built into the matrices."""
    S = s * s
    taps = np.zeros((9, S, S), np.float32)
    offsets = [(dy, dx) for dy in (-1, 0, 1) for dx in (-1, 0, 1)]
    for t, (dy, dx) in enumerate(offsets):
        for i in range(s):
            ii = i + dy
            if not (0 <= ii < s):
                continue
            for j in range(s):
                jj = j + dx
                if 0 <= jj < s:
                    taps[t, i * s + j, ii * s + jj] = 1.0
    return taps.reshape(9 * S, S)


# ----------------------------- Pallas kernels -------------------------------
def _pre_kernel(x_ref, g_ref, beta_ref, dct_s_ref, dct_ht_ref,
                wqkv_ref, bqkv_ref, o_ref):
    """attention_norm (LayerNorm) + 2-D DCT + threshold + fused q|k|v projection."""
    x = x_ref[0]                                                    # (S, H)
    mu = jnp.mean(x, axis=-1, keepdims=True)
    xc = x - mu
    var = jnp.mean(xc * xc, axis=-1, keepdims=True)
    xn = xc * lax.rsqrt(var + LN_EPS) * g_ref[...] + beta_ref[...]
    # 2-D orthonormal DCT-II (== cv2.dct on the (S, H) slice): D_S @ xn @ D_H^T
    t = jnp.dot(xn, dct_ht_ref[...], preferred_element_type=jnp.float32)
    y = jnp.dot(dct_s_ref[...], t, preferred_element_type=jnp.float32)
    y = jnp.where(jnp.abs(y) > DCT_THRESHOLD, y, 0.0)
    # fused q|k|v projection: one lane-dense matmul instead of three linears.
    o_ref[0] = (jnp.dot(y, wqkv_ref[...], preferred_element_type=jnp.float32)
                + bqkv_ref[...])


def _attn_kernel(qkv_ref, pr_ref, pct_ref, ur_ref, uct_ref,
                 taps_ref, dww_ref, dwb_ref, pww_ref, pwb_ref,
                 seg_ref, wt1_ref, wt2_ref, bt_ref, o_ref):
    """Whole Attention core for one batch element, entirely in VMEM."""
    qkv = qkv_ref[0]                                                # (S, 3H): [q|k|v]

    # ---- pooled branch: AvgPool2d(4,4) over the (seq, head_dim) axes -> per-head
    #      softmax attention -> bilinear x4 upsample (verified against the reference:
    #      the pool acts on (seq, head_dim), not on the s x s patch grid).
    rp = jnp.dot(pr_ref[...], qkv, preferred_element_type=jnp.float32)           # (SP, 3H)
    qp = jnp.dot(rp[:, :HIDDEN], pct_ref[...], preferred_element_type=jnp.float32)
    kp = jnp.dot(rp[:, HIDDEN:2 * HIDDEN], pct_ref[...], preferred_element_type=jnp.float32)
    vp = jnp.dot(rp[:, 2 * HIDDEN:], pct_ref[...], preferred_element_type=jnp.float32)
    uct = uct_ref[...]                                              # (DP, Dh) shared per head
    wt2 = wt2_ref[...]                                              # (H, H) fused mix+out weight
    mix_p = jnp.zeros((SP, HIDDEN), jnp.float32)
    for h in range(NUM_HEADS):                                      # unrolled; data stays in VMEM
        sl = slice(h * DP, (h + 1) * DP)
        sc = lax.dot_general(qp[:, sl], kp[:, sl], (((1,), (1,)), ((), ())),
                             preferred_element_type=jnp.float32) * INV_SQRT_HEAD  # (SP, SP)
        sc = sc - jnp.max(sc, axis=-1, keepdims=True)
        e = jnp.exp(sc)
        prb = e * pl.reciprocal(jnp.sum(e, axis=-1, keepdims=True), approx=True)
        ch = jnp.dot(prb, vp[:, sl], preferred_element_type=jnp.float32)          # (SP, DP)
        cu = jnp.dot(ch, uct, preferred_element_type=jnp.float32)                 # (SP, Dh)
        # fold this head's rows of the fused head-mix/out-projection weight in now,
        # so the bilinear row-upsample below runs once at full lane width.
        mix_p = mix_p + jnp.dot(cu, wt2[h * HEAD_SIZE:(h + 1) * HEAD_SIZE, :],
                                preferred_element_type=jnp.float32)               # (SP, H)
    pooled_mix = jnp.dot(ur_ref[...], mix_p, preferred_element_type=jnp.float32)  # (S, H)

    # ---- conv branch: depthwise 3x3 as ONE stacked shift-matrix matmul (padding
    #      baked in, no jnp.pad) fused with the pointwise 1x1 (block-diag weight).
    shifted = jnp.dot(taps_ref[...], qkv, preferred_element_type=jnp.float32)     # (9S, 3H)
    w9 = dww_ref[...]                                               # (9, 3H) per-tap weights
    dw = dwb_ref[...] + jnp.zeros((SEQ, 3 * HIDDEN), jnp.float32)
    for t in range(9):
        dw = dw + shifted[t * SEQ:(t + 1) * SEQ, :] * w9[t]
    qkv2 = (jnp.dot(dw, pww_ref[...], preferred_element_type=jnp.float32)
            + pwb_ref[...])                                         # (S, 3H)

    # ---- element-wise attention on the conv-branch q/k/v (lane-dense (S, H) layout).
    q2 = qkv2[:, :HIDDEN]
    k2 = qkv2[:, HIDDEN:2 * HIDDEN]
    v2 = qkv2[:, 2 * HIDDEN:]
    s_el = q2 * k2 * INV_SQRT_HEAD
    # Subtracting the per-row max is constant within every Dh group -> exact grouped softmax.
    s_el = s_el - jnp.max(s_el, axis=-1, keepdims=True)
    p_el = jnp.exp(s_el)
    denom = jnp.dot(p_el, seg_ref[...], preferred_element_type=jnp.float32)       # per-head sums
    ctx = p_el * pl.reciprocal(denom, approx=True) * v2                           # (S, H)

    # ---- fused 1x1 head-mix conv + permute + output Linear (folded into wt1/wt2/bt).
    o_ref[0] = (jnp.dot(ctx, wt1_ref[...], preferred_element_type=jnp.float32)
                + pooled_mix + bt_ref[...])


def _post_kernel(attn_ref, x_ref, dct_st_ref, dct_h_ref, g_ref, beta_ref,
                 w1_ref, b1_ref, w2_ref, b2_ref, o_ref):
    """inverse 2-D DCT + residual + ffn_norm + MLP + residual."""
    a = attn_ref[0]                                                 # (S, H)
    t = jnp.dot(dct_st_ref[...], a, preferred_element_type=jnp.float32)  # D_S^T @ a
    y = jnp.dot(t, dct_h_ref[...], preferred_element_type=jnp.float32)   # ... @ D_H
    x1 = y + x_ref[0]                                               # residual (pre-norm input)
    mu = jnp.mean(x1, axis=-1, keepdims=True)
    xc = x1 - mu
    var = jnp.mean(xc * xc, axis=-1, keepdims=True)
    xn = xc * lax.rsqrt(var + LN_EPS) * g_ref[...] + beta_ref[...]
    h1 = jnp.dot(xn, w1_ref[...], preferred_element_type=jnp.float32) + b1_ref[...]
    # TODO(synk): torch uses exact erf-GELU; tanh-approx GELU used here (~1e-3 diff, EUP-safe).
    h1 = jax.nn.gelu(h1, approximate=True)
    h2 = jnp.dot(h1, w2_ref[...], preferred_element_type=jnp.float32) + b2_ref[...]
    o_ref[0] = h2 + x1


# ----------------------------- wrappers --------------------------------------
def pre_attention(x, prep):
    Bn, S, H = x.shape
    ws = [prep[k] for k in ('ln1_g', 'ln1_b', 'dct_s', 'dct_h_t', 'wqkv', 'bqkv')]
    return pl.pallas_call(
        _pre_kernel,
        out_shape=jax.ShapeDtypeStruct((Bn, S, 3 * H), jnp.float32),
        grid=(Bn,),
        in_specs=[pl.BlockSpec((1, S, H), lambda b: (b, 0, 0))]
        + [pl.BlockSpec(w.shape, lambda b: (0, 0)) for w in ws],
        out_specs=pl.BlockSpec((1, S, 3 * H), lambda b: (b, 0, 0)),
        compiler_params=PARALLEL,
    )(x, *ws)


def attention_core(qkv, prep):
    Bn, S, H3 = qkv.shape
    H = H3 // 3
    ws = [prep[k] for k in ('pool_r', 'pool_ct', 'up_r', 'up_ct',
                            'dw_taps', 'dw_w9', 'dw_b3', 'pw_blk', 'pw_b3',
                            'seg', 'wt1', 'wt2', 'bt')]
    return pl.pallas_call(
        _attn_kernel,
        out_shape=jax.ShapeDtypeStruct((Bn, S, H), jnp.float32),
        grid=(Bn,),
        in_specs=[pl.BlockSpec((1, S, H3), lambda b: (b, 0, 0))]
        + [pl.BlockSpec(w.shape, lambda b: (0, 0)) for w in ws],
        out_specs=pl.BlockSpec((1, S, H), lambda b: (b, 0, 0)),
        compiler_params=PARALLEL,
    )(qkv, *ws)


def post_attention(attn_out, x, prep):
    Bn, S, H = x.shape
    ws = [prep[k] for k in ('dct_s_t', 'dct_h', 'ln2_g', 'ln2_b',
                            'w1', 'b1', 'w2', 'b2')]
    act_spec = pl.BlockSpec((1, S, H), lambda b: (b, 0, 0))
    return pl.pallas_call(
        _post_kernel,
        out_shape=jax.ShapeDtypeStruct((Bn, S, H), jnp.float32),
        grid=(Bn,),
        in_specs=[act_spec, act_spec]
        + [pl.BlockSpec(w.shape, lambda b: (0, 0)) for w in ws],
        out_specs=act_spec,
        compiler_params=PARALLEL,
    )(attn_out, x, *ws)


def block_forward(x, prep):
    qkv = pre_attention(x, prep)               # LN + DCT + threshold + fused QKV
    attn_out = attention_core(qkv, prep)       # full Attention module
    out = post_attention(attn_out, x, prep)    # IDCT + residual + ffn_norm + MLP + residual
    weights = None                             # vis=False in the reference
    return out, weights


# ----------------------------- parameters -----------------------------------
def init_params(key):
    ks = jax.random.split(key, 20)

    def w(k, shape, scale=0.05):
        return jax.random.normal(k, shape, jnp.float32) * scale

    return {
        'wq': w(ks[0], (HIDDEN, HIDDEN)), 'bq': w(ks[1], (HIDDEN,)),
        'wk': w(ks[2], (HIDDEN, HIDDEN)), 'bk': w(ks[3], (HIDDEN,)),
        'wv': w(ks[4], (HIDDEN, HIDDEN)), 'bv': w(ks[5], (HIDDEN,)),
        'wo': w(ks[6], (HIDDEN, HIDDEN)), 'bo': w(ks[7], (HIDDEN,)),
        # DepthWiseConv: depthwise 3x3 (groups=C) + pointwise 1x1 (shared by q/k/v)
        'dw_w': w(ks[8], (3, 3, HIDDEN)), 'dw_b': w(ks[9], (HIDDEN,)),
        'pw_w': w(ks[10], (HIDDEN, HIDDEN)), 'pw_b': w(ks[11], (HIDDEN,)),
        # fresh 1x1 conv created in Attention.forward(): (2*heads -> heads)
        'c11_w': w(ks[12], (2 * NUM_HEADS, NUM_HEADS)), 'c11_b': w(ks[13], (NUM_HEADS,)),
        # Block-level params
        'ln1_g': jnp.ones((HIDDEN,), jnp.float32), 'ln1_b': jnp.zeros((HIDDEN,), jnp.float32),
        'ln2_g': jnp.ones((HIDDEN,), jnp.float32), 'ln2_b': jnp.zeros((HIDDEN,), jnp.float32),
        'w1': w(ks[14], (HIDDEN, MLP_DIM)), 'b1': w(ks[15], (MLP_DIM,), 1e-6),
        'w2': w(ks[16], (MLP_DIM, HIDDEN)), 'b2': w(ks[17], (HIDDEN,), 1e-6),
    }


def prepare_params(p):
    """One-time weight preprocessing: fuse q|k|v, tile/block-diag the shared conv,
    build DCT / pool / upsample operators, and fold the fresh 1x1 head-mix conv +
    permute + output Linear into two (H, H) matrices and one bias."""
    eye_dh = jnp.eye(HEAD_SIZE, dtype=jnp.float32)
    d_s = jnp.asarray(dct_matrix(SEQ))
    d_h = jnp.asarray(dct_matrix(HIDDEN))
    pc_t = jnp.asarray(avgpool_matrix(HEAD_SIZE, POOL)).T            # (Dh, DP)
    uc_t = jnp.asarray(bilinear_upsample_matrix(DP, POOL)).T         # (DP, Dh)
    a1 = jnp.kron(p['c11_w'][:NUM_HEADS, :], eye_dh)                 # (H, H)
    a2 = jnp.kron(p['c11_w'][NUM_HEADS:, :], eye_dh)                 # (H, H)
    bias_vec = jnp.repeat(p['c11_b'], HEAD_SIZE)                     # (H,)
    return {
        # pre-attention kernel
        'ln1_g': p['ln1_g'].reshape(1, HIDDEN),
        'ln1_b': p['ln1_b'].reshape(1, HIDDEN),
        'dct_s': d_s,
        'dct_h_t': d_h.T,
        'wqkv': jnp.concatenate([p['wq'], p['wk'], p['wv']], axis=1),
        'bqkv': jnp.concatenate([p['bq'], p['bk'], p['bv']]).reshape(1, 3 * HIDDEN),
        # attention-core kernel
        'pool_r': jnp.asarray(avgpool_matrix(SEQ, POOL)),                  # (SP, S)
        'pool_ct': jnp.kron(jnp.eye(NUM_HEADS, dtype=jnp.float32), pc_t),  # (H, NH*DP)
        'up_r': jnp.asarray(bilinear_upsample_matrix(SP, POOL)),           # (S, SP)
        'up_ct': uc_t,                                                     # (DP, Dh)
        'dw_taps': jnp.asarray(dw_shift_taps(GRID_SIDE)),                  # (9S, S)
        'dw_w9': jnp.tile(p['dw_w'].reshape(9, HIDDEN), (1, 3)),           # (9, 3H)
        'dw_b3': jnp.tile(p['dw_b'], 3).reshape(1, 3 * HIDDEN),
        'pw_blk': jnp.kron(jnp.eye(3, dtype=jnp.float32), p['pw_w']),      # (3H, 3H)
        'pw_b3': jnp.tile(p['pw_b'], 3).reshape(1, 3 * HIDDEN),
        'seg': jnp.kron(jnp.eye(NUM_HEADS, dtype=jnp.float32),
                        jnp.ones((HEAD_SIZE, HEAD_SIZE), jnp.float32)),    # (H, H)
        'wt1': a1 @ p['wo'],
        'wt2': a2 @ p['wo'],
        'bt': (bias_vec @ p['wo'] + p['bo']).reshape(1, HIDDEN),
        # post-attention kernel
        'dct_s_t': d_s.T,
        'dct_h': d_h,
        'ln2_g': p['ln2_g'].reshape(1, HIDDEN),
        'ln2_b': p['ln2_b'].reshape(1, HIDDEN),
        'w1': p['w1'],
        'b1': p['b1'].reshape(1, MLP_DIM),
        'w2': p['w2'],
        'b2': p['b2'].reshape(1, HIDDEN),
    }


# ----------------------------- main ------------------------------------------
if __name__ == "__main__":
    key = jax.random.PRNGKey(0)
    pkey, xkey = jax.random.split(key)
    params = init_params(pkey)
    prep = prepare_params(params)
    x = jax.random.normal(xkey, (B, SEQ, HIDDEN), jnp.float32)

    fwd = jax.jit(block_forward)
    out, attn_weights = fwd(x, prep)
    out = jax.block_until_ready(out)

    assert out.shape == (B, SEQ, HIDDEN), out.shape
    assert attn_weights is None
    assert bool(jnp.all(jnp.isfinite(out)))
    print("KERNEL_OK")
</pallas_src>

<mosaic_0001>
module attributes {stable_mosaic.version = 11 : i64} {
  func.func @_pre_kernel(%arg0: i32, %arg1: memref<1x64x32xf32, #tpu.memory_space<vmem>>, %arg2: memref<1x32xf32, #tpu.memory_space<vmem>>, %arg3: memref<1x32xf32, #tpu.memory_space<vmem>>, %arg4: memref<64x64xf32, #tpu.memory_space<vmem>>, %arg5: memref<32x32xf32, #tpu.memory_space<vmem>>, %arg6: memref<32x96xf32, #tpu.memory_space<vmem>>, %arg7: memref<1x96xf32, #tpu.memory_space<vmem>>, %arg8: memref<1x64x96xf32, #tpu.memory_space<vmem>>) attributes {dimension_semantics = [#tpu.dimension_semantics<parallel>], iteration_bounds = array<i64: 2>, scalar_prefetch = 0 : i64, scratch_operands = 0 : i64, tpu.core_type = #tpu.core_type<tc>, window_params = [{transform_indices = @transform_0, window_bounds = array<i64: 1, 64, 32>}, {pipeline_mode = #tpu.pipeline_mode<synchronous>, transform_indices = @transform_1, window_bounds = array<i64: 1, 32>}, {pipeline_mode = #tpu.pipeline_mode<synchronous>, transform_indices = @transform_2, window_bounds = array<i64: 1, 32>}, {pipeline_mode = #tpu.pipeline_mode<synchronous>, transform_indices = @transform_3, window_bounds = array<i64: 64, 64>}, {pipeline_mode = #tpu.pipeline_mode<synchronous>, transform_indices = @transform_4, window_bounds = array<i64: 32, 32>}, {pipeline_mode = #tpu.pipeline_mode<synchronous>, transform_indices = @transform_5, window_bounds = array<i64: 32, 96>}, {pipeline_mode = #tpu.pipeline_mode<synchronous>, transform_indices = @transform_6, window_bounds = array<i64: 1, 96>}, {transform_indices = @transform_7, window_bounds = array<i64: 1, 64, 96>}]} {
    %c0 = arith.constant 0 : index
    %c0_0 = arith.constant 0 : index
    %c0_1 = arith.constant 0 : index
    %0 = vector.load %arg1[%c0, %c0_0, %c0_1] : memref<1x64x32xf32, #tpu.memory_space<vmem>>, vector<1x64x32xf32>
    %1 = vector.shape_cast %0 : vector<1x64x32xf32> to vector<64x32xf32>
    %cst = arith.constant dense<0.000000e+00> : vector<64xf32>
    %2 = vector.multi_reduction <add>, %1, %cst [1] : vector<64x32xf32> to vector<64xf32>
    %3 = vector.shape_cast %2 : vector<64xf32> to vector<64x1xf32>
    %cst_2 = arith.constant 3.200000e+01 : f32
    %4 = vector.broadcast %cst_2 : f32 to vector<64x1xf32>
    %5 = arith.divf %3, %4 : vector<64x1xf32>
    %6 = vector.broadcast %5 : vector<64x1xf32> to vector<64x32xf32>
    %7 = arith.subf %1, %6 : vector<64x32xf32>
    %8 = arith.mulf %7, %7 : vector<64x32xf32>
    %cst_3 = arith.constant dense<0.000000e+00> : vector<64xf32>
    %9 = vector.multi_reduction <add>, %8, %cst_3 [1] : vector<64x32xf32> to vector<64xf32>
    %10 = vector.shape_cast %9 : vector<64xf32> to vector<64x1xf32>
    %cst_4 = arith.constant 3.200000e+01 : f32
    %11 = vector.broadcast %cst_4 : f32 to vector<64x1xf32>
    %12 = arith.divf %10, %11 : vector<64x1xf32>
    %cst_5 = arith.constant 9.99999997E-7 : f32
    %13 = vector.broadcast %cst_5 : f32 to vector<64x1xf32>
    %14 = arith.addf %12, %13 : vector<64x1xf32>
    %15 = math.rsqrt %14 : vector<64x1xf32>
    %16 = vector.broadcast %15 : vector<64x1xf32> to vector<64x32xf32>
    %17 = arith.mulf %7, %16 : vector<64x32xf32>
    %c0_6 = arith.constant 0 : index
    %c0_7 = arith.constant 0 : index
    %18 = vector.load %arg2[%c0_6, %c0_7] : memref<1x32xf32, #tpu.memory_space<vmem>>, vector<1x32xf32>
    %19 = vector.broadcast %18 : vector<1x32xf32> to vector<64x32xf32>
    %20 = arith.mulf %17, %19 : vector<64x32xf32>
    %c0_8 = arith.constant 0 : index
    %c0_9 = arith.constant 0 : index
    %21 = vector.load %arg3[%c0_8, %c0_9] : memref<1x32xf32, #tpu.memory_space<vmem>>, vector<1x32xf32>
    %22 = vector.broadcast %21 : vector<1x32xf32> to vector<64x32xf32>
    %23 = arith.addf %20, %22 : vector<64x32xf32>
    %c0_10 = arith.constant 0 : index
    %c0_11 = arith.constant 0 : index
    %24 = vector.load %arg5[%c0_10, %c0_11] : memref<32x32xf32, #tpu.memory_space<vmem>>, vector<32x32xf32>
    %cst_12 = arith.constant dense<0.000000e+00> : vector<64x32xf32>
    %25 = tpu.matmul %23, %24, %cst_12 {dimension_numbers = #tpu.dot_dimension_numbers<[1], [0], [0], [1], [0, 0, 1, 1], [], []>} : vector<64x32xf32>, vector<32x32xf32>, vector<64x32xf32> -> vector<64x32xf32>
    %c0_13 = arith.constant 0 : index
    %c0_14 = arith.constant 0 : index
    %26 = vector.load %arg4[%c0_13, %c0_14] : memref<64x64xf32, #tpu.memory_space<vmem>>, vector<64x64xf32>
    %cst_15 = arith.constant dense<0.000000e+00> : vector<64x32xf32>
    %27 = tpu.matmul %26, %25, %cst_15 {dimension_numbers = #tpu.dot_dimension_numbers<[1], [0], [0], [1], [0, 0, 1, 1], [], []>} : vector<64x64xf32>, vector<64x32xf32>, vector<64x32xf32> -> vector<64x32xf32>
    %28 = math.absf %27 : vector<64x32xf32>
    %cst_16 = arith.constant 0.00999999977 : f32
    %29 = vector.broadcast %cst_16 : f32 to vector<64x32xf32>
    %30 = arith.cmpf ogt, %28, %29 : vector<64x32xf32>
    %cst_17 = arith.constant 0.000000e+00 : f32
    %31 = vector.broadcast %cst_17 : f32 to vector<64x32xf32>
    %32 = arith.select %30, %27, %31 : vector<64x32xi1>, vector<64x32xf32>
    %c0_18 = arith.constant 0 : index
    %c0_19 = arith.constant 0 : index
    %33 = vector.load %arg6[%c0_18, %c0_19] : memref<32x96xf32, #tpu.memory_space<vmem>>, vector<32x96xf32>
    %cst_20 = arith.constant dense<0.000000e+00> : vector<64x96xf32>
    %34 = tpu.matmul %32, %33, %cst_20 {dimension_numbers = #tpu.dot_dimension_numbers<[1], [0], [0], [1], [0, 0, 1, 1], [], []>} : vector<64x32xf32>, vector<32x96xf32>, vector<64x96xf32> -> vector<64x96xf32>
    %c0_21 = arith.constant 0 : index
    %c0_22 = arith.constant 0 : index
    %35 = vector.load %arg7[%c0_21, %c0_22] : memref<1x96xf32, #tpu.memory_space<vmem>>, vector<1x96xf32>
    %36 = vector.broadcast %35 : vector<1x96xf32> to vector<64x96xf32>
    %37 = arith.addf %34, %36 : vector<64x96xf32>
    %c0_23 = arith.constant 0 : index
    %c0_24 = arith.constant 0 : index
    %c0_25 = arith.constant 0 : index
    %38 = vector.load %arg8[%c0_23, %c0_24, %c0_25] : memref<1x64x96xf32, #tpu.memory_space<vmem>>, vector<1x64x96xf32>
    %39 = vector.shape_cast %38 : vector<1x64x96xf32> to vector<64x96xf32>
    %40 = vector.shape_cast %37 : vector<64x96xf32> to vector<1x64x96xf32>
    tpu.vector_store %arg8[%c0_23, %c0_24, %c0_25], %40 {strides = array<i32>} : memref<1x64x96xf32, #tpu.memory_space<vmem>>, vector<1x64x96xf32>,
    return
  }
  func.func @transform_0(%arg0: i32) -> (i32, i32, i32) {
    %c0_i32 = arith.constant 0 : i32
    %c0_i32_0 = arith.constant 0 : i32
    %c0_i32_1 = arith.constant 0 : i32
    return %arg0, %c0_i32, %c0_i32_0 : i32, i32, i32
  }
  func.func @transform_1(%arg0: i32) -> (i32, i32) {
    %c0_i32 = arith.constant 0 : i32
    %c0_i32_0 = arith.constant 0 : i32
    %c0_i32_1 = arith.constant 0 : i32
    return %c0_i32, %c0_i32_0 : i32, i32
  }
  func.func @transform_2(%arg0: i32) -> (i32, i32) {
    %c0_i32 = arith.constant 0 : i32
    %c0_i32_0 = arith.constant 0 : i32
    %c0_i32_1 = arith.constant 0 : i32
    return %c0_i32, %c0_i32_0 : i32, i32
  }
  func.func @transform_3(%arg0: i32) -> (i32, i32) {
    %c0_i32 = arith.constant 0 : i32
    %c0_i32_0 = arith.constant 0 : i32
    %c0_i32_1 = arith.constant 0 : i32
    return %c0_i32, %c0_i32_0 : i32, i32
  }
  func.func @transform_4(%arg0: i32) -> (i32, i32) {
    %c0_i32 = arith.constant 0 : i32
    %c0_i32_0 = arith.constant 0 : i32
    %c0_i32_1 = arith.constant 0 : i32
    return %c0_i32, %c0_i32_0 : i32, i32
  }
  func.func @transform_5(%arg0: i32) -> (i32, i32) {
    %c0_i32 = arith.constant 0 : i32
    %c0_i32_0 = arith.constant 0 : i32
    %c0_i32_1 = arith.constant 0 : i32
    return %c0_i32, %c0_i32_0 : i32, i32
  }
  func.func @transform_6(%arg0: i32) -> (i32, i32) {
    %c0_i32 = arith.constant 0 : i32
    %c0_i32_0 = arith.constant 0 : i32
    %c0_i32_1 = arith.constant 0 : i32
    return %c0_i32, %c0_i32_0 : i32, i32
  }
  func.func @transform_7(%arg0: i32) -> (i32, i32, i32) {
    %c0_i32 = arith.constant 0 : i32
    %c0_i32_0 = arith.constant 0 : i32
    %c0_i32_1 = arith.constant 0 : i32
    return %arg0, %c0_i32, %c0_i32_0 : i32, i32, i32
  }
}

module attributes {stable_mosaic.version = 11 : i64} {
  func.func @_attn_kernel(%arg0: i32, %arg1: memref<1x64x96xf32, #tpu.memory_space<vmem>>, %arg2: memref<16x64xf32, #tpu.memory_space<vmem>>, %arg3: memref<32x8xf32, #tpu.memory_space<vmem>>, %arg4: memref<64x16xf32, #tpu.memory_space<vmem>>, %arg5: memref<2x8xf32, #tpu.memory_space<vmem>>, %arg6: memref<576x64xf32, #tpu.memory_space<vmem>>, %arg7: memref<9x96xf32, #tpu.memory_space<vmem>>, %arg8: memref<1x96xf32, #tpu.memory_space<vmem>>, %arg9: memref<96x96xf32, #tpu.memory_space<vmem>>, %arg10: memref<1x96xf32, #tpu.memory_space<vmem>>, %arg11: memref<32x32xf32, #tpu.memory_space<vmem>>, %arg12: memref<32x32xf32, #tpu.memory_space<vmem>>, %arg13: memref<32x32xf32, #tpu.memory_space<vmem>>, %arg14: memref<1x32xf32, #tpu.memory_space<vmem>>, %arg15: memref<1x64x32xf32, #tpu.memory_space<vmem>>) attributes {dimension_semantics = [#tpu.dimension_semantics<parallel>], iteration_bounds = array<i64: 2>, scalar_prefetch = 0 : i64, scratch_operands = 0 : i64, tpu.core_type = #tpu.core_type<tc>, window_params = [{transform_indices = @transform_0, window_bounds = array<i64: 1, 64, 96>}, {pipeline_mode = #tpu.pipeline_mode<synchronous>, transform_indices = @transform_1, window_bounds = array<i64: 16, 64>}, {pipeline_mode = #tpu.pipeline_mode<synchronous>, transform_indices = @transform_2, window_bounds = array<i64: 32, 8>}, {pipeline_mode = #tpu.pipeline_mode<synchronous>, transform_indices = @transform_3, window_bounds = array<i64: 64, 16>}, {pipeline_mode = #tpu.pipeline_mode<synchronous>, transform_indices = @transform_4, window_bounds = array<i64: 2, 8>}, {pipeline_mode = #tpu.pipeline_mode<synchronous>, transform_indices = @transform_5, window_bounds = array<i64: 576, 64>}, {pipeline_mode = #tpu.pipeline_mode<synchronous>, transform_indices = @transform_6, window_bounds = array<i64: 9, 96>}, {pipeline_mode = #tpu.pipeline_mode<synchronous>, transform_indices = @transform_7, window_bounds = array<i64: 1, 96>}, {pipeline_mode = #tpu.pipeline_mode<synchronous>, transform_indices = @transform_8, window_bounds = array<i64: 96, 96>}, {pipeline_mode = #tpu.pipeline_mode<synchronous>, transform_indices = @transform_9, window_bounds = array<i64: 1, 96>}, {pipeline_mode = #tpu.pipeline_mode<synchronous>, transform_indices = @transform_10, window_bounds = array<i64: 32, 32>}, {pipeline_mode = #tpu.pipeline_mode<synchronous>, transform_indices = @transform_11, window_bounds = array<i64: 32, 32>}, {pipeline_mode = #tpu.pipeline_mode<synchronous>, transform_indices = @transform_12, window_bounds = array<i64: 32, 32>}, {pipeline_mode = #tpu.pipeline_mode<synchronous>, transform_indices = @transform_13, window_bounds = array<i64: 1, 32>}, {transform_indices = @transform_14, window_bounds = array<i64: 1, 64, 32>}]} {
    %c0 = arith.constant 0 : index
    %c0_0 = arith.constant 0 : index
    %c0_1 = arith.constant 0 : index
    %0 = vector.load %arg1[%c0, %c0_0, %c0_1] : memref<1x64x96xf32, #tpu.memory_space<vmem>>, vector<1x64x96xf32>
    %1 = vector.shape_cast %0 : vector<1x64x96xf32> to vector<64x96xf32>
    %c0_2 = arith.constant 0 : index
    %c0_3 = arith.constant 0 : index
    %2 = vector.load %arg2[%c0_2, %c0_3] : memref<16x64xf32, #tpu.memory_space<vmem>>, vector<16x64xf32>
    %cst = arith.constant dense<0.000000e+00> : vector<16x96xf32>
    %3 = tpu.matmul %2, %1, %cst {dimension_numbers = #tpu.dot_dimension_numbers<[1], [0], [0], [1], [0, 0, 1, 1], [], []>} : vector<16x64xf32>, vector<64x96xf32>, vector<16x96xf32> -> vector<16x96xf32>
    %4 = vector.extract_strided_slice %3 {offsets = [0, 0], sizes = [16, 32], strides = [1, 1]} : vector<16x96xf32> to vector<16x32xf32>
    %c0_4 = arith.constant 0 : index
    %c0_5 = arith.constant 0 : index
    %5 = vector.load %arg3[%c0_4, %c0_5] : memref<32x8xf32, #tpu.memory_space<vmem>>, vector<32x8xf32>
    %cst_6 = arith.constant dense<0.000000e+00> : vector<16x8xf32>
    %6 = tpu.matmul %4, %5, %cst_6 {dimension_numbers = #tpu.dot_dimension_numbers<[1], [0], [0], [1], [0, 0, 1, 1], [], []>} : vector<16x32xf32>, vector<32x8xf32>, vector<16x8xf32> -> vector<16x8xf32>
    %7 = vector.extract_strided_slice %3 {offsets = [0, 32], sizes = [16, 32], strides = [1, 1]} : vector<16x96xf32> to vector<16x32xf32>
    %c0_7 = arith.constant 0 : index
    %c0_8 = arith.constant 0 : index
    %8 = vector.load %arg3[%c0_7, %c0_8] : memref<32x8xf32, #tpu.memory_space<vmem>>, vector<32x8xf32>
    %cst_9 = arith.constant dense<0.000000e+00> : vector<16x8xf32>
    %9 = tpu.matmul %7, %8, %cst_9 {dimension_numbers = #tpu.dot_dimension_numbers<[1], [0], [0], [1], [0, 0, 1, 1], [], []>} : vector<16x32xf32>, vector<32x8xf32>, vector<16x8xf32> -> vector<16x8xf32>
    %10 = vector.extract_strided_slice %3 {offsets = [0, 64], sizes = [16, 32], strides = [1, 1]} : vector<16x96xf32> to vector<16x32xf32>
    %c0_10 = arith.constant 0 : index
    %c0_11 = arith.constant 0 : index
    %11 = vector.load %arg3[%c0_10, %c0_11] : memref<32x8xf32, #tpu.memory_space<vmem>>, vector<32x8xf32>
    %cst_12 = arith.constant dense<0.000000e+00> : vector<16x8xf32>
    %12 = tpu.matmul %10, %11, %cst_12 {dimension_numbers = #tpu.dot_dimension_numbers<[1], [0], [0], [1], [0, 0, 1, 1], [], []>} : vector<16x32xf32>, vector<32x8xf32>, vector<16x8xf32> -> vector<16x8xf32>
    %c0_13 = arith.constant 0 : index
    %c0_14 = arith.constant 0 : index
    %13 = vector.load %arg5[%c0_13, %c0_14] : memref<2x8xf32, #tpu.memory_space<vmem>>, vector<2x8xf32>
    %c0_15 = arith.constant 0 : index
    %c0_16 = arith.constant 0 : index
    %14 = vector.load %arg13[%c0_15, %c0_16] : memref<32x32xf32, #tpu.memory_space<vmem>>, vector<32x32xf32>
    %cst_17 = arith.constant 0.000000e+00 : f32
    %15 = vector.broadcast %cst_17 : f32 to vector<16x32xf32>
    %16 = vector.extract_strided_slice %6 {offsets = [0, 0], sizes = [16, 2], strides = [1, 1]} : vector<16x8xf32> to vector<16x2xf32>
    %17 = vector.extract_strided_slice %9 {offsets = [0, 0], sizes = [16, 2], strides = [1, 1]} : vector<16x8xf32> to vector<16x2xf32>
    %cst_18 = arith.constant dense<0.000000e+00> : vector<16x16xf32>
    %18 = tpu.matmul %16, %17, %cst_18 {dimension_numbers = #tpu.dot_dimension_numbers<[1], [1], [0], [0], [0, 0, 1, 0], [], []>} : vector<16x2xf32>, vector<16x2xf32>, vector<16x16xf32> -> vector<16x16xf32>
    %cst_19 = arith.constant 0.353553385 : f32
    %19 = vector.broadcast %cst_19 : f32 to vector<16x16xf32>
    %20 = arith.mulf %18, %19 : vector<16x16xf32>
    %cst_20 = arith.constant dense<0xFF800000> : vector<16xf32>
    %21 = vector.multi_reduction <maximumf>, %20, %cst_20 [1] : vector<16x16xf32> to vector<16xf32>
    %22 = vector.shape_cast %21 : vector<16xf32> to vector<16x1xf32>
    %23 = vector.broadcast %22 : vector<16x1xf32> to vector<16x16xf32>
    %24 = arith.subf %20, %23 : vector<16x16xf32>
    %25 = math.exp %24 : vector<16x16xf32>
    %cst_21 = arith.constant dense<0.000000e+00> : vector<16xf32>
    %26 = vector.multi_reduction <add>, %25, %cst_21 [1] : vector<16x16xf32> to vector<16xf32>
    %27 = vector.shape_cast %26 : vector<16xf32> to vector<16x1xf32>
    %28 = tpu.reciprocal %27 {approx = true} : vector<16x1xf32> -> vector<16x1xf32>
    %29 = vector.broadcast %28 : vector<16x1xf32> to vector<16x16xf32>
    %30 = arith.mulf %25, %29 : vector<16x16xf32>
    %31 = vector.extract_strided_slice %12 {offsets = [0, 0], sizes = [16, 2], strides = [1, 1]} : vector<16x8xf32> to vector<16x2xf32>
    %cst_22 = arith.constant dense<0.000000e+00> : vector<16x2xf32>
    %32 = tpu.matmul %30, %31, %cst_22 {dimension_numbers = #tpu.dot_dimension_numbers<[1], [0], [0], [1], [0, 0, 1, 1], [], []>} : vector<16x16xf32>, vector<16x2xf32>, vector<16x2xf32> -> vector<16x2xf32>
    %cst_23 = arith.constant dense<0.000000e+00> : vector<16x8xf32>
    %33 = tpu.matmul %32, %13, %cst_23 {dimension_numbers = #tpu.dot_dimension_numbers<[1], [0], [0], [1], [0, 0, 1, 1], [], []>} : vector<16x2xf32>, vector<2x8xf32>, vector<16x8xf32> -> vector<16x8xf32>
    %34 = vector.extract_strided_slice %14 {offsets = [0, 0], sizes = [8, 32], strides = [1, 1]} : vector<32x32xf32> to vector<8x32xf32>
    %cst_24 = arith.constant dense<0.000000e+00> : vector<16x32xf32>
    %35 = tpu.matmul %33, %34, %cst_24 {dimension_numbers = #tpu.dot_dimension_numbers<[1], [0], [0], [1], [0, 0, 1, 1], [], []>} : vector<16x8xf32>, vector<8x32xf32>, vector<16x32xf32> -> vector<16x32xf32>
    %36 = arith.addf %15, %35 : vector<16x32xf32>
    %37 = vector.extract_strided_slice %6 {offsets = [0, 2], sizes = [16, 2], strides = [1, 1]} : vector<16x8xf32> to vector<16x2xf32>
    %38 = vector.extract_strided_slice %9 {offsets = [0, 2], sizes = [16, 2], strides = [1, 1]} : vector<16x8xf32> to vector<16x2xf32>
    %cst_25 = arith.constant dense<0.000000e+00> : vector<16x16xf32>
    %39 = tpu.matmul %37, %38, %cst_25 {dimension_numbers = #tpu.dot_dimension_numbers<[1], [1], [0], [0], [0, 0, 1, 0], [], []>} : vector<16x2xf32>, vector<16x2xf32>, vector<16x16xf32> -> vector<16x16xf32>
    %cst_26 = arith.constant 0.353553385 : f32
    %40 = vector.broadcast %cst_26 : f32 to vector<16x16xf32>
    %41 = arith.mulf %39, %40 : vector<16x16xf32>
    %cst_27 = arith.constant dense<0xFF800000> : vector<16xf32>
    %42 = vector.multi_reduction <maximumf>, %41, %cst_27 [1] : vector<16x16xf32> to vector<16xf32>
    %43 = vector.shape_cast %42 : vector<16xf32> to vector<16x1xf32>
    %44 = vector.broadcast %43 : vector<16x1xf32> to vector<16x16xf32>
    %45 = arith.subf %41, %44 : vector<16x16xf32>
    %46 = math.exp %45 : vector<16x16xf32>
    %cst_28 = arith.constant dense<0.000000e+00> : vector<16xf32>
    %47 = vector.multi_reduction <add>, %46, %cst_28 [1] : vector<16x16xf32> to vector<16xf32>
    %48 = vector.shape_cast %47 : vector<16xf32> to vector<16x1xf32>
    %49 = tpu.reciprocal %48 {approx = true} : vector<16x1xf32> -> vector<16x1xf32>
    %50 = vector.broadcast %49 : vector<16x1xf32> to vector<16x16xf32>
    %51 = arith.mulf %46, %50 : vector<16x16xf32>
    %52 = vector.extract_strided_slice %12 {offsets = [0, 2], sizes = [16, 2], strides = [1, 1]} : vector<16x8xf32> to vector<16x2xf32>
    %cst_29 = arith.constant dense<0.000000e+00> : vector<16x2xf32>
    %53 = tpu.matmul %51, %52, %cst_29 {dimension_numbers = #tpu.dot_dimension_numbers<[1], [0], [0], [1], [0, 0, 1, 1], [], []>} : vector<16x16xf32>, vector<16x2xf32>, vector<16x2xf32> -> vector<16x2xf32>
    %cst_30 = arith.constant dense<0.000000e+00> : vector<16x8xf32>
    %54 = tpu.matmul %53, %13, %cst_30 {dimension_numbers = #tpu.dot_dimension_numbers<[1], [0], [0], [1], [0, 0, 1, 1], [], []>} : vector<16x2xf32>, vector<2x8xf32>, vector<16x8xf32> -> vector<16x8xf32>
    %55 = vector.extract_strided_slice %14 {offsets = [8, 0], sizes = [8, 32], strides = [1, 1]} : vector<32x32xf32> to vector<8x32xf32>
    %cst_31 = arith.constant dense<0.000000e+00> : vector<16x32xf32>
    %56 = tpu.matmul %54, %55, %cst_31 {dimension_numbers = #tpu.dot_dimension_numbers<[1], [0], [0], [1], [0, 0, 1, 1], [], []>} : vector<16x8xf32>, vector<8x32xf32>, vector<16x32xf32> -> vector<16x32xf32>
    %57 = arith.addf %36, %56 : vector<16x32xf32>
    %58 = vector.extract_strided_slice %6 {offsets = [0, 4], sizes = [16, 2], strides = [1, 1]} : vector<16x8xf32> to vector<16x2xf32>
    %59 = vector.extract_strided_slice %9 {offsets = [0, 4], sizes = [16, 2], strides = [1, 1]} : vector<16x8xf32> to vector<16x2xf32>
    %cst_32 = arith.constant dense<0.000000e+00> : vector<16x16xf32>
    %60 = tpu.matmul %58, %59, %cst_32 {dimension_numbers = #tpu.dot_dimension_numbers<[1], [1], [0], [0], [0, 0, 1, 0], [], []>} : vector<16x2xf32>, vector<16x2xf32>, vector<16x16xf32> -> vector<16x16xf32>
    %cst_33 = arith.constant 0.353553385 : f32
    %61 = vector.broadcast %cst_33 : f32 to vector<16x16xf32>
    %62 = arith.mulf %60, %61 : vector<16x16xf32>
    %cst_34 = arith.constant dense<0xFF800000> : vector<16xf32>
    %63 = vector.multi_reduction <maximumf>, %62, %cst_34 [1] : vector<16x16xf32> to vector<16xf32>
    %64 = vector.shape_cast %63 : vector<16xf32> to vector<16x1xf32>
    %65 = vector.broadcast %64 : vector<16x1xf32> to vector<16x16xf32>
    %66 = arith.subf %62, %65 : vector<16x16xf32>
    %67 = math.exp %66 : vector<16x16xf32>
    %cst_35 = arith.constant dense<0.000000e+00> : vector<16xf32>
    %68 = vector.multi_reduction <add>, %67, %cst_35 [1] : vector<16x16xf32> to vector<16xf32>
    %69 = vector.shape_cast %68 : vector<16xf32> to vector<16x1xf32>
    %70 = tpu.reciprocal %69 {approx = true} : vector<16x1xf32> -> vector<16x1xf32>
    %71 = vector.broadcast %70 : vector<16x1xf32> to vector<16x16xf32>
    %72 = arith.mulf %67, %71 : vector<16x16xf32>
    %73 = vector.extract_strided_slice %12 {offsets = [0, 4], sizes = [16, 2], strides = [1, 1]} : vector<16x8xf32> to vector<16x2xf32>
    %cst_36 = arith.constant dense<0.000000e+00> : vector<16x2xf32>
    %74 = tpu.matmul %72, %73, %cst_36 {dimension_numbers = #tpu.dot_dimension_numbers<[1], [0], [0], [1], [0, 0, 1, 1], [], []>} : vector<16x16xf32>, vector<16x2xf32>, vector<16x2xf32> -> vector<16x2xf32>
    %cst_37 = arith.constant dense<0.000000e+00> : vector<16x8xf32>
    %75 = tpu.matmul %74, %13, %cst_37 {dimension_numbers = #tpu.dot_dimension_numbers<[1], [0], [0], [1], [0, 0, 1, 1], [], []>} : vector<16x2xf32>, vector<2x8xf32>, vector<16x8xf32> -> vector<16x8xf32>
    %76 = vector.extract_strided_slice %14 {offsets = [16, 0], sizes = [8, 32], strides = [1, 1]} : vector<32x32xf32> to vector<8x32xf32>
    %cst_38 = arith.constant dense<0.000000e+00> : vector<16x32xf32>
    %77 = tpu.matmul %75, %76, %cst_38 {dimension_numbers = #tpu.dot_dimension_numbers<[1], [0], [0], [1], [0, 0, 1, 1], [], []>} : vector<16x8xf32>, vector<8x32xf32>, vector<16x32xf32> -> vector<16x32xf32>
    %78 = arith.addf %57, %77 : vector<16x32xf32>
    %79 = vector.extract_strided_slice %6 {offsets = [0, 6], sizes = [16, 2], strides = [1, 1]} : vector<16x8xf32> to vector<16x2xf32>
    %80 = vector.extract_strided_slice %9 {offsets = [0, 6], sizes = [16, 2], strides = [1, 1]} : vector<16x8xf32> to vector<16x2xf32>
    %cst_39 = arith.constant dense<0.000000e+00> : vector<16x16xf32>
    %81 = tpu.matmul %79, %80, %cst_39 {dimension_numbers = #tpu.dot_dimension_numbers<[1], [1], [0], [0], [0, 0, 1, 0], [], []>} : vector<16x2xf32>, vector<16x2xf32>, vector<16x16xf32> -> vector<16x16xf32>
    %cst_40 = arith.constant 0.353553385 : f32
    %82 = vector.broadcast %cst_40 : f32 to vector<16x16xf32>
    %83 = arith.mulf %81, %82 : vector<16x16xf32>
    %cst_41 = arith.constant dense<0xFF800000> : vector<16xf32>
    %84 = vector.multi_reduction <maximumf>, %83, %cst_41 [1] : vector<16x16xf32> to vector<16xf32>
    %85 = vector.shape_cast %84 : vector<16xf32> to vector<16x1xf32>
    %86 = vector.broadcast %85 : vector<16x1xf32> to vector<16x16xf32>
    %87 = arith.subf %83, %86 : vector<16x16xf32>
    %88 = math.exp %87 : vector<16x16xf32>
    %cst_42 = arith.constant dense<0.000000e+00> : vector<16xf32>
    %89 = vector.multi_reduction <add>, %88, %cst_42 [1] : vector<16x16xf32> to vector<16xf32>
    %90 = vector.shape_cast %89 : vector<16xf32> to vector<16x1xf32>
    %91 = tpu.reciprocal %90 {approx = true} : vector<16x1xf32> -> vector<16x1xf32>
    %92 = vector.broadcast %91 : vector<16x1xf32> to vector<16x16xf32>
    %93 = arith.mulf %88, %92 : vector<16x16xf32>
    %94 = vector.extract_strided_slice %12 {offsets = [0, 6], sizes = [16, 2], strides = [1, 1]} : vector<16x8xf32> to vector<16x2xf32>
    %cst_43 = arith.constant dense<0.000000e+00> : vector<16x2xf32>
    %95 = tpu.matmul %93, %94, %cst_43 {dimension_numbers = #tpu.dot_dimension_numbers<[1], [0], [0], [1], [0, 0, 1, 1], [], []>} : vector<16x16xf32>, vector<16x2xf32>, vector<16x2xf32> -> vector<16x2xf32>
    %cst_44 = arith.constant dense<0.000000e+00> : vector<16x8xf32>
    %96 = tpu.matmul %95, %13, %cst_44 {dimension_numbers = #tpu.dot_dimension_numbers<[1], [0], [0], [1], [0, 0, 1, 1], [], []>} : vector<16x2xf32>, vector<2x8xf32>, vector<16x8xf32> -> vector<16x8xf32>
    %97 = vector.extract_strided_slice %14 {offsets = [24, 0], sizes = [8, 32], strides = [1, 1]} : vector<32x32xf32> to vector<8x32xf32>
    %cst_45 = arith.constant dense<0.000000e+00> : vector<16x32xf32>
    %98 = tpu.matmul %96, %97, %cst_45 {dimension_numbers = #tpu.dot_dimension_numbers<[1], [0], [0], [1], [0, 0, 1, 1], [], []>} : vector<16x8xf32>, vector<8x32xf32>, vector<16x32xf32> -> vector<16x32xf32>
    %99 = arith.addf %78, %98 : vector<16x32xf32>
    %c0_46 = arith.constant 0 : index
    %c0_47 = arith.constant 0 : index
    %100 = vector.load %arg4[%c0_46, %c0_47] : memref<64x16xf32, #tpu.memory_space<vmem>>, vector<64x16xf32>
    %cst_48 = arith.constant dense<0.000000e+00> : vector<64x32xf32>
    %101 = tpu.matmul %100, %99, %cst_48 {dimension_numbers = #tpu.dot_dimension_numbers<[1], [0], [0], [1], [0, 0, 1, 1], [], []>} : vector<64x16xf32>, vector<16x32xf32>, vector<64x32xf32> -> vector<64x32xf32>
    %c0_49 = arith.constant 0 : index
    %c0_50 = arith.constant 0 : index
    %102 = vector.load %arg6[%c0_49, %c0_50] : memref<576x64xf32, #tpu.memory_space<vmem>>, vector<576x64xf32>
    %cst_51 = arith.constant dense<0.000000e+00> : vector<576x96xf32>
    %103 = tpu.matmul %102, %1, %cst_51 {dimension_numbers = #tpu.dot_dimension_numbers<[1], [0], [0], [1], [0, 0, 1, 1], [], []>} : vector<576x64xf32>, vector<64x96xf32>, vector<576x96xf32> -> vector<576x96xf32>
    %c0_52 = arith.constant 0 : index
    %c0_53 = arith.constant 0 : index
    %104 = vector.load %arg7[%c0_52, %c0_53] : memref<9x96xf32, #tpu.memory_space<vmem>>, vector<9x96xf32>
    %c0_54 = arith.constant 0 : index
    %c0_55 = arith.constant 0 : index
    %105 = vector.load %arg8[%c0_54, %c0_55] : memref<1x96xf32, #tpu.memory_space<vmem>>, vector<1x96xf32>
    %cst_56 = arith.constant 0.000000e+00 : f32
    %106 = vector.broadcast %cst_56 : f32 to vector<64x96xf32>
    %107 = vector.broadcast %105 : vector<1x96xf32> to vector<64x96xf32>
    %108 = arith.addf %107, %106 : vector<64x96xf32>
    %109 = vector.extract_strided_slice %103 {offsets = [0, 0], sizes = [64, 96], strides = [1, 1]} : vector<576x96xf32> to vector<64x96xf32>
    %110 = vector.extract_strided_slice %104 {offsets = [0, 0], sizes = [1, 96], strides = [1, 1]} : vector<9x96xf32> to vector<1x96xf32>
    %111 = vector.shape_cast %110 : vector<1x96xf32> to vector<96xf32>
    %112 = vector.shape_cast %111 : vector<96xf32> to vector<1x96xf32>
    %113 = vector.broadcast %112 : vector<1x96xf32> to vector<64x96xf32>
    %114 = arith.mulf %109, %113 : vector<64x96xf32>
    %115 = arith.addf %108, %114 : vector<64x96xf32>
    %116 = vector.extract_strided_slice %103 {offsets = [64, 0], sizes = [64, 96], strides = [1, 1]} : vector<576x96xf32> to vector<64x96xf32>
    %117 = vector.extract_strided_slice %104 {offsets = [1, 0], sizes = [1, 96], strides = [1, 1]} : vector<9x96xf32> to vector<1x96xf32>
    %118 = vector.shape_cast %117 : vector<1x96xf32> to vector<96xf32>
    %119 = vector.shape_cast %118 : vector<96xf32> to vector<1x96xf32>
    %120 = vector.broadcast %119 : vector<1x96xf32> to vector<64x96xf32>
    %121 = arith.mulf %116, %120 : vector<64x96xf32>
    %122 = arith.addf %115, %121 : vector<64x96xf32>
    %123 = vector.extract_strided_slice %103 {offsets = [128, 0], sizes = [64, 96], strides = [1, 1]} : vector<576x96xf32> to vector<64x96xf32>
    %124 = vector.extract_strided_slice %104 {offsets = [2, 0], sizes = [1, 96], strides = [1, 1]} : vector<9x96xf32> to vector<1x96xf32>
    %125 = vector.shape_cast %124 : vector<1x96xf32> to vector<96xf32>
    %126 = vector.shape_cast %125 : vector<96xf32> to vector<1x96xf32>
    %127 = vector.broadcast %126 : vector<1x96xf32> to vector<64x96xf32>
    %128 = arith.mulf %123, %127 : vector<64x96xf32>
    %129 = arith.addf %122, %128 : vector<64x96xf32>
    %130 = vector.extract_strided_slice %103 {offsets = [192, 0], sizes = [64, 96], strides = [1, 1]} : vector<576x96xf32> to vector<64x96xf32>
    %131 = vector.extract_strided_slice %104 {offsets = [3, 0], sizes = [1, 96], strides = [1, 1]} : vector<9x96xf32> to vector<1x96xf32>
    %132 = vector.shape_cast %131 : vector<1x96xf32> to vector<96xf32>
    %133 = vector.shape_cast %132 : vector<96xf32> to vector<1x96xf32>
    %134 = vector.broadcast %133 : vector<1x96xf32> to vector<64x96xf32>
    %135 = arith.mulf %130, %134 : vector<64x96xf32>
    %136 = arith.addf %129, %135 : vector<64x96xf32>
    %137 = vector.extract_strided_slice %103 {offsets = [256, 0], sizes = [64, 96], strides = [1, 1]} : vector<576x96xf32> to vector<64x96xf32>
    %138 = vector.extract_strided_slice %104 {offsets = [4, 0], sizes = [1, 96], strides = [1, 1]} : vector<9x96xf32> to vector<1x96xf32>
    %139 = vector.shape_cast %138 : vector<1x96xf32> to vector<96xf32>
    %140 = vector.shape_cast %139 : vector<96xf32> to vector<1x96xf32>
    %141 = vector.broadcast %140 : vector<1x96xf32> to vector<64x96xf32>
    %142 = arith.mulf %137, %141 : vector<64x96xf32>
    %143 = arith.addf %136, %142 : vector<64x96xf32>
    %144 = vector.extract_strided_slice %103 {offsets = [320, 0], sizes = [64, 96], strides = [1, 1]} : vector<576x96xf32> to vector<64x96xf32>
    %145 = vector.extract_strided_slice %104 {offsets = [5, 0], sizes = [1, 96], strides = [1, 1]} : vector<9x96xf32> to vector<1x96xf32>
    %146 = vector.shape_cast %145 : vector<1x96xf32> to vector<96xf32>
    %147 = vector.shape_cast %146 : vector<96xf32> to vector<1x96xf32>
    %148 = vector.broadcast %147 : vector<1x96xf32> to vector<64x96xf32>
    %149 = arith.mulf %144, %148 : vector<64x96xf32>
    %150 = arith.addf %143, %149 : vector<64x96xf32>
    %151 = vector.extract_strided_slice %103 {offsets = [384, 0], sizes = [64, 96], strides = [1, 1]} : vector<576x96xf32> to vector<64x96xf32>
    %152 = vector.extract_strided_slice %104 {offsets = [6, 0], sizes = [1, 96], strides = [1, 1]} : vector<9x96xf32> to vector<1x96xf32>
    %153 = vector.shape_cast %152 : vector<1x96xf32> to vector<96xf32>
    %154 = vector.shape_cast %153 : vector<96xf32> to vector<1x96xf32>
    %155 = vector.broadcast %154 : vector<1x96xf32> to vector<64x96xf32>
    %156 = arith.mulf %151, %155 : vector<64x96xf32>
    %157 = arith.addf %150, %156 : vector<64x96xf32>
    %158 = vector.extract_strided_slice %103 {offsets = [448, 0], sizes = [64, 96], strides = [1, 1]} : vector<576x96xf32> to vector<64x96xf32>
    %159 = vector.extract_strided_slice %104 {offsets = [7, 0], sizes = [1, 96], strides = [1, 1]} : vector<9x96xf32> to vector<1x96xf32>
    %160 = vector.shape_cast %159 : vector<1x96xf32> to vector<96xf32>
    %161 = vector.shape_cast %160 : vector<96xf32> to vector<1x96xf32>
    %162 = vector.broadcast %161 : vector<1x96xf32> to vector<64x96xf32>
    %163 = arith.mulf %158, %162 : vector<64x96xf32>
    %164 = arith.addf %157, %163 : vector<64x96xf32>
    %165 = vector.extract_strided_slice %103 {offsets = [512, 0], sizes = [64, 96], strides = [1, 1]} : vector<576x96xf32> to vector<64x96xf32>
    %166 = vector.extract_strided_slice %104 {offsets = [8, 0], sizes = [1, 96], strides = [1, 1]} : vector<9x96xf32> to vector<1x96xf32>
    %167 = vector.shape_cast %166 : vector<1x96xf32> to vector<96xf32>
    %168 = vector.shape_cast %167 : vector<96xf32> to vector<1x96xf32>
    %169 = vector.broadcast %168 : vector<1x96xf32> to vector<64x96xf32>
    %170 = arith.mulf %165, %169 : vector<64x96xf32>
    %171 = arith.addf %164, %170 : vector<64x96xf32>
    %c0_57 = arith.constant 0 : index
    %c0_58 = arith.constant 0 : index
    %172 = vector.load %arg9[%c0_57, %c0_58] : memref<96x96xf32, #tpu.memory_space<vmem>>, vector<96x96xf32>
    %cst_59 = arith.constant dense<0.000000e+00> : vector<64x96xf32>
    %173 = tpu.matmul %171, %172, %cst_59 {dimension_numbers = #tpu.dot_dimension_numbers<[1], [0], [0], [1], [0, 0, 1, 1], [], []>} : vector<64x96xf32>, vector<96x96xf32>, vector<64x96xf32> -> vector<64x96xf32>
    %c0_60 = arith.constant 0 : index
    %c0_61 = arith.constant 0 : index
    %174 = vector.load %arg10[%c0_60, %c0_61] : memref<1x96xf32, #tpu.memory_space<vmem>>, vector<1x96xf32>
    %175 = vector.broadcast %174 : vector<1x96xf32> to vector<64x96xf32>
    %176 = arith.addf %173, %175 : vector<64x96xf32>
    %177 = vector.extract_strided_slice %176 {offsets = [0, 0], sizes = [64, 32], strides = [1, 1]} : vector<64x96xf32> to vector<64x32xf32>
    %178 = vector.extract_strided_slice %176 {offsets = [0, 32], sizes = [64, 32], strides = [1, 1]} : vector<64x96xf32> to vector<64x32xf32>
    %179 = vector.extract_strided_slice %176 {offsets = [0, 64], sizes = [64, 32], strides = [1, 1]} : vector<64x96xf32> to vector<64x32xf32>
    %180 = arith.mulf %177, %178 : vector<64x32xf32>
    %cst_62 = arith.constant 0.353553385 : f32
    %181 = vector.broadcast %cst_62 : f32 to vector<64x32xf32>
    %182 = arith.mulf %180, %181 : vector<64x32xf32>
    %cst_63 = arith.constant dense<0xFF800000> : vector<64xf32>
    %183 = vector.multi_reduction <maximumf>, %182, %cst_63 [1] : vector<64x32xf32> to vector<64xf32>
    %184 = vector.shape_cast %183 : vector<64xf32> to vector<64x1xf32>
    %185 = vector.broadcast %184 : vector<64x1xf32> to vector<64x32xf32>
    %186 = arith.subf %182, %185 : vector<64x32xf32>
    %187 = math.exp %186 : vector<64x32xf32>
    %c0_64 = arith.constant 0 : index
    %c0_65 = arith.constant 0 : index
    %188 = vector.load %arg11[%c0_64, %c0_65] : memref<32x32xf32, #tpu.memory_space<vmem>>, vector<32x32xf32>
    %cst_66 = arith.constant dense<0.000000e+00> : vector<64x32xf32>
    %189 = tpu.matmul %187, %188, %cst_66 {dimension_numbers = #tpu.dot_dimension_numbers<[1], [0], [0], [1], [0, 0, 1, 1], [], []>} : vector<64x32xf32>, vector<32x32xf32>, vector<64x32xf32> -> vector<64x32xf32>
    %190 = tpu.reciprocal %189 {approx = true} : vector<64x32xf32> -> vector<64x32xf32>
    %191 = arith.mulf %187, %190 : vector<64x32xf32>
    %192 = arith.mulf %191, %179 : vector<64x32xf32>
    %c0_67 = arith.constant 0 : index
    %c0_68 = arith.constant 0 : index
    %193 = vector.load %arg12[%c0_67, %c0_68] : memref<32x32xf32, #tpu.memory_space<vmem>>, vector<32x32xf32>
    %cst_69 = arith.constant dense<0.000000e+00> : vector<64x32xf32>
    %194 = tpu.matmul %192, %193, %cst_69 {dimension_numbers = #tpu.dot_dimension_numbers<[1], [0], [0], [1], [0, 0, 1, 1], [], []>} : vector<64x32xf32>, vector<32x32xf32>, vector<64x32xf32> -> vector<64x32xf32>
    %195 = arith.addf %194, %101 : vector<64x32xf32>
    %c0_70 = arith.constant 0 : index
    %c0_71 = arith.constant 0 : index
    %196 = vector.load %arg14[%c0_70, %c0_71] : memref<1x32xf32, #tpu.memory_space<vmem>>, vector<1x32xf32>
    %197 = vector.broadcast %196 : vector<1x32xf32> to vector<64x32xf32>
    %198 = arith.addf %195, %197 : vector<64x32xf32>
    %c0_72 = arith.constant 0 : index
    %c0_73 = arith.constant 0 : index
    %c0_74 = arith.constant 0 : index
    %199 = vector.load %arg15[%c0_72, %c0_73, %c0_74] : memref<1x64x32xf32, #tpu.memory_space<vmem>>, vector<1x64x32xf32>
    %200 = vector.shape_cast %199 : vector<1x64x32xf32> to vector<64x32xf32>
    %201 = vector.shape_cast %198 : vector<64x32xf32> to vector<1x64x32xf32>
    tpu.vector_store %arg15[%c0_72, %c0_73, %c0_74], %201 {strides = array<i32>} : memref<1x64x32xf32, #tpu.memory_space<vmem>>, vector<1x64x32xf32>,
    return
  }
  func.func @transform_0(%arg0: i32) -> (i32, i32, i32) {
    %c0_i32 = arith.constant 0 : i32
    %c0_i32_0 = arith.constant 0 : i32
    %c0_i32_1 = arith.constant 0 : i32
    return %arg0, %c0_i32, %c0_i32_0 : i32, i32, i32
  }
  func.func @transform_1(%arg0: i32) -> (i32, i32) {
    %c0_i32 = arith.constant 0 : i32
    %c0_i32_0 = arith.constant 0 : i32
    %c0_i32_1 = arith.constant 0 : i32
    return %c0_i32, %c0_i32_0 : i32, i32
  }
  func.func @transform_2(%arg0: i32) -> (i32, i32) {
    %c0_i32 = arith.constant 0 : i32
    %c0_i32_0 = arith.constant 0 : i32
    %c0_i32_1 = arith.constant 0 : i32
    return %c0_i32, %c0_i32_0 : i32, i32
  }
  func.func @transform_3(%arg0: i32) -> (i32, i32) {
    %c0_i32 = arith.constant 0 : i32
    %c0_i32_0 = arith.constant 0 : i32
    %c0_i32_1 = arith.constant 0 : i32
    return %c0_i32, %c0_i32_0 : i32, i32
  }
  func.func @transform_4(%arg0: i32) -> (i32, i32) {
    %c0_i32 = arith.constant 0 : i32
    %c0_i32_0 = arith.constant 0 : i32
    %c0_i32_1 = arith.constant 0 : i32
    return %c0_i32, %c0_i32_0 : i32, i32
  }
  func.func @transform_5(%arg0: i32) -> (i32, i32) {
    %c0_i32 = arith.constant 0 : i32
    %c0_i32_0 = arith.constant 0 : i32
    %c0_i32_1 = arith.constant 0 : i32
    return %c0_i32, %c0_i32_0 : i32, i32
  }
  func.func @transform_6(%arg0: i32) -> (i32, i32) {
    %c0_i32 = arith.constant 0 : i32
    %c0_i32_0 = arith.constant 0 : i32
    %c0_i32_1 = arith.constant 0 : i32
    return %c0_i32, %c0_i32_0 : i32, i32
  }
  func.func @transform_7(%arg0: i32) -> (i32, i32) {
    %c0_i32 = arith.constant 0 : i32
    %c0_i32_0 = arith.constant 0 : i32
    %c0_i32_1 = arith.constant 0 : i32
    return %c0_i32, %c0_i32_0 : i32, i32
  }
  func.func @transform_8(%arg0: i32) -> (i32, i32) {
    %c0_i32 = arith.constant 0 : i32
    %c0_i32_0 = arith.constant 0 : i32
    %c0_i32_1 = arith.constant 0 : i32
    return %c0_i32, %c0_i32_0 : i32, i32
  }
  func.func @transform_9(%arg0: i32) -> (i32, i32) {
    %c0_i32 = arith.constant 0 : i32
    %c0_i32_0 = arith.constant 0 : i32
    %c0_i32_1 = arith.constant 0 : i32
    return %c0_i32, %c0_i32_0 : i32, i32
  }
  func.func @transform_10(%arg0: i32) -> (i32, i32) {
    %c0_i32 = arith.constant 0 : i32
    %c0_i32_0 = arith.constant 0 : i32
    %c0_i32_1 = arith.constant 0 : i32
    return %c0_i32, %c0_i32_0 : i32, i32
  }
  func.func @transform_11(%arg0: i32) -> (i32, i32) {
    %c0_i32 = arith.constant 0 : i32
    %c0_i32_0 = arith.constant 0 : i32
    %c0_i32_1 = arith.constant 0 : i32
    return %c0_i32, %c0_i32_0 : i32, i32
  }
  func.func @transform_12(%arg0: i32) -> (i32, i32) {
    %c0_i32 = arith.constant 0 : i32
    %c0_i32_0 = arith.constant 0 : i32
    %c0_i32_1 = arith.constant 0 : i32
    return %c0_i32, %c0_i32_0 : i32, i32
  }
  func.func @transform_13(%arg0: i32) -> (i32, i32) {
    %c0_i32 = arith.constant 0 : i32
    %c0_i32_0 = arith.constant 0 : i32
    %c0_i32_1 = arith.constant 0 : i32
    return %c0_i32, %c0_i32_0 : i32, i32
  }
  func.func @transform_14(%arg0: i32) -> (i32, i32, i32) {
    %c0_i32 = arith.constant 0 : i32
    %c0_i32_0 = arith.constant 0 : i32
    %c0_i32_1 = arith.constant 0 : i32
    return %arg0, %c0_i32, %c0_i32_0 : i32, i32, i32
  }
}

module attributes {stable_mosaic.version = 11 : i64} {
  func.func @_post_kernel(%arg0: i32, %arg1: memref<1x64x32xf32, #tpu.memory_space<vmem>>, %arg2: memref<1x64x32xf32, #tpu.memory_space<vmem>>, %arg3: memref<64x64xf32, #tpu.memory_space<vmem>>, %arg4: memref<32x32xf32, #tpu.memory_space<vmem>>, %arg5: memref<1x32xf32, #tpu.memory_space<vmem>>, %arg6: memref<1x32xf32, #tpu.memory_space<vmem>>, %arg7: memref<32x128xf32, #tpu.memory_space<vmem>>, %arg8: memref<1x128xf32, #tpu.memory_space<vmem>>, %arg9: memref<128x32xf32, #tpu.memory_space<vmem>>, %arg10: memref<1x32xf32, #tpu.memory_space<vmem>>, %arg11: memref<1x64x32xf32, #tpu.memory_space<vmem>>) attributes {dimension_semantics = [#tpu.dimension_semantics<parallel>], iteration_bounds = array<i64: 2>, scalar_prefetch = 0 : i64, scratch_operands = 0 : i64, tpu.core_type = #tpu.core_type<tc>, window_params = [{transform_indices = @transform_0, window_bounds = array<i64: 1, 64, 32>}, {transform_indices = @transform_1, window_bounds = array<i64: 1, 64, 32>}, {pipeline_mode = #tpu.pipeline_mode<synchronous>, transform_indices = @transform_2, window_bounds = array<i64: 64, 64>}, {pipeline_mode = #tpu.pipeline_mode<synchronous>, transform_indices = @transform_3, window_bounds = array<i64: 32, 32>}, {pipeline_mode = #tpu.pipeline_mode<synchronous>, transform_indices = @transform_4, window_bounds = array<i64: 1, 32>}, {pipeline_mode = #tpu.pipeline_mode<synchronous>, transform_indices = @transform_5, window_bounds = array<i64: 1, 32>}, {pipeline_mode = #tpu.pipeline_mode<synchronous>, transform_indices = @transform_6, window_bounds = array<i64: 32, 128>}, {pipeline_mode = #tpu.pipeline_mode<synchronous>, transform_indices = @transform_7, window_bounds = array<i64: 1, 128>}, {pipeline_mode = #tpu.pipeline_mode<synchronous>, transform_indices = @transform_8, window_bounds = array<i64: 128, 32>}, {pipeline_mode = #tpu.pipeline_mode<synchronous>, transform_indices = @transform_9, window_bounds = array<i64: 1, 32>}, {transform_indices = @transform_10, window_bounds = array<i64: 1, 64, 32>}]} {
    %c0 = arith.constant 0 : index
    %c0_0 = arith.constant 0 : index
    %c0_1 = arith.constant 0 : index
    %0 = vector.load %arg1[%c0, %c0_0, %c0_1] : memref<1x64x32xf32, #tpu.memory_space<vmem>>, vector<1x64x32xf32>
    %1 = vector.shape_cast %0 : vector<1x64x32xf32> to vector<64x32xf32>
    %c0_2 = arith.constant 0 : index
    %c0_3 = arith.constant 0 : index
    %2 = vector.load %arg3[%c0_2, %c0_3] : memref<64x64xf32, #tpu.memory_space<vmem>>, vector<64x64xf32>
    %cst = arith.constant dense<0.000000e+00> : vector<64x32xf32>
    %3 = tpu.matmul %2, %1, %cst {dimension_numbers = #tpu.dot_dimension_numbers<[1], [0], [0], [1], [0, 0, 1, 1], [], []>} : vector<64x64xf32>, vector<64x32xf32>, vector<64x32xf32> -> vector<64x32xf32>
    %c0_4 = arith.constant 0 : index
    %c0_5 = arith.constant 0 : index
    %4 = vector.load %arg4[%c0_4, %c0_5] : memref<32x32xf32, #tpu.memory_space<vmem>>, vector<32x32xf32>
    %cst_6 = arith.constant dense<0.000000e+00> : vector<64x32xf32>
    %5 = tpu.matmul %3, %4, %cst_6 {dimension_numbers = #tpu.dot_dimension_numbers<[1], [0], [0], [1], [0, 0, 1, 1], [], []>} : vector<64x32xf32>, vector<32x32xf32>, vector<64x32xf32> -> vector<64x32xf32>
    %c0_7 = arith.constant 0 : index
    %c0_8 = arith.constant 0 : index
    %c0_9 = arith.constant 0 : index
    %6 = vector.load %arg2[%c0_7, %c0_8, %c0_9] : memref<1x64x32xf32, #tpu.memory_space<vmem>>, vector<1x64x32xf32>
    %7 = vector.shape_cast %6 : vector<1x64x32xf32> to vector<64x32xf32>
    %8 = arith.addf %5, %7 : vector<64x32xf32>
    %cst_10 = arith.constant dense<0.000000e+00> : vector<64xf32>
    %9 = vector.multi_reduction <add>, %8, %cst_10 [1] : vector<64x32xf32> to vector<64xf32>
    %10 = vector.shape_cast %9 : vector<64xf32> to vector<64x1xf32>
    %cst_11 = arith.constant 3.200000e+01 : f32
    %11 = vector.broadcast %cst_11 : f32 to vector<64x1xf32>
    %12 = arith.divf %10, %11 : vector<64x1xf32>
    %13 = vector.broadcast %12 : vector<64x1xf32> to vector<64x32xf32>
    %14 = arith.subf %8, %13 : vector<64x32xf32>
    %15 = arith.mulf %14, %14 : vector<64x32xf32>
    %cst_12 = arith.constant dense<0.000000e+00> : vector<64xf32>
    %16 = vector.multi_reduction <add>, %15, %cst_12 [1] : vector<64x32xf32> to vector<64xf32>
    %17 = vector.shape_cast %16 : vector<64xf32> to vector<64x1xf32>
    %cst_13 = arith.constant 3.200000e+01 : f32
    %18 = vector.broadcast %cst_13 : f32 to vector<64x1xf32>
    %19 = arith.divf %17, %18 : vector<64x1xf32>
    %cst_14 = arith.constant 9.99999997E-7 : f32
    %20 = vector.broadcast %cst_14 : f32 to vector<64x1xf32>
    %21 = arith.addf %19, %20 : vector<64x1xf32>
    %22 = math.rsqrt %21 : vector<64x1xf32>
    %23 = vector.broadcast %22 : vector<64x1xf32> to vector<64x32xf32>
    %24 = arith.mulf %14, %23 : vector<64x32xf32>
    %c0_15 = arith.constant 0 : index
    %c0_16 = arith.constant 0 : index
    %25 = vector.load %arg5[%c0_15, %c0_16] : memref<1x32xf32, #tpu.memory_space<vmem>>, vector<1x32xf32>
    %26 = vector.broadcast %25 : vector<1x32xf32> to vector<64x32xf32>
    %27 = arith.mulf %24, %26 : vector<64x32xf32>
    %c0_17 = arith.constant 0 : index
    %c0_18 = arith.constant 0 : index
    %28 = vector.load %arg6[%c0_17, %c0_18] : memref<1x32xf32, #tpu.memory_space<vmem>>, vector<1x32xf32>
    %29 = vector.broadcast %28 : vector<1x32xf32> to vector<64x32xf32>
    %30 = arith.addf %27, %29 : vector<64x32xf32>
    %c0_19 = arith.constant 0 : index
    %c0_20 = arith.constant 0 : index
    %31 = vector.load %arg7[%c0_19, %c0_20] : memref<32x128xf32, #tpu.memory_space<vmem>>, vector<32x128xf32>
    %cst_21 = arith.constant dense<0.000000e+00> : vector<64x128xf32>
    %32 = tpu.matmul %30, %31, %cst_21 {dimension_numbers = #tpu.dot_dimension_numbers<[1], [0], [0], [1], [0, 0, 1, 1], [], []>} : vector<64x32xf32>, vector<32x128xf32>, vector<64x128xf32> -> vector<64x128xf32>
    %c0_22 = arith.constant 0 : index
    %c0_23 = arith.constant 0 : index
    %33 = vector.load %arg8[%c0_22, %c0_23] : memref<1x128xf32, #tpu.memory_space<vmem>>, vector<1x128xf32>
    %34 = vector.broadcast %33 : vector<1x128xf32> to vector<64x128xf32>
    %35 = arith.addf %32, %34 : vector<64x128xf32>
    %36 = arith.mulf %35, %35 : vector<64x128xf32>
    %37 = arith.mulf %35, %36 : vector<64x128xf32>
    %cst_24 = arith.constant 4.471500e-02 : f32
    %38 = vector.broadcast %cst_24 : f32 to vector<64x128xf32>
    %39 = arith.mulf %38, %37 : vector<64x128xf32>
    %40 = arith.addf %35, %39 : vector<64x128xf32>
    %cst_25 = arith.constant 0.797884583 : f32
    %41 = vector.broadcast %cst_25 : f32 to vector<64x128xf32>
    %42 = arith.mulf %41, %40 : vector<64x128xf32>
    %43 = math.tanh %42 : vector<64x128xf32>
    %cst_26 = arith.constant 1.000000e+00 : f32
    %44 = vector.broadcast %cst_26 : f32 to vector<64x128xf32>
    %45 = arith.addf %44, %43 : vector<64x128xf32>
    %cst_27 = arith.constant 5.000000e-01 : f32
    %46 = vector.broadcast %cst_27 : f32 to vector<64x128xf32>
    %47 = arith.mulf %46, %45 : vector<64x128xf32>
    %48 = arith.mulf %35, %47 : vector<64x128xf32>
    %c0_28 = arith.constant 0 : index
    %c0_29 = arith.constant 0 : index
    %49 = vector.load %arg9[%c0_28, %c0_29] : memref<128x32xf32, #tpu.memory_space<vmem>>, vector<128x32xf32>
    %cst_30 = arith.constant dense<0.000000e+00> : vector<64x32xf32>
    %50 = tpu.matmul %48, %49, %cst_30 {dimension_numbers = #tpu.dot_dimension_numbers<[1], [0], [0], [1], [0, 0, 1, 1], [], []>} : vector<64x128xf32>, vector<128x32xf32>, vector<64x32xf32> -> vector<64x32xf32>
    %c0_31 = arith.constant 0 : index
    %c0_32 = arith.constant 0 : index
    %51 = vector.load %arg10[%c0_31, %c0_32] : memref<1x32xf32, #tpu.memory_space<vmem>>, vector<1x32xf32>
    %52 = vector.broadcast %51 : vector<1x32xf32> to vector<64x32xf32>
    %53 = arith.addf %50, %52 : vector<64x32xf32>
    %54 = arith.addf %53, %8 : vector<64x32xf32>
    %c0_33 = arith.constant 0 : index
    %c0_34 = arith.constant 0 : index
    %c0_35 = arith.constant 0 : index
    %55 = vector.load %arg11[%c0_33, %c0_34, %c0_35] : memref<1x64x32xf32, #tpu.memory_space<vmem>>, vector<1x64x32xf32>
    %56 = vector.shape_cast %55 : vector<1x64x32xf32> to vector<64x32xf32>
    %57 = vector.shape_cast %54 : vector<64x32xf32> to vector<1x64x32xf32>
    tpu.vector_store %arg11[%c0_33, %c0_34, %c0_35], %57 {strides = array<i32>} : memref<1x64x32xf32, #tpu.memory_space<vmem>>, vector<1x64x32xf32>,
    return
  }
  func.func @transform_0(%arg0: i32) -> (i32, i32, i32) {
    %c0_i32 = arith.constant 0 : i32
    %c0_i32_0 = arith.constant 0 : i32
    %c0_i32_1 = arith.constant 0 : i32
    return %arg0, %c0_i32, %c0_i32_0 : i32, i32, i32
  }
  func.func @transform_1(%arg0: i32) -> (i32, i32, i32) {
    %c0_i32 = arith.constant 0 : i32
    %c0_i32_0 = arith.constant 0 : i32
    %c0_i32_1 = arith.constant 0 : i32
    return %arg0, %c0_i32, %c0_i32_0 : i32, i32, i32
  }
  func.func @transform_2(%arg0: i32) -> (i32, i32) {
    %c0_i32 = arith.constant 0 : i32
    %c0_i32_0 = arith.constant 0 : i32
    %c0_i32_1 = arith.constant 0 : i32
    return %c0_i32, %c0_i32_0 : i32, i32
  }
  func.func @transform_3(%arg0: i32) -> (i32, i32) {
    %c0_i32 = arith.constant 0 : i32
    %c0_i32_0 = arith.constant 0 : i32
    %c0_i32_1 = arith.constant 0 : i32
    return %c0_i32, %c0_i32_0 : i32, i32
  }
  func.func @transform_4(%arg0: i32) -> (i32, i32) {
    %c0_i32 = arith.constant 0 : i32
    %c0_i32_0 = arith.constant 0 : i32
    %c0_i32_1 = arith.constant 0 : i32
    return %c0_i32, %c0_i32_0 : i32, i32
  }
  func.func @transform_5(%arg0: i32) -> (i32, i32) {
    %c0_i32 = arith.constant 0 : i32
    %c0_i32_0 = arith.constant 0 : i32
    %c0_i32_1 = arith.constant 0 : i32
    return %c0_i32, %c0_i32_0 : i32, i32
  }
  func.func @transform_6(%arg0: i32) -> (i32, i32) {
    %c0_i32 = arith.constant 0 : i32
    %c0_i32_0 = arith.constant 0 : i32
    %c0_i32_1 = arith.constant 0 : i32
    return %c0_i32, %c0_i32_0 : i32, i32
  }
  func.func @transform_7(%arg0: i32) -> (i32, i32) {
    %c0_i32 = arith.constant 0 : i32
    %c0_i32_0 = arith.constant 0 : i32
    %c0_i32_1 = arith.constant 0 : i32
    return %c0_i32, %c0_i32_0 : i32, i32
  }
  func.func @transform_8(%arg0: i32) -> (i32, i32) {
    %c0_i32 = arith.constant 0 : i32
    %c0_i32_0 = arith.constant 0 : i32
    %c0_i32_1 = arith.constant 0 : i32
    return %c0_i32, %c0_i32_0 : i32, i32
  }
  func.func @transform_9(%arg0: i32) -> (i32, i32) {
    %c0_i32 = arith.constant 0 : i32
    %c0_i32_0 = arith.constant 0 : i32
    %c0_i32_1 = arith.constant 0 : i32
    return %c0_i32, %c0_i32_0 : i32, i32
  }
  func.func @transform_10(%arg0: i32) -> (i32, i32, i32) {
    %c0_i32 = arith.constant 0 : i32
    %c0_i32_0 = arith.constant 0 : i32
    %c0_i32_1 = arith.constant 0 : i32
    return %arg0, %c0_i32, %c0_i32_0 : i32, i32, i32
  }
}

</mosaic_0001>

<bundles_post_ra>
// kernel: block_forward.3
= control target key start
LH: loop header
LB: loop body
LE: loop exit
PB: predicated region body
PF: predicated region fallthrough
CT: control target
= control target key end

     0   :  { %s1178_s24 = smov 0   ;;  %s1347_s0 = inlined_call_operand.vmem [shape: f32[2,64,32], index: 0, kind: input, shape index: {}]   ;;  %s1348_s1 = inlined_call_operand.vmem [shape: f32[1,32], index: 1, kind: input, shape index: {}]   ;;  %s1349_s2 = inlined_call_operand.vmem [shape: f32[1,32], index: 2, kind: input, shape index: {}]   ;;  %s1350_s3 = inlined_call_operand.vmem [shape: f32[64,64], index: 3, kind: input, shape index: {}]   ;;  %s1351_s4 = inlined_call_operand.vmem [shape: f32[32,32], index: 4, kind: input, shape index: {}]   ;;  %s1352_s5 = inlined_call_operand.vmem [shape: f32[32,96], index: 5, kind: input, shape index: {}]   ;;  %s1353_s6 = inlined_call_operand.vmem [shape: f32[1,96], index: 6, kind: input, shape index: {}]   ;;  %s1354_s7 = inlined_call_operand.vmem [shape: f32[2,64,96], index: 7, kind: output, shape index: {}]  }
   0x1 LB: > { %s922_s25 = sadd.s32 4294967295, %s1136_s24   ;;  %p926_p0 = scmp.ge.s32.totalorder %s1136_s24, 1  ;;  %s1136_s24 = sphi %s1178_s24, %s17_s24  }
   0x2   : > { %p237_p1 = scmp.lt.s32.totalorder %s1136_s24, 3 }
   0x4   : > { %p238_p2 = pnand %p926_p0, %p237_p1 }
   0x5   : > { %p269_p3 = scmp.lt.s32.totalorder (!%p238_p2), %s922_s25, 1  ;;  %vm287_vm0 = vcmask (!%p238_p2), 261120   ;;  %v423_v56 = vld [vmem:[%s1351_s4] sm:$0xff] (!%p238_p2)  ;;  %v424_v57 = vld [vmem:[%s1351_s4 + $0x8] sm:$0xff] (!%p238_p2)  ;;  %v425_v59 = vld [vmem:[%s1351_s4 + $0x10] sm:$0xff] (!%p238_p2)  ;;  %vm564_vm1 = vcmask (!%p238_p2), 523264  }
   0x6   : > { %241 = sbr.rel (%p238_p2) target bundleno = 1011 (0x3f3), region = 48  ;;  %v1070_v58 = vpack.c.bf16 (!%p238_p2), %v424_v57, %v423_v56  ;;  %v426_v60 = vld [vmem:[%s1351_s4 + $0x18] sm:$0xff] (!%p238_p2)  ;;  %vm858_vm10 = vcmask (!%p238_p2), 785408  }
   0x7   : > { %v1074_v61 = vpack.c.bf16 (!%p238_p2), %v426_v60, %v425_v59 }
   0x8   : > { %1071 = vmatprep.subr.bf16.mxu0 (!%p238_p2), %v1070_v58 }
   0x9   : > { %1073 = vmatpush3.bf16.msra.mxu0 (!%p238_p2), %v1070_v58  ;;  %v719_v58 = vld [vmem:[%s1352_s5 + $0x8] sm:$0xff] (!%p238_p2) }
   0xa   : > { %1075 = vmatprep.subr.bf16.mxu0 (!%p238_p2), %v1074_v61 }
   0xd   : > { %s1356_s25 = smov (!%p269_p3, %s922_s25), 1  ;;  %1077 = vmatpush3.bf16.msra.mxu0 %v1074_v61 }
   0xe   : > { %s960_s26 = sshll.u32 %s1356_s25, 6 }
   0xf   : > { %s273_s29 = scalar_lea.vmem %s1347_s0, %s960_s26  ;;  %s278_s30 = scalar_lea.vmem %s1354_s7, %s960_s26 }
  0x10   : > { %v279_v0 = vld [vmem:[%s273_s29] sm:$0xff]  ;;  %v281_v1 = vld [vmem:[%s273_s29 + $0x10] sm:$0xff]  ;;  %v280_v2 = vld [vmem:[%s273_s29 + $0x8] sm:$0xff] }
  0x11   : > { %v288_v3 = vsel %vm287_vm0, %v279_v0, 0.0  ;;  %v294_v4 = vsel %vm287_vm0, %v281_v1, 0.0  ;;  %v282_v5 = vld [vmem:[%s273_s29 + $0x18] sm:$0xff]  ;;  %v291_v6 = vsel %vm287_vm0, %v280_v2, 0.0  ;;  %v283_v8 = vld [vmem:[%s273_s29 + $0x20] sm:$0xff]  ;;  %v284_v9 = vld [vmem:[%s273_s29 + $0x28] sm:$0xff] }
  0x12   : > { %289 = vadd.xlane.f32.xlu0 %v288_v3  ;;  %295 = vadd.xlane.f32.xlu1 %v294_v4  ;;  %v297_v7 = vsel %vm287_vm0, %v282_v5, 0.0  ;;  %v300_v10 = vsel %vm287_vm0, %v283_v8, 0.0  ;;  %v303_v11 = vsel %vm287_vm0, %v284_v9, 0.0  ;;  %v285_v12 = vld [vmem:[%s273_s29 + $0x30] sm:$0xff]  ;;  %v286_v13 = vld [vmem:[%s273_s29 + $0x38] sm:$0xff] }
  0x13   : > { %v306_v14 = vsel %vm287_vm0, %v285_v12, 0.0  ;;  %v309_v15 = vsel %vm287_vm0, %v286_v13, 0.0 }
  0x16   : > { %292 = vadd.xlane.f32.xlu0 %v291_v6  ;;  %298 = vadd.xlane.f32.xlu1 %v297_v7 }
  0x1a   : > { %301 = vadd.xlane.f32.xlu0 %v300_v10  ;;  %304 = vadd.xlane.f32.xlu1 %v303_v11 }
  0x1e   : > { %307 = vadd.xlane.f32.xlu0 %v306_v14  ;;  %310 = vadd.xlane.f32.xlu1 %v309_v15 }
  0x9f   : > { %v290_v16 = vpop.xlane.xlu0 %289  ;;  %v296_v17 = vpop.xlane.xlu1 %295 }
  0xa0   : > { %v313_v18 = vmul.f32 0.03125, %v290_v16  ;;  %v315_v19 = vmul.f32 0.03125, %v296_v17 }
  0xa2   : > { %v1202_v20 = vsub.f32 %v279_v0, %v313_v18  ;;  %v1204_v21 = vsub.f32 %v281_v1, %v315_v19 }
  0xa3   : > { %v293_v22 = vpop.xlane.xlu0 %292  ;;  %v299_v23 = vpop.xlane.xlu1 %298 }
  0xa4   : > { %v314_v24 = vmul.f32 0.03125, %v293_v22  ;;  %v316_v25 = vmul.f32 0.03125, %v299_v23  ;;  %v329_v26 = vmul.f32 %v1202_v20, %v1202_v20  ;;  %v331_v27 = vmul.f32 %v1204_v21, %v1204_v21  ;;  %v931_v22 = vld [vmem:[%s1348_s1] ss:$0 sm:$0xff] }
  0xa6   : > { %v1210_v28 = vsub.f32 %v280_v2, %v314_v24  ;;  %v1212_v29 = vsub.f32 %v282_v5, %v316_v25  ;;  %v337_v30 = vsel %vm287_vm0, %v329_v26, 0.0  ;;  %v343_v33 = vsel %vm287_vm0, %v331_v27, 0.0  ;;  %v932_v26 = vld [vmem:[%s1349_s2] ss:$0 sm:$0xff] }
  0xa7   : > { %338 = vadd.xlane.f32.xlu0 %v337_v30  ;;  %v302_v31 = vpop.xlane.xlu0 %301  ;;  %v305_v32 = vpop.xlane.xlu1 %304 }
  0xa8   : > { %v317_v34 = vmul.f32 0.03125, %v302_v31  ;;  %v318_v35 = vmul.f32 0.03125, %v305_v32  ;;  %v330_v36 = vmul.f32 %v1210_v28, %v1210_v28  ;;  %v332_v37 = vmul.f32 %v1212_v29, %v1212_v29 }
  0xaa   : > { %v1220_v38 = vsub.f32 %v283_v8, %v317_v34  ;;  %v1222_v39 = vsub.f32 %v284_v9, %v318_v35  ;;  %v340_v40 = vsel %vm287_vm0, %v330_v36, 0.0  ;;  %v346_v43 = vsel %vm287_vm0, %v332_v37, 0.0 }
  0xab   : > { %344 = vadd.xlane.f32.xlu0 %v343_v33  ;;  %341 = vadd.xlane.f32.xlu1 %v340_v40  ;;  %v308_v41 = vpop.xlane.xlu0 %307  ;;  %v311_v42 = vpop.xlane.xlu1 %310 }
  0xac   : > { %v319_v44 = vmul.f32 0.03125, %v308_v41  ;;  %v320_v45 = vmul.f32 0.03125, %v311_v42  ;;  %v333_v46 = vmul.f32 %v1220_v38, %v1220_v38  ;;  %v334_v47 = vmul.f32 %v1222_v39, %v1222_v39 }
  0xae   : > { %v1230_v48 = vsub.f32 %v285_v12, %v319_v44  ;;  %v1232_v49 = vsub.f32 %v286_v13, %v320_v45  ;;  %v349_v50 = vsel %vm287_vm0, %v333_v46, 0.0  ;;  %v352_v51 = vsel %vm287_vm0, %v334_v47, 0.0 }
  0xaf   : > { %347 = vadd.xlane.f32.xlu1 %v346_v43  ;;  %350 = vadd.xlane.f32.xlu0 %v349_v50 }
  0xb0   : > { %v335_v52 = vmul.f32 %v1230_v48, %v1230_v48  ;;  %v336_v53 = vmul.f32 %v1232_v49, %v1232_v49 }
  0xb2   : > { %v355_v54 = vsel %vm287_vm0, %v335_v52, 0.0  ;;  %v358_v55 = vsel %vm287_vm0, %v336_v53, 0.0 }
  0xb3   : > { %353 = vadd.xlane.f32.xlu1 %v352_v51  ;;  %356 = vadd.xlane.f32.xlu0 %v355_v54 }
  0xb7   : > { %359 = vadd.xlane.f32.xlu1 %v358_v55 }
 0x134   : > { %v339_v62 = vpop.xlane.xlu0 %338 }
 0x135   : > { %v361_v63 = vmul.f32 0.03125, %v339_v62 }
 0x137   : > { %v369_v0 = vadd.f32 1e-06, %v361_v63 }
 0x138   : > { %v342_v1 = vpop.xlane.xlu1 %341  ;;  %v345_v2 = vpop.xlane.xlu0 %344 }
 0x139   : > { %1114 = vrsqrt.f32 %v369_v0  ;;  %v362_v3 = vmul.f32 0.03125, %v342_v1  ;;  %v363_v4 = vmul.f32 0.03125, %v345_v2 }
 0x13b   : > { %v370_v5 = vadd.f32 1e-06, %v362_v3  ;;  %v371_v6 = vadd.f32 1e-06, %v363_v4 }
 0x13c   : > { %v348_v7 = vpop.xlane.xlu1 %347  ;;  %v351_v8 = vpop.xlane.xlu0 %350 }
 0x13d   : > { %1116 = vrsqrt.f32 %v370_v5  ;;  %v364_v9 = vmul.f32 0.03125, %v348_v7  ;;  %v365_v10 = vmul.f32 0.03125, %v351_v8  ;;  %v557_v8 = vld [vmem:[%s1350_s3 + $0x8] sm:$0xff] }
 0x13e   : > { %1118 = vrsqrt.f32 %v371_v6 }
 0x13f   : > { %v372_v11 = vadd.f32 1e-06, %v364_v9  ;;  %v373_v12 = vadd.f32 1e-06, %v365_v10  ;;  %v558_v9 = vld [vmem:[%s1350_s3 + $0x10] sm:$0xff]  ;;  %v559_v10 = vld [vmem:[%s1350_s3 + $0x18] sm:$0xff] }
 0x140   : > { %v354_v13 = vpop.xlane.xlu1 %353  ;;  %v357_v14 = vpop.xlane.xlu0 %356 }
 0x141   : > { %1120 = vrsqrt.f32 %v372_v11  ;;  %v366_v15 = vmul.f32 0.03125, %v354_v13  ;;  %v367_v16 = vmul.f32 0.03125, %v357_v14  ;;  %v560_v11 = vld [vmem:[%s1350_s3 + $0x20] sm:$0xff]  ;;  %v562_v13 = vld [vmem:[%s1350_s3 + $0x30] sm:$0xff]  ;;  %v563_v14 = vld [vmem:[%s1350_s3 + $0x38] sm:$0xff] }
 0x142   : > { %1122 = vrsqrt.f32 %v373_v12  ;;  %v561_v12 = vld [vmem:[%s1350_s3 + $0x28] sm:$0xff] }
 0x143   : > { %v1115_v17 = vpop.eup %1114  ;;  %v374_v18 = vadd.f32 1e-06, %v366_v15  ;;  %v375_v19 = vadd.f32 1e-06, %v367_v16  ;;  %v720_v15 = vld [vmem:[%s1352_s5 + $0x10] sm:$0xff]  ;;  %v721_v16 = vld [vmem:[%s1352_s5 + $0x18] sm:$0xff] }
 0x144   : > { %v360_v23 = vpop.xlane.xlu1 %359  ;;  %v385_v24 = vmul.f32 %v1115_v17, %v1202_v20  ;;  %v1098_v17 = vpack.c.bf16 %v721_v16, %v720_v15 }
 0x145   : > { %1124 = vrsqrt.f32 %v374_v18  ;;  %v368_v25 = vmul.f32 0.03125, %v360_v23 }
 0x146   : > { %1126 = vrsqrt.f32 %v375_v19  ;;  %v400_v27 = vmul.f32 %v931_v22, %v385_v24 }
 0x147   : > { %v1117_v30 = vpop.eup %1116  ;;  %v376_v31 = vadd.f32 1e-06, %v368_v25 }
 0x148   : > { %v1119_v32 = vpop.eup %1118  ;;  %v415_v33 = vadd.f32 %v932_v26, %v400_v27  ;;  %v386_v34 = vmul.f32 %v1117_v30, %v1210_v28 }
 0x149   : > { %1128 = vrsqrt.f32 %v376_v31  ;;  %v387_v35 = vmul.f32 %v1119_v32, %v1204_v21 }
 0x14a   : > { %1010 = vmatprep.mubr.msk.f32.mxu0 %vm287_vm0, %v415_v33  ;;  %v401_v20 = vmul.f32 %v931_v22, %v386_v34 }
 0x14b   : > { %v1121_v36 = vpop.eup %1120  ;;  %v402_v37 = vmul.f32 %v931_v22, %v387_v35 }
 0x14c   : > { %v1123_v40 = vpop.eup %1122  ;;  %v416_v41 = vadd.f32 %v932_v26, %v401_v20  ;;  %v388_v42 = vmul.f32 %v1121_v36, %v1212_v29 }
 0x14d   : > { %v417_v43 = vadd.f32 %v932_v26, %v402_v37  ;;  %v389_v44 = vmul.f32 %v1123_v40, %v1220_v38 }
 0x14e   : > { %1011 = vmatmul.mubr.msk.f32.vlgmr.msra.gmra.mrb[0].mxu0 %vm287_vm0, %v416_v41  ;;  %v403_v45 = vmul.f32 %v931_v22, %v388_v42 }
 0x14f   : > { %v1125_v46 = vpop.eup %1124  ;;  %1013 = vmatprep.mubr.msk.f32.mxu0 %vm287_vm0, %v417_v43  ;;  %v404_v28 = vmul.f32 %v931_v22, %v389_v44 }
 0x150   : > { %v1127_v21 = vpop.eup %1126  ;;  %v418_v47 = vadd.f32 %v932_v26, %v403_v45  ;;  %v390_v50 = vmul.f32 %v1125_v46, %v1222_v39 }
 0x151   : > { %v419_v51 = vadd.f32 %v932_v26, %v404_v28  ;;  %v391_v52 = vmul.f32 %v1127_v21, %v1230_v48  ;;  %v556_v48 = vld [vmem:[%s1350_s3] sm:$0xff] }
 0x152   : > { %1014 = vmatmul.mubr.msk.f32.gmra.mrb[2].mxu0 %vm287_vm0, %v418_v47  ;;  %v405_v29 = vmul.f32 %v931_v22, %v390_v50  ;;  %1038 = vmatprep.mubr.msk.f32.mxu1 %vm564_vm1, %v556_v48  ;;  %v949_v28 = vld [vmem:[%s1353_s6] ss:$0 sm:$0xff] }
 0x153   : > { %v1129_v53 = vpop.eup %1128  ;;  %1016 = vmatprep.mubr.msk.f32.mxu0 %vm287_vm0, %v419_v51  ;;  %v406_v38 = vmul.f32 %v931_v22, %v391_v52 }
 0x154   : > { %v420_v54 = vadd.f32 %v932_v26, %v405_v29  ;;  %v392_v55 = vmul.f32 %v1129_v53, %v1232_v49  ;;  %v718_v49 = vld [vmem:[%s1352_s5] sm:$0xff] }
 0x155   : > { %v421_v56 = vadd.f32 %v932_v26, %v406_v38  ;;  %v1094_v59 = vpack.c.bf16 %v719_v58, %v718_v49 }
 0x156   : > { %1017 = vmatmul.mubr.msk.f32.gmra.mrb[4].mxu0 %vm287_vm0, %v420_v54  ;;  %v407_v57 = vmul.f32 %v931_v22, %v392_v55 }
 0x157   : > { %1019 = vmatprep.mubr.msk.f32.mxu0 %vm287_vm0, %v421_v56  ;;  %1095 = vmatprep.subr.bf16.mxu0 %v1094_v59 }
 0x158   : > { %v422_v39 = vadd.f32 %v932_v26, %v407_v57  ;;  %1097 = vmatpush3.bf16.msra.mxu0 %v1094_v59 }
 0x159   : > { %1099 = vmatprep.subr.bf16.mxu0 %v1098_v17 }
 0x15a   : > { %1020 = vmatmul.mubr.msk.f32.gmra.mrb[6].mxu0 %vm287_vm0, %v422_v39 }
 0x15c   : > { %1101 = vmatpush3.bf16.msra.mxu0 %v1098_v17 }
 0x221   : > { %v1012_v60 = vpop.f32.mrb[0].mxu0 }
 0x222   : > { %v517_v61 = vpop.f32.mrb[1].mxu0 }
 0x223   : > { %v1078_v62 = vpack.c.bf16 %v1012_v60, %v517_v61 }
 0x225   : > { %v1015_v63 = vpop.f32.mrb[2].mxu0  ;;  %1079 = vmatprep.subr.bf16.mxu1 %v1078_v62 }
 0x226   : > { %v527_v0 = vpop.f32.mrb[3].mxu0  ;;  %1081 = vmatpush3.bf16.msra.mxu1 %v1078_v62 }
 0x227   : > { %v1082_v1 = vpack.c.bf16 %v1015_v63, %v527_v0 }
 0x229   : > { %v1018_v2 = vpop.f32.mrb[4].mxu0  ;;  %1083 = vmatprep.subr.bf16.mxu1 %v1082_v1 }
 0x22a   : > { %v537_v3 = vpop.f32.mrb[5].mxu0  ;;  %1085 = vmatpush3.bf16.msra.mxu1 %v1082_v1 }
 0x22b   : > { %v1086_v4 = vpack.c.bf16 %v1018_v2, %v537_v3 }
 0x22d   : > { %v1021_v5 = vpop.f32.mrb[6].mxu0  ;;  %1087 = vmatprep.subr.bf16.mxu1 %v1086_v4 }
 0x22e   : > { %v547_v6 = vpop.f32.mrb[7].mxu0  ;;  %1089 = vmatpush3.bf16.msra.mxu1 %v1086_v4 }
 0x22f   : > { %v1090_v7 = vpack.c.bf16 %v1021_v5, %v547_v6 }
 0x231   : > { %1091 = vmatprep.subr.bf16.mxu1 %v1090_v7 }
 0x232   : > { %1093 = vmatpush3.bf16.msra.mxu1 %v1090_v7 }
 0x233   : > { %1102 = vmatprep.subr.bf16.mxu1 %v1094_v59 }
 0x235   : > { %1039 = vmatmul.mubr.msk.f32.vlgmr.msra.gmra.mrb[0].mxu1 %vm564_vm1, %v557_v8 }
 0x236   : > { %1041 = vmatprep.mubr.msk.f32.mxu1 %vm564_vm1, %v558_v9  ;;  %1104 = vmatpush3.bf16.msra.mxu1 %v1094_v59 }
 0x237   : > { %1103 = vmatprep.subr.bf16.mxu1 %v1098_v17 }
 0x239   : > { %1042 = vmatmul.mubr.msk.f32.gmra.mrb[2].mxu1 %vm564_vm1, %v559_v10 }
 0x23a   : > { %1044 = vmatprep.mubr.msk.f32.mxu1 %vm564_vm1, %v560_v11  ;;  %1105 = vmatpush3.bf16.msra.mxu1 %v1098_v17 }
 0x23d   : > { %1045 = vmatmul.mubr.msk.f32.gmra.mrb[4].mxu1 %vm564_vm1, %v561_v12 }
 0x23e   : > { %1047 = vmatprep.mubr.msk.f32.mxu1 %vm564_vm1, %v562_v13 }
 0x241   : > { %1048 = vmatmul.mubr.msk.f32.gmra.mrb[6].mxu1 %vm564_vm1, %v563_v14 }
 0x308   : > { %v1040_v18 = vpop.f32.mrb[0].mxu1 }
 0x309   : > { %v695_v19 = vand.u32 2147483647, %v1040_v18  ;;  %v655_v22 = vpop.f32.mrb[1].mxu1 }
 0x30a   : > { %v694_v23 = vand.u32 2147483647, %v655_v22 }
 0x30b   : > { %vm703_vm2 = vcmp.gt.f32.partialorder %v695_v19, 0.01 }
 0x30c   : > { %vm702_vm3 = vcmp.gt.f32.partialorder %v694_v23, 0.01  ;;  %v1043_v24 = vpop.f32.mrb[2].mxu1  ;;  %v711_v30 = vsel %vm703_vm2, %v1040_v18, 0.0 }
 0x30d   : > { %v710_v25 = vsel %vm702_vm3, %v655_v22, 0.0  ;;  %v697_v26 = vand.u32 2147483647, %v1043_v24  ;;  %v665_v27 = vpop.f32.mrb[3].mxu1 }
 0x30e   : > { %v696_v31 = vand.u32 2147483647, %v665_v27  ;;  %1058 = vmatprep.mubr.msk.f32.mxu0 %vm287_vm0, %v710_v25 }
 0x30f   : > { %vm705_vm4 = vcmp.gt.f32.partialorder %v697_v26, 0.01  ;;  %1059 = vmatmul.mubr.msk.f32.vlgmr.msra.gmra.mrb[8].mxu0 %vm287_vm0, %v711_v30 }
 0x310   : > { %vm704_vm5 = vcmp.gt.f32.partialorder %v696_v31, 0.01  ;;  %v1046_v32 = vpop.f32.mrb[4].mxu1  ;;  %v713_v20 = vsel %vm705_vm4, %v1043_v24, 0.0 }
 0x311   : > { %v712_v33 = vsel %vm704_vm5, %v665_v27, 0.0  ;;  %v699_v34 = vand.u32 2147483647, %v1046_v32  ;;  %v675_v35 = vpop.f32.mrb[5].mxu1 }
 0x312   : > { %v698_v36 = vand.u32 2147483647, %v675_v35  ;;  %1061 = vmatprep.mubr.msk.f32.mxu0 %vm287_vm0, %v712_v33 }
 0x313   : > { %vm707_vm6 = vcmp.gt.f32.partialorder %v699_v34, 0.01  ;;  %1062 = vmatmul.mubr.msk.f32.gmra.mrb[10].mxu0 %vm287_vm0, %v713_v20 }
 0x314   : > { %vm706_vm7 = vcmp.gt.f32.partialorder %v698_v36, 0.01  ;;  %v1049_v37 = vpop.f32.mrb[6].mxu1  ;;  %v715_v43 = vsel %vm707_vm6, %v1046_v32, 0.0 }
 0x315   : > { %v714_v40 = vsel %vm706_vm7, %v675_v35, 0.0  ;;  %v701_v41 = vand.u32 2147483647, %v1049_v37  ;;  %v685_v42 = vpop.f32.mrb[7].mxu1 }
 0x316   : > { %v700_v44 = vand.u32 2147483647, %v685_v42  ;;  %1064 = vmatprep.mubr.msk.f32.mxu0 %vm287_vm0, %v714_v40 }
 0x317   : > { %vm709_vm8 = vcmp.gt.f32.partialorder %v701_v41, 0.01  ;;  %1065 = vmatmul.mubr.msk.f32.gmra.mrb[12].mxu0 %vm287_vm0, %v715_v43 }
 0x318   : > { %vm708_vm9 = vcmp.gt.f32.partialorder %v700_v44, 0.01  ;;  %v717_v46 = vsel %vm709_vm8, %v1049_v37, 0.0 }
 0x319   : > { %v716_v45 = vsel %vm708_vm9, %v685_v42, 0.0 }
 0x31a   : > { %1067 = vmatprep.mubr.msk.f32.mxu1 %vm287_vm0, %v716_v45 }
 0x31b   : > { %1068 = vmatmul.mubr.msk.f32.vlgmr.msra.gmra.mrb[8].mxu1 %vm287_vm0, %v717_v46 }
 0x3e2   : > { %v1060_v21 = vpop.f32.mrb[8].mxu0 }
 0x3e3   : > { %v825_v47 = vadd.f32 %v1060_v21, %v949_v28  ;;  %v819_v50 = vpop.f32.mrb[9].mxu0 }
 0x3e4   : > { %v820_v51 = vadd.f32 %v949_v28, %v819_v50 }
 0x3e5   : > { %860 = vst.msk [vmem:[%s278_s30 + $0x8] sm:$0xff] %vm858_vm10, %v825_v47 }
 0x3e6   : > { %859 = vst.msk [vmem:[%s278_s30] sm:$0xff] %vm858_vm10, %v820_v51  ;;  %v1063_v52 = vpop.f32.mrb[10].mxu0 }
 0x3e7   : > { %v835_v29 = vadd.f32 %v1063_v52, %v949_v28  ;;  %v829_v53 = vpop.f32.mrb[11].mxu0 }
 0x3e8   : > { %v830_v38 = vadd.f32 %v949_v28, %v829_v53 }
 0x3e9   : > { %862 = vst.msk [vmem:[%s278_s30 + $0x18] sm:$0xff] %vm858_vm10, %v835_v29 }
 0x3ea   : > { %861 = vst.msk [vmem:[%s278_s30 + $0x10] sm:$0xff] %vm858_vm10, %v830_v38  ;;  %v1066_v54 = vpop.f32.mrb[12].mxu0 }
 0x3eb   : > { %v845_v55 = vadd.f32 %v1066_v54, %v949_v28  ;;  %v839_v56 = vpop.f32.mrb[13].mxu0 }
 0x3ec   : > { %v840_v57 = vadd.f32 %v949_v28, %v839_v56 }
 0x3ed   : > { %864 = vst.msk [vmem:[%s278_s30 + $0x28] sm:$0xff] %vm858_vm10, %v845_v55 }
 0x3ee   : > { %863 = vst.msk [vmem:[%s278_s30 + $0x20] sm:$0xff] %vm858_vm10, %v840_v57  ;;  %v1069_v39 = vpop.f32.mrb[8].mxu1 }
 0x3ef   : > { %v855_v48 = vadd.f32 %v1069_v39, %v949_v28  ;;  %v849_v49 = vpop.f32.mrb[9].mxu1 }
 0x3f0   : > { %v850_v58 = vadd.f32 %v949_v28, %v849_v49 }
 0x3f1   : > { %866 = vst.msk [vmem:[%s278_s30 + $0x38] sm:$0xff] %vm858_vm10, %v855_v48 }
 0x3f2   : > { %865 = vst.msk [vmem:[%s278_s30 + $0x30] sm:$0xff] %vm858_vm10, %v850_v58 }
 0x3f3 PF: > { %s17_s24 = sadd.s32 1, %s1136_s24  }
 0x3f4   : > { %p14_p4 = scmp.ge.s32.totalorder %s17_s24, 4  }
 0x3f6   :  { %16 = sbr.rel (!%p14_p4) target bundleno = 1 (0x1), region = 78 }

// kernel: block_forward.5
= control target key start
LH: loop header
LB: loop body
LE: loop exit
PB: predicated region body
PF: predicated region fallthrough
CT: control target
= control target key end

     0   :  { %s1629_s13 = smov 0   ;;  %s1939_s0 = inlined_call_operand.vmem [shape: f32[2,64,32], index: 0, kind: input, shape index: {}]   ;;  %s1940_s1 = inlined_call_operand.vmem [shape: f32[2,64,32], index: 1, kind: input, shape index: {}]   ;;  %s1941_s2 = inlined_call_operand.vmem [shape: f32[64,64], index: 2, kind: input, shape index: {}]   ;;  %s1942_s3 = inlined_call_operand.vmem [shape: f32[32,32], index: 3, kind: input, shape index: {}]   ;;  %s1943_s4 = inlined_call_operand.vmem [shape: f32[1,32], index: 4, kind: input, shape index: {}]   ;;  %s1944_s5 = inlined_call_operand.vmem [shape: f32[1,32], index: 5, kind: input, shape index: {}]   ;;  %s1945_s6 = inlined_call_operand.vmem [shape: f32[32,128], index: 6, kind: input, shape index: {}]   ;;  %s1946_s7 = inlined_call_operand.vmem [shape: f32[1,128], index: 7, kind: input, shape index: {}]   ;;  %s1947_s8 = inlined_call_operand.vmem [shape: f32[128,32], index: 8, kind: input, shape index: {}]   ;;  %s1948_s9 = inlined_call_operand.vmem [shape: f32[1,32], index: 9, kind: input, shape index: {}]   ;;  %s1949_s10 = inlined_call_operand.vmem [shape: f32[2,64,32], index: 10, kind: output, shape index: {}]  }
   0x1 LB: > { %s1226_s14 = sadd.s32 4294967295, %s1572_s13   ;;  %p1230_p0 = scmp.ge.s32.totalorder %s1572_s13, 1  ;;  %s1572_s13 = sphi %s1629_s13, %s20_s13  }
   0x2   : > { %p322_p1 = scmp.lt.s32.totalorder %s1572_s13, 3 }
   0x4   : > { %p323_p2 = pnand %p1230_p0, %p322_p1 }
   0x5   : > { %p365_p3 = scmp.lt.s32.totalorder (!%p323_p2), %s1226_s14, 1  ;;  %v388_v0 = vld [vmem:[%s1941_s2] sm:$0xff] (!%p323_p2)  ;;  %vm396_vm0 = vcmask (!%p323_p2), 523264   ;;  %v527_v2 = vld [vmem:[%s1942_s3 + $0x8] sm:$0xff] (!%p323_p2)  ;;  %v528_v3 = vld [vmem:[%s1942_s3 + $0x10] sm:$0xff] (!%p323_p2)  ;;  %vm538_vm1 = vcmask (!%p323_p2), 261120  }
   0x6   : > { %326 = sbr.rel (%p323_p2) target bundleno = 1254 (0x4e6), region = 60  ;;  %1350 = vmatprep.mubr.msk.f32.mxu0 (!%p323_p2), %vm396_vm0, %v388_v0  ;;  %v526_v1 = vld [vmem:[%s1942_s3] sm:$0xff] (!%p323_p2)  ;;  %v529_v4 = vld [vmem:[%s1942_s3 + $0x18] sm:$0xff] (!%p323_p2)  ;;  %v389_v19 = vld [vmem:[%s1941_s2 + $0x8] sm:$0xff] (!%p323_p2) }
   0x7   : > { %v1462_v5 = vpack.c.bf16 (!%p323_p2), %v527_v2, %v526_v1  ;;  %v1466_v6 = vpack.c.bf16 (!%p323_p2), %v529_v4, %v528_v3  ;;  %v390_v20 = vld [vmem:[%s1941_s2 + $0x10] sm:$0xff] (!%p323_p2)  ;;  %v391_v21 = vld [vmem:[%s1941_s2 + $0x18] sm:$0xff] (!%p323_p2)  ;;  %v392_v22 = vld [vmem:[%s1941_s2 + $0x20] sm:$0xff] (!%p323_p2) }
   0x8   : > { %v393_v23 = vld [vmem:[%s1941_s2 + $0x28] sm:$0xff] (!%p323_p2)  ;;  %v394_v24 = vld [vmem:[%s1941_s2 + $0x30] sm:$0xff] (!%p323_p2)  ;;  %v395_v25 = vld [vmem:[%s1941_s2 + $0x38] sm:$0xff] (!%p323_p2) }
   0x9   : > { %1463 = vmatprep.subr.bf16.mxu1 (!%p323_p2), %v1462_v5 }
   0xa   : > { %1465 = vmatpush3.bf16.msra.mxu1 (!%p323_p2), %v1462_v5 }
   0xb   : > { %1467 = vmatprep.subr.bf16.mxu1 (!%p323_p2), %v1466_v6 }
   0xd   : > { %s1951_s14 = smov (!%p365_p3, %s1226_s14), 1 }
   0xe   : > { %s1653_s25 = sshll.u32 %s1951_s14, 6  ;;  %1469 = vmatpush3.bf16.msra.mxu1 %v1466_v6 }
   0xf   : > { %s369_s28 = scalar_lea.vmem %s1939_s0, %s1653_s25  ;;  %s374_s27 = scalar_lea.vmem %s1940_s1, %s1653_s25 }
  0x10   : > { %v380_v7 = vld [vmem:[%s369_s28] sm:$0xff]  ;;  %v381_v8 = vld [vmem:[%s369_s28 + $0x8] sm:$0xff]  ;;  %v382_v9 = vld [vmem:[%s369_s28 + $0x10] sm:$0xff]  ;;  %s379_s23 = scalar_lea.vmem %s1949_s10, %s1653_s25 }
  0x11   : > { %v1446_v10 = vpack.c.bf16 %v381_v8, %v380_v7  ;;  %v383_v11 = vld [vmem:[%s369_s28 + $0x18] sm:$0xff]  ;;  %v384_v13 = vld [vmem:[%s369_s28 + $0x20] sm:$0xff]  ;;  %v385_v14 = vld [vmem:[%s369_s28 + $0x28] sm:$0xff] }
  0x12   : > { %v1450_v12 = vpack.c.bf16 %v383_v11, %v382_v9  ;;  %v1454_v15 = vpack.c.bf16 %v385_v14, %v384_v13  ;;  %v386_v16 = vld [vmem:[%s369_s28 + $0x30] sm:$0xff]  ;;  %v387_v17 = vld [vmem:[%s369_s28 + $0x38] sm:$0xff]  ;;  %v530_v34 = vld [vmem:[%s374_s27] sm:$0xff] }
  0x13   : > { %1447 = vmatprep.subr.bf16.mxu0 %v1446_v10  ;;  %v1458_v18 = vpack.c.bf16 %v387_v17, %v386_v16  ;;  %v531_v36 = vld [vmem:[%s374_s27 + $0x8] sm:$0xff]  ;;  %v532_v39 = vld [vmem:[%s374_s27 + $0x10] sm:$0xff]  ;;  %v533_v43 = vld [vmem:[%s374_s27 + $0x18] sm:$0xff] }
  0x14   : > { %1449 = vmatpush3.bf16.msra.mxu0 %v1446_v10  ;;  %v534_v46 = vld [vmem:[%s374_s27 + $0x20] sm:$0xff]  ;;  %v535_v51 = vld [vmem:[%s374_s27 + $0x28] sm:$0xff]  ;;  %v536_v54 = vld [vmem:[%s374_s27 + $0x30] sm:$0xff] }
  0x15   : > { %1451 = vmatprep.subr.bf16.mxu0 %v1450_v12  ;;  %v537_v59 = vld [vmem:[%s374_s27 + $0x38] sm:$0xff] }
  0x18   : > { %1453 = vmatpush3.bf16.msra.mxu0 %v1450_v12 }
  0x19   : > { %1455 = vmatprep.subr.bf16.mxu0 %v1454_v15 }
  0x1c   : > { %1457 = vmatpush3.bf16.msra.mxu0 %v1454_v15 }
  0x1d   : > { %1459 = vmatprep.subr.bf16.mxu0 %v1458_v18 }
  0x20   : > { %1461 = vmatpush3.bf16.msra.mxu0 %v1458_v18 }
  0x23   : > { %1351 = vmatmul.mubr.msk.f32.vlgmr.msra.gmra.mrb[0].mxu0 %vm396_vm0, %v389_v19 }
  0x24   : > { %1353 = vmatprep.mubr.msk.f32.mxu0 %vm396_vm0, %v390_v20 }
  0x27   : > { %1354 = vmatmul.mubr.msk.f32.gmra.mrb[2].mxu0 %vm396_vm0, %v391_v21 }
  0x28   : > { %1356 = vmatprep.mubr.msk.f32.mxu0 %vm396_vm0, %v392_v22 }
  0x2b   : > { %1357 = vmatmul.mubr.msk.f32.gmra.mrb[4].mxu0 %vm396_vm0, %v393_v23 }
  0x2c   : > { %1359 = vmatprep.mubr.msk.f32.mxu0 %vm396_vm0, %v394_v24 }
  0x2f   : > { %1360 = vmatmul.mubr.msk.f32.gmra.mrb[6].mxu0 %vm396_vm0, %v395_v25 }
  0xf6   : > { %v1352_v26 = vpop.f32.mrb[0].mxu0 }
  0xf7   : > { %v487_v27 = vpop.f32.mrb[1].mxu0 }
  0xf8   : > { %1370 = vmatprep.mubr.msk.f32.mxu1 %vm538_vm1, %v487_v27 }
  0xf9   : > { %1371 = vmatmul.mubr.msk.f32.vlgmr.msra.gmra.mrb[0].mxu1 %vm538_vm1, %v1352_v26 }
  0xfa   : > { %v1355_v28 = vpop.f32.mrb[2].mxu0 }
  0xfb   : > { %v497_v29 = vpop.f32.mrb[3].mxu0 }
  0xfc   : > { %1373 = vmatprep.mubr.msk.f32.mxu1 %vm538_vm1, %v497_v29 }
  0xfd   : > { %1374 = vmatmul.mubr.msk.f32.gmra.mrb[2].mxu1 %vm538_vm1, %v1355_v28 }
  0xfe   : > { %v1358_v30 = vpop.f32.mrb[4].mxu0 }
  0xff   : > { %v507_v31 = vpop.f32.mrb[5].mxu0 }
 0x100   : > { %1376 = vmatprep.mubr.msk.f32.mxu1 %vm538_vm1, %v507_v31 }
 0x101   : > { %1377 = vmatmul.mubr.msk.f32.gmra.mrb[4].mxu1 %vm538_vm1, %v1358_v30 }
 0x102   : > { %v1361_v32 = vpop.f32.mrb[6].mxu0 }
 0x103   : > { %v517_v33 = vpop.f32.mrb[7].mxu0 }
 0x104   : > { %1379 = vmatprep.mubr.msk.f32.mxu1 %vm538_vm1, %v517_v33 }
 0x105   : > { %1380 = vmatmul.mubr.msk.f32.gmra.mrb[6].mxu1 %vm538_vm1, %v1361_v32 }
 0x1cc   : > { %v1372_v35 = vpop.f32.mrb[0].mxu1 }
 0x1cd   : > { %v629_v37 = vpop.f32.mrb[1].mxu1  ;;  %v1701_v40 = vadd.f32 %v1372_v35, %v531_v36 }
 0x1ce   : > { %v1699_v38 = vadd.f32 %v629_v37, %v530_v34 }
 0x1cf   : > { %v671_v49 = vsel %vm538_vm1, %v1701_v40, 0.0 }
 0x1d0   : > { %v1375_v41 = vpop.f32.mrb[2].mxu1  ;;  %v668_v42 = vsel %vm538_vm1, %v1699_v38, 0.0 }
 0x1d1   : > { %669 = vadd.xlane.f32.xlu0 %v668_v42  ;;  %v639_v44 = vpop.f32.mrb[3].mxu1  ;;  %v1707_v47 = vadd.f32 %v1375_v41, %v533_v43 }
 0x1d2   : > { %v1705_v45 = vadd.f32 %v639_v44, %v532_v39  ;;  %v803_v44 = vld [vmem:[%s1945_s6] sm:$0xff] }
 0x1d3   : > { %v677_v57 = vsel %vm538_vm1, %v1707_v47, 0.0 }
 0x1d4   : > { %v1378_v48 = vpop.f32.mrb[4].mxu1  ;;  %v674_v50 = vsel %vm538_vm1, %v1705_v45, 0.0 }
 0x1d5   : > { %672 = vadd.xlane.f32.xlu0 %v671_v49  ;;  %675 = vadd.xlane.f32.xlu1 %v674_v50  ;;  %v649_v52 = vpop.f32.mrb[5].mxu1  ;;  %v1715_v55 = vadd.f32 %v1378_v48, %v535_v51  ;;  %v805_v49 = vld [vmem:[%s1945_s6 + $0x10] sm:$0xff]  ;;  %v806_v50 = vld [vmem:[%s1945_s6 + $0x18] sm:$0xff] }
 0x1d6   : > { %v1713_v53 = vadd.f32 %v649_v52, %v534_v46  ;;  %v804_v46 = vld [vmem:[%s1945_s6 + $0x8] sm:$0xff]  ;;  %v1474_v51 = vpack.c.bf16 %v806_v50, %v805_v49 }
 0x1d7   : > { %v683_v63 = vsel %vm538_vm1, %v1715_v55, 0.0  ;;  %v1470_v48 = vpack.c.bf16 %v804_v46, %v803_v44 }
 0x1d8   : > { %v1381_v56 = vpop.f32.mrb[6].mxu1  ;;  %v680_v58 = vsel %vm538_vm1, %v1713_v53, 0.0 }
 0x1d9   : > { %678 = vadd.xlane.f32.xlu1 %v677_v57  ;;  %681 = vadd.xlane.f32.xlu0 %v680_v58  ;;  %v659_v60 = vpop.f32.mrb[7].mxu1  ;;  %v1723_v62 = vadd.f32 %v1381_v56, %v537_v59 }
 0x1da   : > { %v1721_v61 = vadd.f32 %v659_v60, %v536_v54  ;;  %1471 = vmatprep.subr.bf16.mxu1 %v1470_v48 }
 0x1db   : > { %v689_v1 = vsel %vm538_vm1, %v1723_v62, 0.0  ;;  %1473 = vmatpush3.bf16.msra.mxu1 %v1470_v48 }
 0x1dc   : > { %v686_v0 = vsel %vm538_vm1, %v1721_v61, 0.0  ;;  %1475 = vmatprep.subr.bf16.mxu1 %v1474_v51 }
 0x1dd   : > { %684 = vadd.xlane.f32.xlu1 %v683_v63  ;;  %687 = vadd.xlane.f32.xlu0 %v686_v0 }
 0x1df   : > { %1477 = vmatpush3.bf16.msra.mxu1 %v1474_v51 }
 0x1e1   : > { %690 = vadd.xlane.f32.xlu1 %v689_v1 }
 0x25e   : > { %v670_v2 = vpop.xlane.xlu0 %669 }
 0x25f   : > { %v693_v3 = vmul.f32 0.03125, %v670_v2 }
 0x261   : > { %v1732_v4 = vsub.f32 %v1699_v38, %v693_v3 }
 0x262   : > { %v673_v5 = vpop.xlane.xlu0 %672  ;;  %v676_v6 = vpop.xlane.xlu1 %675 }
 0x263   : > { %v694_v7 = vmul.f32 0.03125, %v673_v5  ;;  %v695_v8 = vmul.f32 0.03125, %v676_v6  ;;  %v709_v9 = vmul.f32 %v1732_v4, %v1732_v4 }
 0x265   : > { %v1737_v10 = vsub.f32 %v1701_v40, %v694_v7  ;;  %v1740_v11 = vsub.f32 %v1705_v45, %v695_v8  ;;  %v717_v12 = vsel %vm538_vm1, %v709_v9, 0.0 }
 0x266   : > { %v679_v13 = vpop.xlane.xlu1 %678  ;;  %v682_v14 = vpop.xlane.xlu0 %681  ;;  %718 = vadd.xlane.f32.xlu0 %v717_v12 }
 0x267   : > { %v696_v15 = vmul.f32 0.03125, %v679_v13  ;;  %v697_v16 = vmul.f32 0.03125, %v682_v14  ;;  %v710_v17 = vmul.f32 %v1737_v10, %v1737_v10  ;;  %v711_v18 = vmul.f32 %v1740_v11, %v1740_v11 }
 0x269   : > { %v1748_v19 = vsub.f32 %v1707_v47, %v696_v15  ;;  %v1751_v20 = vsub.f32 %v1713_v53, %v697_v16  ;;  %v720_v21 = vsel %vm538_vm1, %v710_v17, 0.0  ;;  %v723_v22 = vsel %vm538_vm1, %v711_v18, 0.0  ;;  %v1253_v15 = vld [vmem:[%s1943_s4] ss:$0 sm:$0xff] }
 0x26a   : > { %v685_v23 = vpop.xlane.xlu1 %684  ;;  %721 = vadd.xlane.f32.xlu1 %v720_v21  ;;  %724 = vadd.xlane.f32.xlu0 %v723_v22  ;;  %v688_v24 = vpop.xlane.xlu0 %687  ;;  %v1254_v22 = vld [vmem:[%s1944_s5] ss:$0 sm:$0xff] }
 0x26b   : > { %v698_v25 = vmul.f32 0.03125, %v685_v23  ;;  %v699_v26 = vmul.f32 0.03125, %v688_v24  ;;  %v712_v27 = vmul.f32 %v1748_v19, %v1748_v19  ;;  %v713_v28 = vmul.f32 %v1751_v20, %v1751_v20 }
 0x26d   : > { %v1760_v29 = vsub.f32 %v1715_v55, %v698_v25  ;;  %v1763_v30 = vsub.f32 %v1721_v61, %v699_v26  ;;  %v726_v31 = vsel %vm538_vm1, %v712_v27, 0.0  ;;  %v729_v32 = vsel %vm538_vm1, %v713_v28, 0.0 }
 0x26e   : > { %727 = vadd.xlane.f32.xlu1 %v726_v31  ;;  %v691_v33 = vpop.xlane.xlu1 %690  ;;  %730 = vadd.xlane.f32.xlu0 %v729_v32 }
 0x26f   : > { %v700_v34 = vmul.f32 0.03125, %v691_v33  ;;  %v714_v35 = vmul.f32 %v1760_v29, %v1760_v29  ;;  %v715_v36 = vmul.f32 %v1763_v30, %v1763_v30 }
 0x271   : > { %v1772_v37 = vsub.f32 %v1723_v62, %v700_v34  ;;  %v732_v39 = vsel %vm538_vm1, %v714_v35, 0.0  ;;  %v735_v41 = vsel %vm538_vm1, %v715_v36, 0.0 }
 0x272   : > { %733 = vadd.xlane.f32.xlu1 %v732_v39  ;;  %736 = vadd.xlane.f32.xlu0 %v735_v41 }
 0x273   : > { %v716_v42 = vmul.f32 %v1772_v37, %v1772_v37 }
 0x275   : > { %v738_v43 = vsel %vm538_vm1, %v716_v42, 0.0 }
 0x276   : > { %739 = vadd.xlane.f32.xlu1 %v738_v43 }
 0x2f3   : > { %v719_v52 = vpop.xlane.xlu0 %718 }
 0x2f4   : > { %v741_v54 = vmul.f32 0.03125, %v719_v52 }
 0x2f6   : > { %v749_v56 = vadd.f32 1e-06, %v741_v54 }
 0x2f7   : > { %v722_v57 = vpop.xlane.xlu1 %721  ;;  %v725_v58 = vpop.xlane.xlu0 %724 }
 0x2f8   : > { %1534 = vrsqrt.f32 %v749_v56  ;;  %v742_v59 = vmul.f32 0.03125, %v722_v57  ;;  %v743_v60 = vmul.f32 0.03125, %v725_v58  ;;  %v1016_v58 = vld [vmem:[%s1947_s8 + $0x8] sm:$0xff] }
 0x2fa   : > { %v750_v63 = vadd.f32 1e-06, %v742_v59  ;;  %v751_v0 = vadd.f32 1e-06, %v743_v60  ;;  %v1018_v60 = vld [vmem:[%s1947_s8 + $0x18] sm:$0xff] }
 0x2fb   : > { %v728_v1 = vpop.xlane.xlu1 %727  ;;  %v731_v2 = vpop.xlane.xlu0 %730 }
 0x2fc   : > { %1536 = vrsqrt.f32 %v750_v63  ;;  %v744_v3 = vmul.f32 0.03125, %v728_v1  ;;  %v745_v5 = vmul.f32 0.03125, %v731_v2  ;;  %v1020_v1 = vld [vmem:[%s1947_s8 + $0x28] sm:$0xff] }
 0x2fd   : > { %1538 = vrsqrt.f32 %v751_v0  ;;  %v1019_v0 = vld [vmem:[%s1947_s8 + $0x20] sm:$0xff] }
 0x2fe   : > { %v752_v6 = vadd.f32 1e-06, %v744_v3  ;;  %v753_v7 = vadd.f32 1e-06, %v745_v5  ;;  %v1486_v2 = vpack.c.bf16 %v1020_v1, %v1019_v0  ;;  %v1021_v3 = vld [vmem:[%s1947_s8 + $0x30] sm:$0xff]  ;;  %v1022_v5 = vld [vmem:[%s1947_s8 + $0x38] sm:$0xff] }
 0x2ff   : > { %v734_v8 = vpop.xlane.xlu1 %733  ;;  %v737_v9 = vpop.xlane.xlu0 %736 }
 0x300   : > { %1540 = vrsqrt.f32 %v752_v6  ;;  %v746_v12 = vmul.f32 0.03125, %v734_v8  ;;  %v747_v13 = vmul.f32 0.03125, %v737_v9  ;;  %v1490_v6 = vpack.c.bf16 %v1022_v5, %v1021_v3  ;;  %v1024_v8 = vld [vmem:[%s1947_s8 + $0x48] sm:$0xff] }
 0x301   : > { %1542 = vrsqrt.f32 %v753_v7  ;;  %v1023_v7 = vld [vmem:[%s1947_s8 + $0x40] sm:$0xff] }
 0x302   : > { %v1535_v14 = vpop.eup %1534  ;;  %v754_v16 = vadd.f32 1e-06, %v746_v12  ;;  %v755_v17 = vadd.f32 1e-06, %v747_v13  ;;  %v1494_v9 = vpack.c.bf16 %v1024_v8, %v1023_v7  ;;  %v1025_v12 = vld [vmem:[%s1947_s8 + $0x50] sm:$0xff]  ;;  %v1026_v13 = vld [vmem:[%s1947_s8 + $0x58] sm:$0xff] }
 0x303   : > { %v740_v18 = vpop.xlane.xlu1 %739  ;;  %v765_v21 = vmul.f32 %v1535_v14, %v1732_v4  ;;  %v1498_v14 = vpack.c.bf16 %v1026_v13, %v1025_v12 }
 0x304   : > { %1544 = vrsqrt.f32 %v754_v16  ;;  %v748_v23 = vmul.f32 0.03125, %v740_v18  ;;  %v1028_v16 = vld [vmem:[%s1947_s8 + $0x68] sm:$0xff]  ;;  %v1029_v18 = vld [vmem:[%s1947_s8 + $0x70] sm:$0xff] }
 0x305   : > { %1546 = vrsqrt.f32 %v755_v17  ;;  %v780_v24 = vmul.f32 %v1253_v15, %v765_v21  ;;  %v1030_v21 = vld [vmem:[%s1947_s8 + $0x78] sm:$0xff] }
 0x306   : > { %v1537_v25 = vpop.eup %1536  ;;  %v756_v26 = vadd.f32 1e-06, %v748_v23  ;;  %v1255_v23 = vld [vmem:[%s1946_s7] ss:$0 sm:$0xff] }
 0x307   : > { %v1539_v27 = vpop.eup %1538  ;;  %v766_v28 = vmul.f32 %v1537_v25, %v1737_v10  ;;  %v795_v31 = vadd.f32 %v1254_v22, %v780_v24 }
 0x308   : > { %1548 = vrsqrt.f32 %v756_v26  ;;  %v767_v32 = vmul.f32 %v1539_v27, %v1740_v11 }
 0x309   : > { %v781_v33 = vmul.f32 %v1253_v15, %v766_v28  ;;  %1390 = vmatprep.mubr.msk.f32.mxu1 %vm538_vm1, %v795_v31 }
 0x30a   : > { %v1541_v4 = vpop.eup %1540  ;;  %v782_v34 = vmul.f32 %v1253_v15, %v767_v32 }
 0x30b   : > { %v1543_v35 = vpop.eup %1542  ;;  %v796_v36 = vadd.f32 %v1254_v22, %v781_v33  ;;  %v768_v39 = vmul.f32 %v1541_v4, %v1748_v19 }
 0x30c   : > { %v797_v41 = vadd.f32 %v1254_v22, %v782_v34  ;;  %v769_v42 = vmul.f32 %v1543_v35, %v1751_v20 }
 0x30d   : > { %1391 = vmatmul.mubr.msk.f32.vlgmr.msra.gmra.mrb[8].mxu1 %vm538_vm1, %v796_v36  ;;  %v783_v43 = vmul.f32 %v1253_v15, %v768_v39 }
 0x30e   : > { %v1545_v10 = vpop.eup %1544  ;;  %1393 = vmatprep.mubr.msk.f32.mxu1 %vm538_vm1, %v797_v41  ;;  %v784_v44 = vmul.f32 %v1253_v15, %v769_v42 }
 0x30f   : > { %v1547_v11 = vpop.eup %1546  ;;  %v798_v46 = vadd.f32 %v1254_v22, %v783_v43  ;;  %v770_v48 = vmul.f32 %v1545_v10, %v1760_v29 }
 0x310   : > { %v799_v49 = vadd.f32 %v1254_v22, %v784_v44  ;;  %v771_v50 = vmul.f32 %v1547_v11, %v1763_v30  ;;  %v1015_v30 = vld [vmem:[%s1947_s8] sm:$0xff] }
 0x311   : > { %1394 = vmatmul.mubr.msk.f32.gmra.mrb[10].mxu1 %vm538_vm1, %v798_v46  ;;  %v785_v19 = vmul.f32 %v1253_v15, %v770_v48  ;;  %v1478_v59 = vpack.c.bf16 %v1016_v58, %v1015_v30 }
 0x312   : > { %v1549_v51 = vpop.eup %1548  ;;  %1396 = vmatprep.mubr.msk.f32.mxu1 %vm538_vm1, %v799_v49  ;;  %v786_v20 = vmul.f32 %v1253_v15, %v771_v50 }
 0x313   : > { %v800_v52 = vadd.f32 %v1254_v22, %v785_v19  ;;  %v772_v54 = vmul.f32 %v1549_v51, %v1772_v37  ;;  %1479 = vmatprep.subr.bf16.mxu0 %v1478_v59  ;;  %1510 = vmatprep.subr.bf16.mxu1 %v1478_v59  ;;  %v1017_v37 = vld [vmem:[%s1947_s8 + $0x10] sm:$0xff] }
 0x314   : > { %v801_v56 = vadd.f32 %v1254_v22, %v786_v20  ;;  %1481 = vmatpush3.bf16.msra.mxu0 %v1478_v59  ;;  %1518 = vmatpush3.bf16.msra.mxu1 %v1478_v59  ;;  %v1482_v63 = vpack.c.bf16 %v1018_v60, %v1017_v37 }
 0x315   : > { %1397 = vmatmul.mubr.msk.f32.gmra.mrb[12].mxu1 %vm538_vm1, %v800_v52  ;;  %v787_v57 = vmul.f32 %v1253_v15, %v772_v54  ;;  %v1027_v15 = vld [vmem:[%s1947_s8 + $0x60] sm:$0xff] }
 0x316   : > { %1399 = vmatprep.mubr.msk.f32.mxu1 %vm538_vm1, %v801_v56  ;;  %1483 = vmatprep.subr.bf16.mxu0 %v1482_v63  ;;  %v1502_v17 = vpack.c.bf16 %v1028_v16, %v1027_v15 }
 0x317   : > { %v802_v29 = vadd.f32 %v1254_v22, %v787_v57  ;;  %1511 = vmatprep.subr.bf16.mxu1 %v1482_v63  ;;  %v1506_v22 = vpack.c.bf16 %v1030_v21, %v1029_v18 }
 0x318   : > { %1485 = vmatpush3.bf16.msra.mxu0 %v1482_v63  ;;  %1519 = vmatpush3.bf16.msra.mxu1 %v1482_v63 }
 0x319   : > { %1400 = vmatmul.mubr.msk.f32.gmra.mrb[14].mxu1 %vm538_vm1, %v802_v29  ;;  %1487 = vmatprep.subr.bf16.mxu0 %v1486_v2 }
 0x31a   : > { %1512 = vmatprep.subr.bf16.mxu1 %v1486_v2 }
 0x31c   : > { %1489 = vmatpush3.bf16.msra.mxu0 %v1486_v2  ;;  %1520 = vmatpush3.bf16.msra.mxu1 %v1486_v2 }
 0x31d   : > { %1491 = vmatprep.subr.bf16.mxu0 %v1490_v6  ;;  %1513 = vmatprep.subr.bf16.mxu1 %v1490_v6 }
 0x320   : > { %1493 = vmatpush3.bf16.msra.mxu0 %v1490_v6  ;;  %1521 = vmatpush3.bf16.msra.mxu1 %v1490_v6 }
 0x321   : > { %1495 = vmatprep.subr.bf16.mxu0 %v1494_v9  ;;  %1514 = vmatprep.subr.bf16.mxu1 %v1494_v9 }
 0x324   : > { %1497 = vmatpush3.bf16.msra.mxu0 %v1494_v9  ;;  %1522 = vmatpush3.bf16.msra.mxu1 %v1494_v9 }
 0x325   : > { %1499 = vmatprep.subr.bf16.mxu0 %v1498_v14  ;;  %1515 = vmatprep.subr.bf16.mxu1 %v1498_v14 }
 0x328   : > { %1501 = vmatpush3.bf16.msra.mxu0 %v1498_v14  ;;  %1523 = vmatpush3.bf16.msra.mxu1 %v1498_v14 }
 0x329   : > { %1503 = vmatprep.subr.bf16.mxu0 %v1502_v17  ;;  %1516 = vmatprep.subr.bf16.mxu1 %v1502_v17 }
 0x32c   : > { %1505 = vmatpush3.bf16.msra.mxu0 %v1502_v17  ;;  %1524 = vmatpush3.bf16.msra.mxu1 %v1502_v17 }
 0x32d   : > { %1507 = vmatprep.subr.bf16.mxu0 %v1506_v22  ;;  %1517 = vmatprep.subr.bf16.mxu1 %v1506_v22 }
 0x330   : > { %1509 = vmatpush3.bf16.msra.mxu0 %v1506_v22  ;;  %1525 = vmatpush3.bf16.msra.mxu1 %v1506_v22 }
 0x3e0   : > { %v1392_v24 = vpop.f32.mrb[8].mxu1 }
 0x3e1   : > { %v1864_v25 = vadd.f32 %v1392_v24, %v1255_v23  ;;  %v904_v26 = vpop.f32.mrb[9].mxu1 }
 0x3e2   : > { %v1866_v27 = vadd.f32 %v1255_v23, %v904_v26 }
 0x3e3   : > { %v944_v28 = vmul.f32 %v1864_v25, %v1864_v25 }
 0x3e4   : > { %v943_v31 = vmul.f32 %v1866_v27, %v1866_v27  ;;  %v1395_v32 = vpop.f32.mrb[10].mxu1 }
 0x3e5   : > { %v952_v33 = vmul.f32 %v944_v28, %v1864_v25  ;;  %v1873_v4 = vadd.f32 %v1395_v32, %v1255_v23  ;;  %v914_v34 = vpop.f32.mrb[11].mxu1 }
 0x3e6   : > { %v951_v35 = vmul.f32 %v943_v31, %v1866_v27  ;;  %v1876_v36 = vadd.f32 %v1255_v23, %v914_v34 }
 0x3e7   : > { %v960_v39 = vmul.f32 0.044715, %v952_v33  ;;  %v946_v41 = vmul.f32 %v1873_v4, %v1873_v4 }
 0x3e8   : > { %v959_v42 = vmul.f32 0.044715, %v951_v35  ;;  %v945_v43 = vmul.f32 %v1876_v36, %v1876_v36  ;;  %v1398_v10 = vpop.f32.mrb[12].mxu1 }
 0x3e9   : > { %v968_v44 = vadd.f32 %v960_v39, %v1864_v25  ;;  %v954_v11 = vmul.f32 %v946_v41, %v1873_v4  ;;  %v1884_v46 = vadd.f32 %v1398_v10, %v1255_v23  ;;  %v924_v48 = vpop.f32.mrb[13].mxu1 }
 0x3ea   : > { %v967_v49 = vadd.f32 %v959_v42, %v1866_v27  ;;  %v953_v50 = vmul.f32 %v945_v43, %v1876_v36  ;;  %v1888_v19 = vadd.f32 %v1255_v23, %v924_v48 }
 0x3eb   : > { %v976_v51 = vmul.f32 0.7978846, %v968_v44  ;;  %v962_v20 = vmul.f32 0.044715, %v954_v11  ;;  %v948_v52 = vmul.f32 %v1884_v46, %v1884_v46 }
 0x3ec   : > { %v975_v54 = vmul.f32 0.7978846, %v967_v49  ;;  %v961_v56 = vmul.f32 0.044715, %v953_v50  ;;  %v947_v57 = vmul.f32 %v1888_v19, %v1888_v19  ;;  %v1401_v29 = vpop.f32.mrb[14].mxu1 }
 0x3ed   : > { %1550 = vtanh.f32 %v976_v51  ;;  %v970_v30 = vadd.f32 %v962_v20, %v1873_v4  ;;  %v956_v58 = vmul.f32 %v948_v52, %v1884_v46  ;;  %v1896_v59 = vadd.f32 %v1401_v29, %v1255_v23  ;;  %v934_v37 = vpop.f32.mrb[15].mxu1 }
 0x3ee   : > { %v969_v60 = vadd.f32 %v961_v56, %v1876_v36  ;;  %v955_v63 = vmul.f32 %v947_v57, %v1888_v19  ;;  %v935_v0 = vadd.f32 %v1255_v23, %v934_v37  ;;  %1552 = vtanh.f32 %v975_v54 }
 0x3ef   : > { %v978_v1 = vmul.f32 0.7978846, %v970_v30  ;;  %v964_v2 = vmul.f32 0.044715, %v956_v58  ;;  %v950_v3 = vmul.f32 %v1896_v59, %v1896_v59 }
 0x3f0   : > { %v977_v5 = vmul.f32 0.7978846, %v969_v60  ;;  %v963_v6 = vmul.f32 0.044715, %v955_v63  ;;  %v949_v7 = vmul.f32 %v935_v0, %v935_v0  ;;  %v1264_v60 = vld [vmem:[%s1948_s9] ss:$0 sm:$0xff] }
 0x3f1   : > { %v972_v8 = vadd.f32 %v964_v2, %v1884_v46  ;;  %v958_v9 = vmul.f32 %v950_v3, %v1896_v59  ;;  %1554 = vtanh.f32 %v978_v1 }
 0x3f2   : > { %v971_v12 = vadd.f32 %v963_v6, %v1888_v19  ;;  %v957_v13 = vmul.f32 %v949_v7, %v935_v0  ;;  %1556 = vtanh.f32 %v977_v5 }
 0x3f3   : > { %v980_v14 = vmul.f32 0.7978846, %v972_v8  ;;  %v966_v15 = vmul.f32 0.044715, %v958_v9 }
 0x3f4   : > { %v979_v16 = vmul.f32 0.7978846, %v971_v12  ;;  %v965_v17 = vmul.f32 0.044715, %v957_v13 }
 0x3f5   : > { %v974_v18 = vadd.f32 %v966_v15, %v1896_v59  ;;  %1558 = vtanh.f32 %v980_v14 }
 0x3f6   : > { %v973_v21 = vadd.f32 %v965_v17, %v935_v0  ;;  %1560 = vtanh.f32 %v979_v16 }
 0x3f7   : > { %v1551_v22 = vpop.eup %1550  ;;  %v982_v23 = vmul.f32 0.7978846, %v974_v18 }
 0x3f8   : > { %v1553_v24 = vpop.eup %1552  ;;  %v992_v26 = vadd.f32 1.0, %v1551_v22  ;;  %v981_v28 = vmul.f32 0.7978846, %v973_v21 }
 0x3f9   : > { %1562 = vtanh.f32 %v982_v23  ;;  %v991_v31 = vadd.f32 1.0, %v1553_v24 }
 0x3fa   : > { %v1000_v32 = vmul.f32 0.5, %v992_v26  ;;  %1564 = vtanh.f32 %v981_v28 }
 0x3fb   : > { %v1555_v33 = vpop.eup %1554  ;;  %v999_v34 = vmul.f32 0.5, %v991_v31 }
 0x3fc   : > { %v1557_v35 = vpop.eup %1556  ;;  %v994_v39 = vadd.f32 1.0, %v1555_v33  ;;  %v1008_v43 = vmul.f32 %v1000_v32, %v1864_v25 }
 0x3fd   : > { %v1007_v41 = vmul.f32 %v999_v34, %v1866_v27  ;;  %v993_v42 = vadd.f32 1.0, %v1557_v35 }
 0x3fe   : > { %v1002_v10 = vmul.f32 0.5, %v994_v39 }
 0x3ff   : > { %v1559_v44 = vpop.eup %1558  ;;  %1434 = vmatprep.mubr.f32.mxu0 %v1007_v41  ;;  %v1001_v11 = vmul.f32 0.5, %v993_v42 }
 0x400   : > { %v1561_v48 = vpop.eup %1560  ;;  %1435 = vmatmul.mubr.f32.vlgmr.msra.gmra.mrb[8].mxu0 %v1008_v43  ;;  %v996_v49 = vadd.f32 1.0, %v1559_v44  ;;  %v1010_v20 = vmul.f32 %v1002_v10, %v1873_v4 }
 0x401   : > { %v1009_v50 = vmul.f32 %v1001_v11, %v1876_v36  ;;  %v995_v51 = vadd.f32 1.0, %v1561_v48 }
 0x402   : > { %v1004_v52 = vmul.f32 0.5, %v996_v49 }
 0x403   : > { %v1563_v54 = vpop.eup %1562  ;;  %1437 = vmatprep.mubr.f32.mxu0 %v1009_v50  ;;  %v1003_v56 = vmul.f32 0.5, %v995_v51 }
 0x404   : > { %v1565_v27 = vpop.eup %1564  ;;  %v998_v57 = vadd.f32 1.0, %v1563_v54  ;;  %1438 = vmatmul.mubr.f32.gmra.mrb[10].mxu0 %v1010_v20  ;;  %v1012_v58 = vmul.f32 %v1004_v52, %v1884_v46 }
 0x405   : > { %v1011_v25 = vmul.f32 %v1003_v56, %v1888_v19  ;;  %v997_v29 = vadd.f32 1.0, %v1565_v27 }
 0x406   : > { %v1006_v30 = vmul.f32 0.5, %v998_v57 }
 0x407   : > { %1440 = vmatprep.mubr.f32.mxu0 %v1011_v25  ;;  %v1005_v37 = vmul.f32 0.5, %v997_v29 }
 0x408   : > { %1441 = vmatmul.mubr.f32.gmra.mrb[12].mxu0 %v1012_v58  ;;  %v1014_v4 = vmul.f32 %v1006_v30, %v1896_v59 }
 0x409   : > { %v1013_v36 = vmul.f32 %v1005_v37, %v935_v0 }
 0x40b   : > { %1443 = vmatprep.mubr.f32.mxu1 %v1013_v36 }
 0x40c   : > { %1444 = vmatmul.mubr.f32.vlgmr.msra.gmra.mrb[16].mxu1 %v1014_v4 }
 0x4d3   : > { %v1436_v63 = vpop.f32.mrb[8].mxu0 }
 0x4d4   : > { %v1110_v1 = vadd.f32 %v1436_v63, %v1264_v60  ;;  %v1104_v2 = vpop.f32.mrb[9].mxu0 }
 0x4d5   : > { %v1105_v46 = vadd.f32 %v1264_v60, %v1104_v2 }
 0x4d6   : > { %v1144_v19 = vadd.f32 %v1110_v1, %v1701_v40 }
 0x4d7   : > { %v1143_v0 = vadd.f32 %v1105_v46, %v1699_v38  ;;  %v1439_v3 = vpop.f32.mrb[10].mxu0 }
 0x4d8   : > { %1152 = vst.msk [vmem:[%s379_s23 + $0x8] sm:$0xff] %vm538_vm1, %v1144_v19  ;;  %v1120_v59 = vadd.f32 %v1439_v3, %v1264_v60  ;;  %v1114_v5 = vpop.f32.mrb[11].mxu0 }
 0x4d9   : > { %1151 = vst.msk [vmem:[%s379_s23] sm:$0xff] %vm538_vm1, %v1143_v0  ;;  %v1115_v6 = vadd.f32 %v1264_v60, %v1114_v5 }
 0x4da   : > { %v1146_v7 = vadd.f32 %v1120_v59, %v1707_v47 }
 0x4db   : > { %v1145_v8 = vadd.f32 %v1115_v6, %v1705_v45  ;;  %v1442_v9 = vpop.f32.mrb[12].mxu0 }
 0x4dc   : > { %1154 = vst.msk [vmem:[%s379_s23 + $0x18] sm:$0xff] %vm538_vm1, %v1146_v7  ;;  %v1130_v12 = vadd.f32 %v1442_v9, %v1264_v60  ;;  %v1124_v13 = vpop.f32.mrb[13].mxu0 }
 0x4dd   : > { %1153 = vst.msk [vmem:[%s379_s23 + $0x10] sm:$0xff] %vm538_vm1, %v1145_v8  ;;  %v1125_v38 = vadd.f32 %v1264_v60, %v1124_v13 }
 0x4de   : > { %v1148_v40 = vadd.f32 %v1130_v12, %v1715_v55 }
 0x4df   : > { %v1147_v14 = vadd.f32 %v1125_v38, %v1713_v53  ;;  %v1445_v15 = vpop.f32.mrb[16].mxu1 }
 0x4e0   : > { %1156 = vst.msk [vmem:[%s379_s23 + $0x28] sm:$0xff] %vm538_vm1, %v1148_v40  ;;  %v1140_v16 = vadd.f32 %v1445_v15, %v1264_v60  ;;  %v1134_v17 = vpop.f32.mrb[17].mxu1 }
 0x4e1   : > { %1155 = vst.msk [vmem:[%s379_s23 + $0x20] sm:$0xff] %vm538_vm1, %v1147_v14  ;;  %v1135_v45 = vadd.f32 %v1264_v60, %v1134_v17 }
 0x4e2   : > { %v1150_v47 = vadd.f32 %v1140_v16, %v1723_v62 }
 0x4e3   : > { %v1149_v18 = vadd.f32 %v1135_v45, %v1721_v61 }
 0x4e4   : > { %1158 = vst.msk [vmem:[%s379_s23 + $0x38] sm:$0xff] %vm538_vm1, %v1150_v47 }
 0x4e5   : > { %1157 = vst.msk [vmem:[%s379_s23 + $0x30] sm:$0xff] %vm538_vm1, %v1149_v18 }
 0x4e6 PF: > { %s20_s13 = sadd.s32 1, %s1572_s13  }
 0x4e7   : > { %p17_p4 = scmp.ge.s32.totalorder %s20_s13, 4  }
 0x4e9   :  { %19 = sbr.rel (!%p17_p4) target bundleno = 1 (0x1), region = 93 }

// kernel: block_forward.4
= control target key start
LH: loop header
LB: loop body
LE: loop exit
PB: predicated region body
PF: predicated region fallthrough
CT: control target
= control target key end

     0   :  { %s5065_s29 = smov 0   ;;  %s5870_s0 = inlined_call_operand.vmem [shape: f32[2,64,96], index: 0, kind: input, shape index: {}]   ;;  %s5871_s1 = inlined_call_operand.vmem [shape: f32[16,64], index: 1, kind: input, shape index: {}]   ;;  %s5872_s2 = inlined_call_operand.vmem [shape: f32[32,8], index: 2, kind: input, shape index: {}]   ;;  %s5873_s3 = inlined_call_operand.vmem [shape: f32[64,16], index: 3, kind: input, shape index: {}]   ;;  %s5874_s4 = inlined_call_operand.vmem [shape: f32[2,8], index: 4, kind: input, shape index: {}]   ;;  %s5875_s5 = inlined_call_operand.vmem [shape: f32[576,64], index: 5, kind: input, shape index: {}]   ;;  %s5876_s6 = inlined_call_operand.vmem [shape: f32[9,96], index: 6, kind: input, shape index: {}]   ;;  %s5877_s7 = inlined_call_operand.vmem [shape: f32[1,96], index: 7, kind: input, shape index: {}]   ;;  %s5878_s8 = inlined_call_operand.vmem [shape: f32[96,96], index: 8, kind: input, shape index: {}]   ;;  %s5879_s9 = inlined_call_operand.vmem [shape: f32[1,96], index: 9, kind: input, shape index: {}]   ;;  %s5880_s10 = inlined_call_operand.vmem [shape: f32[32,32], index: 10, kind: input, shape index: {}]   ;;  %s5881_s11 = inlined_call_operand.vmem [shape: f32[32,32], index: 11, kind: input, shape index: {}]   ;;  %s5882_s12 = inlined_call_operand.vmem [shape: f32[32,32], index: 12, kind: input, shape index: {}]   ;;  %s5883_s13 = inlined_call_operand.vmem [shape: f32[1,32], index: 13, kind: input, shape index: {}]   ;;  %s5884_s14 = inlined_call_operand.vmem [shape: f32[2,64,32], index: 14, kind: output, shape index: {}]  }
   0x1 LB: > { %s3953_s30 = sadd.s32 4294967295, %s4983_s29   ;;  %p3957_p0 = scmp.ge.s32.totalorder %s4983_s29, 1  ;;  %s4983_s29 = sphi %s5065_s29, %s24_s29  }
   0x2   : > { %p412_p1 = scmp.lt.s32.totalorder %s4983_s29, 3 }
   0x4   : > { %p413_p2 = pnand %p3957_p0, %p412_p1 }
   0x5   : > { %p458_p3 = scmp.lt.s32.totalorder (!%p413_p2), %s3953_s30, 1  ;;  %v476_v0 = vld [vmem:[%s5871_s1] sm:$0xff] (!%p413_p2)  ;;  %vm478_vm0 = vcmask (!%p413_p2), 523264   ;;  %v561_v2 = vld [vmem:[%s5872_s2 + $0x8] sm:$0xff] (!%p413_p2)  ;;  %v562_v3 = vld [vmem:[%s5872_s2 + $0x10] sm:$0xff] (!%p413_p2)  ;;  %vm564_vm1 = vcmask (!%p413_p2), 261120  }
   0x6   : > { %416 = sbr.rel (%p413_p2) target bundleno = 5068 (0x13cc), region = 76  ;;  %v560_v1 = vld [vmem:[%s5872_s2] sm:$0xff] (!%p413_p2)  ;;  %4360 = vmatprep.mubr.msk.f32.mxu0 (!%p413_p2), %vm478_vm0, %v476_v0  ;;  %v563_v4 = vld [vmem:[%s5872_s2 + $0x18] sm:$0xff] (!%p413_p2)  ;;  %v477_v19 = vld [vmem:[%s5871_s1 + $0x8] sm:$0xff] (!%p413_p2)  ;;  %s4985_s17 = smov (!%p413_p2), 64   ;;  %vm817_vm2 = vcmask (!%p413_p2), 15360  }
   0x7   : > { %v4724_v5 = vpack.c.bf16 (!%p413_p2), %v561_v2, %v560_v1  ;;  %v4728_v6 = vpack.c.bf16 (!%p413_p2), %v563_v4, %v562_v3  ;;  %s4986_s18 = smov (!%p413_p2), 96   ;;  %vm5135_vm3 = vmpackc.low (!%p413_p2), %vm817_vm2, %vm817_vm2  ;;  %vm907_vm4 = vcmask (!%p413_p2), 130048   ;;  %s4987_s19 = smov (!%p413_p2), 126   ;;  %v5170_v1 = vld [vmem:[%s5874_s4] sm:$0x3] (!%p413_p2)  ;;  %vm1017_vm5 = vcmask (!%p413_p2), 1041408  }
   0x8   : > { %s4988_s22 = smov (!%p413_p2), 124   ;;  %vm1381_vm6 = vcmask (!%p413_p2), 64512   ;;  %vm3335_vm7 = vcmask (!%p413_p2), 785408  }
   0x9   : > { %4725 = vmatprep.subr.bf16.mxu1 (!%p413_p2), %v4724_v5 }
   0xa   : > { %4727 = vmatpush3.bf16.msra.mxu1 (!%p413_p2), %v4724_v5 }
   0xb   : > { %4729 = vmatprep.subr.bf16.mxu1 (!%p413_p2), %v4728_v6 }
   0xd   : > { %s5888_s30 = smov (!%p458_p3, %s3953_s30), 1 }
   0xe   : > { %s4124_s25 = sshll.u32 %s5888_s30, 6  ;;  %4731 = vmatpush3.bf16.msra.mxu1 %v4728_v6 }
   0xf   : > { %s462_s28 = scalar_lea.vmem %s5870_s0, %s4124_s25  ;;  %4733 = vmatprep.subr.bf16.mxu1 %v4724_v5  ;;  %s467_s21 = scalar_lea.vmem %s5884_s14, %s4124_s25 }
  0x10   : > { %v468_v7 = vld [vmem:[%s462_s28] sm:$0xff]  ;;  %v469_v8 = vld [vmem:[%s462_s28 + $0x8] sm:$0xff]  ;;  %v470_v9 = vld [vmem:[%s462_s28 + $0x10] sm:$0xff] }
  0x11   : > { %v5097_v10 = vpack.c.bf16 %v469_v8, %v468_v7  ;;  %v471_v11 = vld [vmem:[%s462_s28 + $0x18] sm:$0xff]  ;;  %v472_v13 = vld [vmem:[%s462_s28 + $0x20] sm:$0xff]  ;;  %v473_v14 = vld [vmem:[%s462_s28 + $0x28] sm:$0xff] }
  0x12   : > { %v5099_v12 = vpack.c.bf16 %v471_v11, %v470_v9  ;;  %v5104_v15 = vpack.c.bf16 %v473_v14, %v472_v13  ;;  %v474_v16 = vld [vmem:[%s462_s28 + $0x30] sm:$0xff]  ;;  %v475_v17 = vld [vmem:[%s462_s28 + $0x38] sm:$0xff]  ;;  %s4989_s28 = smov 122  }
  0x13   : > { %4709 = vmatprep.subr.bf16.mxu0 %v5097_v10  ;;  %v5108_v18 = vpack.c.bf16 %v475_v17, %v474_v16 }
  0x14   : > { %4711 = vmatpush3.bf16.msra.mxu0 %v5097_v10 }
  0x15   : > { %4713 = vmatprep.subr.bf16.mxu0 %v5099_v12 }
  0x18   : > { %4715 = vmatpush3.bf16.msra.mxu0 %v5099_v12 }
  0x19   : > { %4717 = vmatprep.subr.bf16.mxu0 %v5104_v15 }
  0x1c   : > { %4719 = vmatpush3.bf16.msra.mxu0 %v5104_v15 }
  0x1d   : > { %4721 = vmatprep.subr.bf16.mxu0 %v5108_v18 }
  0x20   : > { %4723 = vmatpush3.bf16.msra.mxu0 %v5108_v18 }
  0x21   : > { %4741 = vmatprep.subr.bf16.mxu0 %v4724_v5 }
  0x23   : > { %4361 = vmatmul.mubr.msk.f32.vlgmr.msra.gmra.mrb[0].mxu0 %vm478_vm0, %v477_v19 }
  0x24   : > { %4743 = vmatpush3.bf16.msra.mxu0 %v4724_v5 }
  0x25   : > { %4745 = vmatprep.subr.bf16.mxu0 %v4728_v6 }
  0x28   : > { %4747 = vmatpush3.bf16.msra.mxu0 %v4728_v6 }
  0xf6   : > { %v4362_v20 = vpop.f32.mrb[0].mxu0 }
  0xf7   : > { %v551_v21 = vpop.f32.mrb[1].mxu0 }
  0xf8   : > { %729 = vrot.lane.b32.xlu1 %v551_v21, %s4985_s17  ;;  %646 = vrot.lane.b32.xlu0 %v551_v21, %s4986_s18 }
  0xf9   : > { %4371 = vmatprep.mubr.msk.f32.mxu1 %vm564_vm1, %v551_v21 }
  0xfa   : > { %4372 = vmatmul.mubr.msk.f32.vlgmr.msra.gmra.mrb[0].mxu1 %vm564_vm1, %v4362_v20 }
  0xfb   : > { %4735 = vmatpush3.bf16.msra.mxu1 %v4724_v5 }
  0xfc   : > { %731 = vrot.lane.b32.xlu1 %v4362_v20, %s4985_s17  ;;  %648 = vrot.lane.b32.xlu0 %v4362_v20, %s4986_s18 }
  0xfd   : > { %4737 = vmatprep.subr.bf16.mxu1 %v4728_v6 }
  0xff   : > { %4739 = vmatpush3.bf16.msra.mxu1 %v4728_v6 }
 0x16a   : > { %v730_v22 = vpop.permute.xlu1 %729  ;;  %v647_v23 = vpop.permute.xlu0 %646 }
 0x16b   : > { %4382 = vmatprep.mubr.msk.f32.mxu1 %vm564_vm1, %v647_v23  ;;  %4393 = vmatprep.mubr.msk.f32.mxu0 %vm564_vm1, %v730_v22 }
 0x16e   : > { %v732_v24 = vpop.permute.xlu1 %731  ;;  %v649_v25 = vpop.permute.xlu0 %648 }
 0x16f   : > { %4383 = vmatmul.mubr.msk.f32.vlgmr.msra.gmra.mrb[2].mxu1 %vm564_vm1, %v649_v25  ;;  %4394 = vmatmul.mubr.msk.f32.vlgmr.msra.gmra.mrb[2].mxu0 %vm564_vm1, %v732_v24 }
 0x1cd   : > { %v5127_v26 = vpop.f32.mrb[0].mxu1 }
 0x1ce   : > { %v5129_v27 = vpop.f32.mrb[1].mxu1 }
 0x1cf   : > { %4400 = vmatprep.mubr.msk.f32.mxu1 %vm817_vm2, %v5129_v27 }
 0x242   : > { %v4384_v28 = vpop.f32.mrb[2].mxu1  ;;  %v4395_v29 = vpop.f32.mrb[2].mxu0 }
 0x243   : > { %v720_v30 = vpop.f32.mrb[3].mxu1  ;;  %v803_v31 = vpop.f32.mrb[3].mxu0 }
 0x244   : > { %v4748_v33 = vpack.c.bf16 %v4384_v28, %v720_v30  ;;  %v4754_v34 = vpack.c.bf16 %v4395_v29, %v803_v31  ;;  %v5139_v35 = vpack.i.bf16 %v4384_v28, %v720_v30  ;;  %v5141_v36 = vpack.i.bf16 %v4395_v29, %v803_v31 }
 0x246   : > { %4750 = vmatprep.subr.msk.bf16.mxu1 %vm5135_vm3, %v4748_v33  ;;  %4755 = vmatprep.subr.bf16.mxu0 %v4754_v34 }
 0x247   : > { %4753 = vmatpush3.bf16.xpose.msk.msra.mxu1 %vm5135_vm3, %v4748_v33  ;;  %4757 = vmatpush3.bf16.msra.mxu0 %v4754_v34 }
 0x248   : > { %4410 = vmatprep.subr.msk.mxu1 %vm1017_vm5, %v5170_v1 }
 0x24e   : > { %4401 = vmatmul.mubr.msk.f32.vlgmr.msra.gmra.mrb[4].mxu1 %vm817_vm2, %v5127_v26 }
 0x24f   : > { %4411 = vmatpush3.msk.msra.mxu1 %vm1017_vm5, %v5170_v1 }
 0x321   : > { %v4402_v37 = vpop.f32.mrb[4].mxu1 }
 0x322   : > { %v906_v38 = vmul.f32 0.35355338, %v4402_v37  ;;  %v896_v39 = vpop.f32.mrb[5].mxu1 }
 0x323   : > { %v905_v40 = vmul.f32 0.35355338, %v896_v39 }
 0x324   : > { %v911_v41 = vsel %vm907_vm4, %v906_v38, -inf }
 0x325   : > { %912 = vmax.xlane.f32.xlu1 %v911_v41  ;;  %v908_v42 = vsel %vm907_vm4, %v905_v40, -inf }
 0x326   : > { %909 = vmax.xlane.f32.xlu0 %v908_v42 }
 0x336   : > { %4884 = vrot.lane.b32.xlu1 %v5139_v35, %s4987_s19 }
 0x33a   : > { %1098 = vrot.lane.b32.xlu1 %v5127_v26, %s4987_s19 }
 0x3b2   : > { %v913_v43 = vpop.xlane.xlu1 %912 }
 0x3b3   : > { %v915_v44 = vsub.f32 %v906_v38, %v913_v43  ;;  %v910_v45 = vpop.xlane.xlu0 %909 }
 0x3b4   : > { %v914_v46 = vsub.f32 %v905_v40, %v910_v45 }
 0x3b5   : > { %v918_v47 = vmul.f32 1.442695, %v915_v44 }
 0x3b6   : > { %v916_v48 = vmul.f32 1.442695, %v914_v46  ;;  %v4885_v49 = vpop.permute.xlu1 %4884 }
 0x3b7   : > { %v4887_v50 = vunpack.i.h.bf16 %v4885_v49  ;;  %v4886_v51 = vunpack.i.l.bf16 %v4885_v49  ;;  %v814_v49 = vld [vmem:[%s5882_s12 + $0x8] sm:$0xff] }
 0x3b8   : > { %4913 = vpow2.f32 %v916_v48 }
 0x3b9   : > { %v4758_v52 = vpack.c.bf16 %v4887_v50, %v4886_v51  ;;  %4915 = vpow2.f32 %v918_v47  ;;  %v813_v50 = vld [vmem:[%s5882_s12] sm:$0xff] }
 0x3ba   : > { %v1099_v0 = vpop.permute.xlu1 %1098 }
 0x3bb   : > { %4760 = vmatprep.subr.msk.bf16.mxu0 %vm5135_vm3, %v4758_v52 }
 0x3c2   : > { %v4914_v53 = vpop.eup %4913 }
 0x3c3   : > { %v920_v54 = vsel %vm907_vm4, %v4914_v53, 0.0  ;;  %v4916_v55 = vpop.eup %4915 }
 0x3c4   : > { %921 = vadd.xlane.f32.xlu0 %v920_v54  ;;  %v923_v56 = vsel %vm907_vm4, %v4916_v55, 0.0 }
 0x3c8   : > { %924 = vadd.xlane.f32.xlu0 %v923_v56 }
 0x3de   : > { %1096 = vrot.lane.b32.xlu0 %v5129_v27, %s4987_s19 }
 0x451   : > { %v922_v57 = vpop.xlane.xlu0 %921 }
 0x452   : > { %4917 = vrcp.f32 %v922_v57 }
 0x455   : > { %v925_v58 = vpop.xlane.xlu0 %924 }
 0x456   : > { %4919 = vrcp.f32 %v925_v58 }
 0x459   : > { %v1097_v63 = vpop.permute.xlu0 %1096 }
 0x45c   : > { %v4918_v59 = vpop.eup %4917 }
 0x45d   : > { %v928_v60 = vmul.f32 %v4918_v59, %v4914_v53 }
 0x45f   : > { %4407 = vmatprep.mubr.msk.f32.mxu0 %vm907_vm4, %v928_v60 }
 0x460   : > { %v4920_v61 = vpop.eup %4919 }
 0x461   : > { %v929_v62 = vmul.f32 %v4920_v61, %v4916_v55 }
 0x463   : > { %4408 = vmatmul.mubr.msk.f32.vlgmr.msra.gmra.mrb[4].mxu0 %vm907_vm4, %v929_v62 }
 0x464   : > { %4763 = vmatpush3.bf16.xpose.msk.msra.mxu0 %vm5135_vm3, %v4758_v52  ;;  %4419 = vmatprep.mubr.msk.f32.mxu0 %vm817_vm2, %v1097_v63 }
 0x465   : > { %4434 = vmatprep.subr.mxu0 %v814_v49 }
 0x46b   : > { %4420 = vmatmul.mubr.msk.f32.vlgmr.msra.gmra.mrb[6].mxu0 %vm817_vm2, %v1099_v0 }
 0x46c   : > { %4435 = vmatpush3.msra.mxu0 %v814_v49 }
 0x46d   : > { %4439 = vmatprep.subr.mxu0 %v813_v50 }
 0x536   : > { %v4409_v2 = vpop.f32.mrb[4].mxu0 }
 0x537   : > { %v1002_v3 = vpop.f32.mrb[5].mxu0 }
 0x538   : > { %4412 = vmatprep.mubr.msk.f32.mxu1 %vm817_vm2, %v1002_v3 }
 0x539   : > { %4413 = vmatmul.mubr.msk.f32.vlgmr.msra.gmra.mrb[6].mxu1 %vm817_vm2, %v4409_v2 }
 0x53e   : > { %v4421_v4 = vpop.f32.mrb[6].mxu0 }
 0x53f   : > { %v1188_v5 = vmul.f32 0.35355338, %v4421_v4  ;;  %v1178_v6 = vpop.f32.mrb[7].mxu0 }
 0x540   : > { %v1187_v7 = vmul.f32 0.35355338, %v1178_v6 }
 0x541   : > { %v1192_v8 = vsel %vm907_vm4, %v1188_v5, -inf }
 0x542   : > { %1193 = vmax.xlane.f32.xlu0 %v1192_v8  ;;  %v1189_v9 = vsel %vm907_vm4, %v1187_v7, -inf }
 0x543   : > { %1190 = vmax.xlane.f32.xlu1 %v1189_v9 }
 0x5cf   : > { %v1194_v11 = vpop.xlane.xlu0 %1193 }
 0x5d0   : > { %v1196_v13 = vsub.f32 %v1188_v5, %v1194_v11  ;;  %v1191_v14 = vpop.xlane.xlu1 %1190 }
 0x5d1   : > { %v1195_v16 = vsub.f32 %v1187_v7, %v1191_v14 }
 0x5d2   : > { %v1199_v17 = vmul.f32 1.442695, %v1196_v13 }
 0x5d3   : > { %v1197_v19 = vmul.f32 1.442695, %v1195_v16 }
 0x5d4   : > { %4921 = vpow2.f32 %v1199_v17 }
 0x5d5   : > { %4923 = vpow2.f32 %v1197_v19 }
 0x5de   : > { %v4922_v20 = vpop.eup %4921 }
 0x5df   : > { %v4924_v21 = vpop.eup %4923  ;;  %v1204_v22 = vsel %vm907_vm4, %v4922_v20, 0.0 }
 0x5e0   : > { %1205 = vadd.xlane.f32.xlu1 %v1204_v22  ;;  %v1201_v23 = vsel %vm907_vm4, %v4924_v21, 0.0 }
 0x5e1   : > { %1202 = vadd.xlane.f32.xlu0 %v1201_v23 }
 0x5f1   : > { %4894 = vrot.lane.b32.xlu1 %v5139_v35, %s4988_s22 }
 0x5f5   : > { %1544 = vrot.lane.b32.xlu1 %v5129_v27, %s4988_s22 }
 0x5f7   : > { %4889 = vrot.lane.b32.xlu0 %v5141_v36, %s4987_s19 }
 0x5fb   : > { %1546 = vrot.lane.b32.xlu0 %v5127_v26, %s4988_s22 }
 0x60c   : > { %v4414_v24 = vpop.f32.mrb[6].mxu1 }
 0x60d   : > { %v1087_v25 = vpop.f32.mrb[7].mxu1 }
 0x66d   : > { %v1206_v28 = vpop.xlane.xlu1 %1205 }
 0x66e   : > { %4925 = vrcp.f32 %v1206_v28  ;;  %v1203_v29 = vpop.xlane.xlu0 %1202 }
 0x66f   : > { %4927 = vrcp.f32 %v1203_v29 }
 0x671   : > { %v4895_v37 = vpop.permute.xlu1 %4894 }
 0x672   : > { %v4890_v30 = vpop.permute.xlu0 %4889  ;;  %v4897_v40 = vunpack.i.h.bf16 %v4895_v37  ;;  %v4896_v41 = vunpack.i.l.bf16 %v4895_v37 }
 0x673   : > { %v4892_v31 = vunpack.i.h.bf16 %v4890_v30  ;;  %v4891_v33 = vunpack.i.l.bf16 %v4890_v30 }
 0x674   : > { %v4768_v44 = vpack.c.bf16 %v4897_v40, %v4896_v41 }
 0x675   : > { %v4764_v34 = vpack.c.bf16 %v4892_v31, %v4891_v33  ;;  %v1545_v47 = vpop.permute.xlu1 %1544 }
 0x676   : > { %v1547_v48 = vpop.permute.xlu0 %1546 }
 0x677   : > { %4765 = vmatprep.subr.bf16.mxu1 %v4764_v34 }
 0x678   : > { %v4926_v38 = vpop.eup %4925  ;;  %4767 = vmatpush3.bf16.msra.mxu1 %v4764_v34 }
 0x679   : > { %v4928_v39 = vpop.eup %4927  ;;  %4429 = vmatprep.subr.msk.mxu1 %vm1017_vm5, %v5170_v1  ;;  %v1210_v43 = vmul.f32 %v4926_v38, %v4922_v20 }
 0x67a   : > { %v1209_v42 = vmul.f32 %v4928_v39, %v4924_v21 }
 0x67c   : > { %4426 = vmatprep.mubr.msk.f32.mxu1 %vm907_vm4, %v1209_v42 }
 0x67d   : > { %4427 = vmatmul.mubr.msk.f32.vlgmr.msra.gmra.mrb[8].mxu1 %vm907_vm4, %v1210_v43 }
 0x67e   : > { %4430 = vmatpush3.msk.msra.mxu1 %vm1017_vm5, %v5170_v1 }
 0x67f   : > { %4770 = vmatprep.subr.msk.bf16.mxu1 %vm5135_vm3, %v4768_v44 }
 0x750   : > { %v4428_v45 = vpop.f32.mrb[8].mxu1 }
 0x751   : > { %v1291_v46 = vpop.f32.mrb[9].mxu1 }
 0x752   : > { %4431 = vmatprep.mubr.msk.f32.mxu1 %vm817_vm2, %v1291_v46 }
 0x753   : > { %4432 = vmatmul.mubr.msk.f32.vlgmr.msra.gmra.mrb[10].mxu1 %vm817_vm2, %v4428_v45 }
 0x754   : > { %4773 = vmatpush3.bf16.xpose.msk.msra.mxu1 %vm5135_vm3, %v4768_v44  ;;  %4448 = vmatprep.mubr.msk.f32.mxu1 %vm817_vm2, %v1545_v47 }
 0x755   : > { %4458 = vmatprep.subr.msk.mxu1 %vm1017_vm5, %v5170_v1 }
 0x75b   : > { %4449 = vmatmul.mubr.msk.f32.vlgmr.msra.gmra.mrb[12].mxu1 %vm817_vm2, %v1547_v48 }
 0x75c   : > { %4459 = vmatpush3.msk.msra.mxu1 %vm1017_vm5, %v5170_v1 }
 0x826   : > { %v4433_v51 = vpop.f32.mrb[10].mxu1 }
 0x827   : > { %v1372_v52 = vpop.f32.mrb[11].mxu1 }
 0x828   : > { %4436 = vmatprep.mubr.msk.f32.mxu0 %vm1381_vm6, %v1372_v52 }
 0x829   : > { %4437 = vmatmul.mubr.msk.f32.vlgmr.msra.gmra.mrb[8].mxu0 %vm1381_vm6, %v4433_v51 }
 0x82a   : > { %4441 = vmatprep.mubr.msk.f32.mxu0 %vm1381_vm6, %v1087_v25  ;;  %4440 = vmatpush3.msra.mxu0 %v813_v50  ;;  %v815_v25 = vld [vmem:[%s5882_s12 + $0x10] sm:$0xff] }
 0x82e   : > { %v4450_v53 = vpop.f32.mrb[12].mxu1 }
 0x82f   : > { %v1636_v54 = vmul.f32 0.35355338, %v4450_v53  ;;  %v1626_v55 = vpop.f32.mrb[13].mxu1 }
 0x830   : > { %v1635_v56 = vmul.f32 0.35355338, %v1626_v55 }
 0x831   : > { %4442 = vmatmul.mubr.msk.f32.vlgmr.msra.gmra.mrb[8].mxu0 %vm1381_vm6, %v4414_v24  ;;  %v1640_v57 = vsel %vm907_vm4, %v1636_v54, -inf }
 0x832   : > { %1641 = vmax.xlane.f32.xlu0 %v1640_v57  ;;  %v1637_v58 = vsel %vm907_vm4, %v1635_v56, -inf }
 0x833   : > { %1638 = vmax.xlane.f32.xlu1 %v1637_v58 }
 0x8bf   : > { %v1642_v59 = vpop.xlane.xlu0 %1641 }
 0x8c0   : > { %v1644_v60 = vsub.f32 %v1636_v54, %v1642_v59  ;;  %v1639_v61 = vpop.xlane.xlu1 %1638 }
 0x8c1   : > { %v1643_v62 = vsub.f32 %v1635_v56, %v1639_v61 }
 0x8c2   : > { %v1647_v63 = vmul.f32 1.442695, %v1644_v60 }
 0x8c3   : > { %v1645_v0 = vmul.f32 1.442695, %v1643_v62  ;;  %v2414_v62 = vld [vmem:[%s5875_s5 + $0x8] sm:$0xff] }
 0x8c4   : > { %4929 = vpow2.f32 %v1647_v63  ;;  %v2415_v63 = vld [vmem:[%s5875_s5 + $0x10] sm:$0xff] }
 0x8c5   : > { %4931 = vpow2.f32 %v1645_v0  ;;  %v2416_v0 = vld [vmem:[%s5875_s5 + $0x18] sm:$0xff] }
 0x8ce   : > { %v4930_v2 = vpop.eup %4929 }
 0x8cf   : > { %v4932_v3 = vpop.eup %4931  ;;  %v1652_v4 = vsel %vm907_vm4, %v4930_v2, 0.0 }
 0x8d0   : > { %1653 = vadd.xlane.f32.xlu1 %v1652_v4  ;;  %v1649_v5 = vsel %vm907_vm4, %v4932_v3, 0.0  ;;  %v2419_v4 = vld [vmem:[%s5875_s5 + $0x30] sm:$0xff] }
 0x8d1   : > { %1650 = vadd.xlane.f32.xlu0 %v1649_v5  ;;  %v2420_v5 = vld [vmem:[%s5875_s5 + $0x38] sm:$0xff] }
 0x8e1   : > { %4904 = vrot.lane.b32.xlu1 %v5139_v35, %s4989_s28 }
 0x8e5   : > { %1910 = vrot.lane.b32.xlu1 %v5129_v27, %s4989_s28 }
 0x8e7   : > { %4899 = vrot.lane.b32.xlu0 %v5141_v36, %s4988_s22 }
 0x8eb   : > { %1912 = vrot.lane.b32.xlu0 %v5127_v26, %s4989_s28 }
 0x95d   : > { %v1654_v6 = vpop.xlane.xlu1 %1653 }
 0x95e   : > { %4933 = vrcp.f32 %v1654_v6  ;;  %v1651_v7 = vpop.xlane.xlu0 %1650  ;;  %v2421_v6 = vld [vmem:[%s5875_s5 + $0x40] sm:$0xff] }
 0x95f   : > { %4935 = vrcp.f32 %v1651_v7  ;;  %v2422_v7 = vld [vmem:[%s5875_s5 + $0x48] sm:$0xff] }
 0x961   : > { %v4905_v8 = vpop.permute.xlu1 %4904 }
 0x962   : > { %v4907_v9 = vunpack.i.h.bf16 %v4905_v8  ;;  %v4906_v11 = vunpack.i.l.bf16 %v4905_v8  ;;  %v4900_v13 = vpop.permute.xlu0 %4899  ;;  %v2423_v8 = vld [vmem:[%s5875_s5 + $0x50] sm:$0xff] }
 0x963   : > { %v4902_v14 = vunpack.i.h.bf16 %v4900_v13  ;;  %v4901_v16 = vunpack.i.l.bf16 %v4900_v13  ;;  %v2426_v13 = vld [vmem:[%s5875_s5 + $0x68] sm:$0xff] }
 0x964   : > { %v4778_v35 = vpack.c.bf16 %v4907_v9, %v4906_v11  ;;  %v2424_v9 = vld [vmem:[%s5875_s5 + $0x58] sm:$0xff]  ;;  %v2425_v11 = vld [vmem:[%s5875_s5 + $0x60] sm:$0xff] }
 0x965   : > { %v4774_v17 = vpack.c.bf16 %v4902_v14, %v4901_v16  ;;  %v1911_v23 = vpop.permute.xlu1 %1910  ;;  %v2427_v14 = vld [vmem:[%s5875_s5 + $0x70] sm:$0xff]  ;;  %v2428_v16 = vld [vmem:[%s5875_s5 + $0x78] sm:$0xff] }
 0x966   : > { %4780 = vmatprep.subr.msk.bf16.mxu1 %vm5135_vm3, %v4778_v35  ;;  %v1913_v24 = vpop.permute.xlu0 %1912 }
 0x967   : > { %4775 = vmatprep.subr.bf16.mxu0 %v4774_v17 }
 0x968   : > { %v4934_v27 = vpop.eup %4933  ;;  %4777 = vmatpush3.bf16.msra.mxu0 %v4774_v17  ;;  %v2429_v17 = vld [vmem:[%s5875_s5 + $0x80] sm:$0xff] }
 0x969   : > { %v4936_v19 = vpop.eup %4935  ;;  %v1658_v20 = vmul.f32 %v4934_v27, %v4930_v2  ;;  %4463 = vmatprep.subr.mxu0 %v815_v25  ;;  %v2417_v2 = vld [vmem:[%s5875_s5 + $0x20] sm:$0xff]  ;;  %v2430_v27 = vld [vmem:[%s5875_s5 + $0x88] sm:$0xff] }
 0x96a   : > { %v1657_v26 = vmul.f32 %v4936_v19, %v4932_v3  ;;  %v2418_v3 = vld [vmem:[%s5875_s5 + $0x28] sm:$0xff]  ;;  %v2431_v19 = vld [vmem:[%s5875_s5 + $0x90] sm:$0xff] }
 0x96c   : > { %4455 = vmatprep.mubr.msk.f32.mxu0 %vm907_vm4, %v1657_v26  ;;  %v2432_v26 = vld [vmem:[%s5875_s5 + $0x98] sm:$0xff] }
 0x96d   : > { %4456 = vmatmul.mubr.msk.f32.vlgmr.msra.gmra.mrb[10].mxu0 %vm907_vm4, %v1658_v20  ;;  %v2433_v20 = vld [vmem:[%s5875_s5 + $0xa0] sm:$0xff] }
 0x96e   : > { %4464 = vmatpush3.msra.mxu0 %v815_v25  ;;  %v2438_v25 = vld [vmem:[%s5875_s5 + $0xc8] sm:$0xff] }
 0xa40   : > { %v4457_v21 = vpop.f32.mrb[10].mxu0 }
 0xa41   : > { %v1737_v22 = vpop.f32.mrb[11].mxu0 }
 0xa42   : > { %4460 = vmatprep.mubr.msk.f32.mxu1 %vm817_vm2, %v1737_v22  ;;  %v2435_v22 = vld [vmem:[%s5875_s5 + $0xb0] sm:$0xff] }
 0xa43   : > { %4461 = vmatmul.mubr.msk.f32.vlgmr.msra.gmra.mrb[14].mxu1 %vm817_vm2, %v4457_v21  ;;  %v2434_v21 = vld [vmem:[%s5875_s5 + $0xa8] sm:$0xff] }
 0xa44   : > { %4783 = vmatpush3.bf16.xpose.msk.msra.mxu1 %vm5135_vm3, %v4778_v35  ;;  %4472 = vmatprep.mubr.msk.f32.mxu1 %vm817_vm2, %v1911_v23  ;;  %v2276_v35 = vld [vmem:[%s5873_s3] sm:$0xff]  ;;  %v2436_v23 = vld [vmem:[%s5875_s5 + $0xb8] sm:$0xff] }
 0xa4b   : > { %4473 = vmatmul.mubr.msk.f32.vlgmr.msra.gmra.mrb[16].mxu1 %vm817_vm2, %v1913_v24  ;;  %v2437_v24 = vld [vmem:[%s5875_s5 + $0xc0] sm:$0xff] }
 0xa4c   : > { %4496 = vmatprep.mubr.msk.f32.mxu1 %vm907_vm4, %v2276_v35 }
 0xb16   : > { %v4462_v28 = vpop.f32.mrb[14].mxu1 }
 0xb17   : > { %v1818_v29 = vpop.f32.mrb[15].mxu1 }
 0xb18   : > { %4465 = vmatprep.mubr.msk.f32.mxu0 %vm1381_vm6, %v1818_v29  ;;  %v2440_v29 = vld [vmem:[%s5875_s5 + $0xd8] sm:$0xff] }
 0xb19   : > { %4466 = vmatmul.mubr.msk.f32.vlgmr.msra.gmra.mrb[8].mxu0 %vm1381_vm6, %v4462_v28  ;;  %v2439_v28 = vld [vmem:[%s5875_s5 + $0xd0] sm:$0xff] }
 0xb1e   : > { %v4474_v30 = vpop.f32.mrb[16].mxu1 }
 0xb1f   : > { %v2002_v32 = vmul.f32 0.35355338, %v4474_v30  ;;  %v1992_v31 = vpop.f32.mrb[17].mxu1  ;;  %v2441_v30 = vld [vmem:[%s5875_s5 + $0xe0] sm:$0xff] }
 0xb20   : > { %v2001_v33 = vmul.f32 0.35355338, %v1992_v31 }
 0xb21   : > { %v2006_v34 = vsel %vm907_vm4, %v2002_v32, -inf }
 0xb22   : > { %2007 = vmax.xlane.f32.xlu0 %v2006_v34  ;;  %v2003_v37 = vsel %vm907_vm4, %v2001_v33, -inf }
 0xb23   : > { %2004 = vmax.xlane.f32.xlu1 %v2003_v37  ;;  %v2277_v37 = vld [vmem:[%s5873_s3 + $0x8] sm:$0xff] }
 0xbaf   : > { %v2008_v38 = vpop.xlane.xlu0 %2007 }
 0xbb0   : > { %v2010_v39 = vsub.f32 %v2002_v32, %v2008_v38  ;;  %v2005_v40 = vpop.xlane.xlu1 %2004  ;;  %v2442_v32 = vld [vmem:[%s5875_s5 + $0xe8] sm:$0xff]  ;;  %v2278_v38 = vld [vmem:[%s5873_s3 + $0x10] sm:$0xff] }
 0xbb1   : > { %v2009_v41 = vsub.f32 %v2001_v33, %v2005_v40  ;;  %v2280_v40 = vld [vmem:[%s5873_s3 + $0x20] sm:$0xff] }
 0xbb2   : > { %v2013_v42 = vmul.f32 1.442695, %v2010_v39  ;;  %v2279_v39 = vld [vmem:[%s5873_s3 + $0x18] sm:$0xff] }
 0xbb3   : > { %v2011_v43 = vmul.f32 1.442695, %v2009_v41  ;;  %v3136_v41 = vlaneseq }
 0xbb4   : > { %4937 = vpow2.f32 %v2013_v42  ;;  %v2282_v42 = vld [vmem:[%s5873_s3 + $0x30] sm:$0xff] }
 0xbb5   : > { %4939 = vpow2.f32 %v2011_v43 }
 0xbbe   : > { %v4938_v44 = vpop.eup %4937 }
 0xbbf   : > { %v4940_v45 = vpop.eup %4939  ;;  %v2018_v46 = vsel %vm907_vm4, %v4938_v44, 0.0 }
 0xbc0   : > { %2019 = vadd.xlane.f32.xlu1 %v2018_v46  ;;  %v2015_v47 = vsel %vm907_vm4, %v4940_v45, 0.0  ;;  %v2443_v46 = vld [vmem:[%s5875_s5 + $0xf0] sm:$0xff] }
 0xbc1   : > { %2016 = vadd.xlane.f32.xlu0 %v2015_v47 }
 0xbd7   : > { %4909 = vrot.lane.b32.xlu0 %v5141_v36, %s4989_s28  ;;  %v816_v36 = vld [vmem:[%s5882_s12 + $0x18] sm:$0xff] }
 0xc4d   : > { %v2020_v48 = vpop.xlane.xlu1 %2019 }
 0xc4e   : > { %4941 = vrcp.f32 %v2020_v48  ;;  %v2017_v49 = vpop.xlane.xlu0 %2016 }
 0xc4f   : > { %4943 = vrcp.f32 %v2017_v49 }
 0xc52   : > { %v4910_v50 = vpop.permute.xlu0 %4909 }
 0xc53   : > { %v4912_v51 = vunpack.i.h.bf16 %v4910_v50  ;;  %v4911_v52 = vunpack.i.l.bf16 %v4910_v50  ;;  %v2445_v50 = vld [vmem:[%s5875_s5 + $0x100] sm:$0xff] }
 0xc55   : > { %v4784_v53 = vpack.c.bf16 %v4912_v51, %v4911_v52  ;;  %v5448_v51 = vld [vmem:[%s5876_s6] sm:$0xff]  ;;  %v2446_v52 = vld [vmem:[%s5875_s5 + $0x108] sm:$0xff] }
 0xc57   : > { %4785 = vmatprep.subr.bf16.mxu0 %v4784_v53 }
 0xc58   : > { %v4942_v54 = vpop.eup %4941  ;;  %4787 = vmatpush3.bf16.msra.mxu0 %v4784_v53 }
 0xc59   : > { %v4944_v55 = vpop.eup %4943  ;;  %4482 = vmatprep.subr.msk.mxu0 %vm1017_vm5, %v5170_v1  ;;  %v2024_v57 = vmul.f32 %v4942_v54, %v4938_v44  ;;  %v5429_v44 = vshrl.u32 %v3136_v41, 7  ;;  %v2469_v41 = vld [vmem:[%s5875_s5 + $0x1c0] sm:$0xff] }
 0xc5a   : > { %v2023_v56 = vmul.f32 %v4944_v55, %v4940_v45  ;;  %v2447_v55 = vld [vmem:[%s5875_s5 + $0x110] sm:$0xff] }
 0xc5b   : > { %v3138_v48 = vsub.s32 0, %v5429_v44 }
 0xc5c   : > { %4479 = vmatprep.mubr.msk.f32.mxu0 %vm907_vm4, %v2023_v56 }
 0xc5d   : > { %4480 = vmatmul.mubr.msk.f32.vlgmr.msra.gmra.mrb[12].mxu0 %vm907_vm4, %v2024_v57  ;;  %v5458_v53 = vrot.slane %v5448_v51, %v3138_v48  ;;  %v3158_v57 = vsub.s32 1, %v5429_v44  ;;  %v2475_v48 = vld [vmem:[%s5875_s5 + $0x1f0] sm:$0xff] }
 0xc5e   : > { %4483 = vmatpush3.msk.msra.mxu0 %vm1017_vm5, %v5170_v1  ;;  %v2413_v1 = vld [vmem:[%s5875_s5] sm:$0xff] }
 0xc5f   : > { %4487 = vmatprep.subr.mxu0 %v816_v36 }
 0xd30   : > { %v4481_v58 = vpop.f32.mrb[12].mxu0 }
 0xd31   : > { %v2103_v59 = vpop.f32.mrb[13].mxu0 }
 0xd32   : > { %4484 = vmatprep.mubr.msk.f32.mxu0 %vm817_vm2, %v2103_v59  ;;  %v2448_v59 = vld [vmem:[%s5875_s5 + $0x118] sm:$0xff] }
 0xd33   : > { %4485 = vmatmul.mubr.msk.f32.vlgmr.msra.gmra.mrb[14].mxu0 %vm817_vm2, %v4481_v58 }
 0xd34   : > { %4488 = vmatpush3.msra.mxu0 %v816_v36 }
 0xd35   : > { %4793 = vmatprep.subr.bf16.mxu0 %v5097_v10 }
 0xe06   : > { %v4486_v60 = vpop.f32.mrb[14].mxu0 }
 0xe07   : > { %v2184_v61 = vpop.f32.mrb[15].mxu0 }
 0xe08   : > { %4489 = vmatprep.mubr.msk.f32.mxu0 %vm1381_vm6, %v2184_v61  ;;  %v2449_v61 = vld [vmem:[%s5875_s5 + $0x120] sm:$0xff] }
 0xe09   : > { %4490 = vmatmul.mubr.msk.f32.vlgmr.msra.gmra.mrb[8].mxu0 %vm1381_vm6, %v4486_v60 }
 0xe0a   : > { %4795 = vmatpush3.bf16.msra.mxu0 %v5097_v10  ;;  %4524 = vmatprep.mubr.msk.f32.mxu0 %vm478_vm0, %v2413_v1  ;;  %v5483_v1 = vld [vmem:[%s5877_s7] ss:$0 sm:$0xff] }
 0xe0b   : > { %4797 = vmatprep.subr.bf16.mxu0 %v5099_v12 }
 0xe0e   : > { %4799 = vmatpush3.bf16.msra.mxu0 %v5099_v12 }
 0xe0f   : > { %4801 = vmatprep.subr.bf16.mxu0 %v5104_v15 }
 0xe12   : > { %4803 = vmatpush3.bf16.msra.mxu0 %v5104_v15 }
 0xe13   : > { %4805 = vmatprep.subr.bf16.mxu0 %v5108_v18 }
 0xe16   : > { %4807 = vmatpush3.bf16.msra.mxu0 %v5108_v18 }
 0xe19   : > { %4525 = vmatmul.mubr.msk.f32.vlgmr.msra.gmra.mrb[16].mxu0 %vm478_vm0, %v2414_v62 }
 0xe1a   : > { %4527 = vmatprep.mubr.msk.f32.mxu0 %vm478_vm0, %v2415_v63 }
 0xe1d   : > { %4528 = vmatmul.mubr.msk.f32.gmra.mrb[18].mxu0 %vm478_vm0, %v2416_v0  ;;  %v5488_v0 = vrot.slane %v5448_v51, %v3158_v57 }
 0xe1e   : > { %4530 = vmatprep.mubr.msk.f32.mxu0 %vm478_vm0, %v2417_v2 }
 0xe21   : > { %4531 = vmatmul.mubr.msk.f32.gmra.mrb[20].mxu0 %vm478_vm0, %v2418_v3 }
 0xe22   : > { %4533 = vmatprep.mubr.msk.f32.mxu0 %vm478_vm0, %v2419_v4 }
 0xe25   : > { %4534 = vmatmul.mubr.msk.f32.gmra.mrb[22].mxu0 %vm478_vm0, %v2420_v5  ;;  %v2450_v5 = vld [vmem:[%s5875_s5 + $0x128] sm:$0xff] }
 0xe26   : > { %4536 = vmatprep.mubr.msk.f32.mxu0 %vm478_vm0, %v2421_v6 }
 0xe29   : > { %4537 = vmatmul.mubr.msk.f32.gmra.mrb[24].mxu0 %vm478_vm0, %v2422_v7 }
 0xe2a   : > { %4539 = vmatprep.mubr.msk.f32.mxu0 %vm478_vm0, %v2423_v8  ;;  %v2451_v8 = vld [vmem:[%s5875_s5 + $0x130] sm:$0xff] }
 0xe2d   : > { %4540 = vmatmul.mubr.msk.f32.gmra.mrb[26].mxu0 %vm478_vm0, %v2424_v9 }
 0xe2e   : > { %4542 = vmatprep.mubr.msk.f32.mxu0 %vm478_vm0, %v2425_v11 }
 0xe31   : > { %4543 = vmatmul.mubr.msk.f32.gmra.mrb[28].mxu0 %vm478_vm0, %v2426_v13 }
 0xe32   : > { %4545 = vmatprep.mubr.msk.f32.mxu0 %vm478_vm0, %v2427_v14 }
 0xe35   : > { %4546 = vmatmul.mubr.msk.f32.gmra.mrb[30].mxu0 %vm478_vm0, %v2428_v16 }
 0xe36   : > { %4548 = vmatprep.mubr.msk.f32.mxu0 %vm478_vm0, %v2429_v17  ;;  %v2452_v17 = vld [vmem:[%s5875_s5 + $0x138] sm:$0xff] }
 0xe39   : > { %4549 = vmatmul.mubr.msk.f32.gmra.mrb[32].mxu0 %vm478_vm0, %v2430_v27 }
 0xe3a   : > { %4551 = vmatprep.mubr.msk.f32.mxu0 %vm478_vm0, %v2431_v19 }
 0xe3d   : > { %4552 = vmatmul.mubr.msk.f32.gmra.mrb[34].mxu0 %vm478_vm0, %v2432_v26  ;;  %v2453_v26 = vld [vmem:[%s5875_s5 + $0x140] sm:$0xff] }
 0xe3e   : > { %4554 = vmatprep.mubr.msk.f32.mxu0 %vm478_vm0, %v2433_v20 }
 0xe41   : > { %4555 = vmatmul.mubr.msk.f32.gmra.mrb[36].mxu0 %vm478_vm0, %v2434_v21 }
 0xe42   : > { %4557 = vmatprep.mubr.msk.f32.mxu0 %vm478_vm0, %v2435_v22 }
 0xe45   : > { %4558 = vmatmul.mubr.msk.f32.gmra.mrb[38].mxu0 %vm478_vm0, %v2436_v23  ;;  %v2454_v23 = vld [vmem:[%s5875_s5 + $0x148] sm:$0xff] }
 0xe46   : > { %4560 = vmatprep.mubr.msk.f32.mxu0 %vm478_vm0, %v2437_v24  ;;  %v2455_v24 = vld [vmem:[%s5875_s5 + $0x150] sm:$0xff] }
 0xe49   : > { %4561 = vmatmul.mubr.msk.f32.gmra.mrb[40].mxu0 %vm478_vm0, %v2438_v25  ;;  %v2456_v25 = vld [vmem:[%s5875_s5 + $0x158] sm:$0xff] }
 0xe4a   : > { %4563 = vmatprep.mubr.msk.f32.mxu0 %vm478_vm0, %v2439_v28  ;;  %v2457_v28 = vld [vmem:[%s5875_s5 + $0x160] sm:$0xff] }
 0xe4d   : > { %4564 = vmatmul.mubr.msk.f32.gmra.mrb[42].mxu0 %vm478_vm0, %v2440_v29  ;;  %v2458_v29 = vld [vmem:[%s5875_s5 + $0x168] sm:$0xff] }
 0xe4e   : > { %4566 = vmatprep.mubr.msk.f32.mxu0 %vm478_vm0, %v2441_v30  ;;  %v2459_v30 = vld [vmem:[%s5875_s5 + $0x170] sm:$0xff] }
 0xe51   : > { %4567 = vmatmul.mubr.msk.f32.gmra.mrb[44].mxu0 %vm478_vm0, %v2442_v32  ;;  %v2460_v32 = vld [vmem:[%s5875_s5 + $0x178] sm:$0xff] }
 0xedc   : > { %v4491_v31 = vpop.f32.mrb[8].mxu0 }
 0xedd   : > { %v2265_v33 = vpop.f32.mrb[9].mxu0 }
 0xede   : > { %v4788_v34 = vpack.c.bf16 %v4491_v31, %v2265_v33  ;;  %v2461_v31 = vld [vmem:[%s5875_s5 + $0x180] sm:$0xff]  ;;  %v2462_v33 = vld [vmem:[%s5875_s5 + $0x188] sm:$0xff] }
 0xee0   : > { %4789 = vmatprep.subr.bf16.mxu1 %v4788_v34 }
 0xee1   : > { %4791 = vmatpush3.bf16.msra.mxu1 %v4788_v34  ;;  %v2463_v34 = vld [vmem:[%s5875_s5 + $0x190] sm:$0xff] }
 0xee2   : > { %4848 = vmatprep.subr.bf16.mxu1 %v5097_v10 }
 0xee4   : > { %4497 = vmatmul.mubr.msk.f32.vlgmr.msra.gmra.mrb[18].mxu1 %vm907_vm4, %v2277_v37  ;;  %v2464_v37 = vld [vmem:[%s5875_s5 + $0x198] sm:$0xff] }
 0xee5   : > { %4852 = vmatpush3.bf16.msra.mxu1 %v5097_v10  ;;  %4499 = vmatprep.mubr.msk.f32.mxu1 %vm907_vm4, %v2278_v38  ;;  %v2281_v10 = vld [vmem:[%s5873_s3 + $0x28] sm:$0xff]  ;;  %v2465_v38 = vld [vmem:[%s5875_s5 + $0x1a0] sm:$0xff] }
 0xee6   : > { %4849 = vmatprep.subr.bf16.mxu1 %v5099_v12 }
 0xee8   : > { %4500 = vmatmul.mubr.msk.f32.gmra.mrb[20].mxu1 %vm907_vm4, %v2279_v39  ;;  %v2466_v39 = vld [vmem:[%s5875_s5 + $0x1a8] sm:$0xff] }
 0xee9   : > { %4853 = vmatpush3.bf16.msra.mxu1 %v5099_v12  ;;  %4502 = vmatprep.mubr.msk.f32.mxu1 %vm907_vm4, %v2280_v40  ;;  %v2283_v12 = vld [vmem:[%s5873_s3 + $0x38] sm:$0xff]  ;;  %v2467_v40 = vld [vmem:[%s5875_s5 + $0x1b0] sm:$0xff] }
 0xeea   : > { %4850 = vmatprep.subr.bf16.mxu1 %v5104_v15 }
 0xeec   : > { %4503 = vmatmul.mubr.msk.f32.gmra.mrb[22].mxu1 %vm907_vm4, %v2281_v10  ;;  %v4526_v43 = vpop.f32.mrb[16].mxu0  ;;  %v2468_v10 = vld [vmem:[%s5875_s5 + $0x1b8] sm:$0xff] }
 0xeed   : > { %4854 = vmatpush3.bf16.msra.mxu1 %v5104_v15  ;;  %4505 = vmatprep.mubr.msk.f32.mxu1 %vm907_vm4, %v2282_v42  ;;  %v2767_v45 = vpop.f32.mrb[17].mxu0  ;;  %v2444_v15 = vld [vmem:[%s5875_s5 + $0xf8] sm:$0xff]  ;;  %v3141_v56 = vmul.f32 %v4526_v43, %v5458_v53  ;;  %v2470_v42 = vld [vmem:[%s5875_s5 + $0x1c8] sm:$0xff]  ;;  %v2471_v43 = vld [vmem:[%s5875_s5 + $0x1d0] sm:$0xff] }
 0xeee   : > { %4851 = vmatprep.subr.bf16.mxu1 %v5108_v18  ;;  %v3140_v36 = vmul.f32 %v5458_v53, %v2767_v45  ;;  %v2473_v45 = vld [vmem:[%s5875_s5 + $0x1e0] sm:$0xff] }
 0xeef   : > { %v3149_v62 = vadd.f32 %v5483_v1, %v3141_v56  ;;  %v2477_v56 = vld [vmem:[%s5875_s5 + $0x200] sm:$0xff] }
 0xef0   : > { %4506 = vmatmul.mubr.msk.f32.gmra.mrb[24].mxu1 %vm907_vm4, %v2283_v12  ;;  %v4529_v47 = vpop.f32.mrb[18].mxu0  ;;  %v3148_v2 = vadd.f32 %v5483_v1, %v3140_v36  ;;  %v2472_v12 = vld [vmem:[%s5875_s5 + $0x1d8] sm:$0xff] }
 0xef1   : > { %4855 = vmatpush3.bf16.msra.mxu1 %v5108_v18  ;;  %4569 = vmatprep.mubr.msk.f32.mxu1 %vm478_vm0, %v2443_v46  ;;  %v2777_v49 = vpop.f32.mrb[19].mxu0  ;;  %v3143_v63 = vmul.f32 %v4529_v47, %v5458_v53  ;;  %v2474_v47 = vld [vmem:[%s5875_s5 + $0x1e8] sm:$0xff] }
 0xef2   : > { %v3142_v3 = vmul.f32 %v5458_v53, %v2777_v49 }
 0xef3   : > { %v3151_v11 = vadd.f32 %v5483_v1, %v3143_v63 }
 0xef4   : > { %4570 = vmatmul.mubr.msk.f32.vlgmr.msra.gmra.mrb[26].mxu1 %vm478_vm0, %v2444_v15  ;;  %v5451_v18 = vpop.f32.mrb[20].mxu0  ;;  %v3150_v14 = vadd.f32 %v5483_v1, %v3142_v3  ;;  %v2479_v3 = vld [vmem:[%s5875_s5 + $0x210] sm:$0xff] }
 0xef5   : > { %4572 = vmatprep.mubr.msk.f32.mxu1 %vm478_vm0, %v2445_v50  ;;  %v5460_v54 = vpop.f32.mrb[21].mxu0  ;;  %v3145_v46 = vmul.f32 %v5451_v18, %v5458_v53  ;;  %v2476_v18 = vld [vmem:[%s5875_s5 + $0x1f8] sm:$0xff] }
 0xef6   : > { %v3144_v15 = vmul.f32 %v5458_v53, %v5460_v54 }
 0xef7   : > { %v3153_v49 = vadd.f32 %v5483_v1, %v3145_v46 }
 0xef8   : > { %4573 = vmatmul.mubr.msk.f32.gmra.mrb[28].mxu1 %vm478_vm0, %v2446_v52  ;;  %v5469_v58 = vpop.f32.mrb[22].mxu0  ;;  %v3152_v52 = vadd.f32 %v5483_v1, %v3144_v15 }
 0xef9   : > { %4575 = vmatprep.mubr.msk.f32.mxu1 %vm478_vm0, %v2447_v55  ;;  %v5475_v60 = vpop.f32.mrb[23].mxu0  ;;  %v3147_v50 = vmul.f32 %v5469_v58, %v5458_v53 }
 0xefa   : > { %v3146_v54 = vmul.f32 %v5458_v53, %v5475_v60  ;;  %v2478_v53 = vld [vmem:[%s5875_s5 + $0x208] sm:$0xff] }
 0xefc   : > { %4576 = vmatmul.mubr.msk.f32.gmra.mrb[30].mxu1 %vm478_vm0, %v2448_v59  ;;  %v4538_v4 = vpop.f32.mrb[24].mxu0  ;;  %v3155_v59 = vadd.f32 %v5483_v1, %v3147_v50  ;;  %v3154_v60 = vadd.f32 %v5483_v1, %v3146_v54  ;;  %v2480_v1 = vld [vmem:[%s5875_s5 + $0x218] sm:$0xff] }
 0xefd   : > { %4578 = vmatprep.mubr.msk.f32.mxu1 %vm478_vm0, %v2449_v61  ;;  %v3161_v6 = vmul.f32 %v4538_v4, %v5488_v0  ;;  %v2807_v7 = vpop.f32.mrb[25].mxu0 }
 0xefe   : > { %v3160_v9 = vmul.f32 %v5488_v0, %v2807_v7 }
 0xeff   : > { %v5503_v13 = vadd.f32 %v3161_v6, %v3149_v62  ;;  %v3178_v62 = vsub.s32 2, %v5429_v44 }
 0xf00   : > { %4579 = vmatmul.mubr.msk.f32.gmra.mrb[32].mxu1 %vm478_vm0, %v2450_v5  ;;  %v5507_v16 = vadd.f32 %v3160_v9, %v3148_v2  ;;  %v4541_v35 = vpop.f32.mrb[26].mxu0 }
 0xf01   : > { %4581 = vmatprep.mubr.msk.f32.mxu1 %vm478_vm0, %v2451_v8  ;;  %v3163_v27 = vmul.f32 %v4541_v35, %v5488_v0  ;;  %v2817_v19 = vpop.f32.mrb[27].mxu0  ;;  %v3179_v8 = vrot.slane %v5448_v51, %v3178_v62  ;;  %v3317_v62 = vld [vmem:[%s5878_s8 + $0x8] sm:$0xff] }
 0xf02   : > { %v3162_v20 = vmul.f32 %v5488_v0, %v2817_v19  ;;  %v2482_v19 = vld [vmem:[%s5875_s5 + $0x228] sm:$0xff] }
 0xf03   : > { %v5518_v21 = vadd.f32 %v3163_v27, %v3151_v11 }
 0xf04   : > { %4582 = vmatmul.mubr.msk.f32.gmra.mrb[34].mxu1 %vm478_vm0, %v2452_v17  ;;  %v5521_v22 = vadd.f32 %v3162_v20, %v3150_v14  ;;  %v4544_v55 = vpop.f32.mrb[28].mxu0  ;;  %v2481_v14 = vld [vmem:[%s5875_s5 + $0x220] sm:$0xff] }
 0xf05   : > { %4584 = vmatprep.mubr.msk.f32.mxu1 %vm478_vm0, %v2453_v26  ;;  %v3165_v57 = vmul.f32 %v4544_v55, %v5488_v0  ;;  %v2827_v36 = vpop.f32.mrb[29].mxu0 }
 0xf06   : > { %v3164_v58 = vmul.f32 %v5488_v0, %v2827_v36 }
 0xf07   : > { %v3173_v61 = vadd.f32 %v3165_v57, %v3153_v49 }
 0xf08   : > { %4585 = vmatmul.mubr.msk.f32.gmra.mrb[36].mxu1 %vm478_vm0, %v2454_v23  ;;  %v3172_v63 = vadd.f32 %v3164_v58, %v3152_v52  ;;  %v4547_v2 = vpop.f32.mrb[30].mxu0  ;;  %v2483_v23 = vld [vmem:[%s5875_s5 + $0x230] sm:$0xff] }
 0xf09   : > { %4587 = vmatprep.mubr.msk.f32.mxu1 %vm478_vm0, %v2455_v24  ;;  %v3167_v4 = vmul.f32 %v4547_v2, %v5488_v0  ;;  %v2837_v5 = vpop.f32.mrb[31].mxu0 }
 0xf0a   : > { %v3166_v6 = vmul.f32 %v5488_v0, %v2837_v5 }
 0xf0b   : > { %v3175_v7 = vadd.f32 %v3167_v4, %v3155_v59  ;;  %v3321_v4 = vld [vmem:[%s5878_s8 + $0x28] sm:$0xff] }
 0xf0c   : > { %4588 = vmatmul.mubr.msk.f32.gmra.mrb[38].mxu1 %vm478_vm0, %v2456_v25  ;;  %v3174_v9 = vadd.f32 %v3166_v6, %v3154_v60  ;;  %v4550_v11 = vpop.f32.mrb[32].mxu0  ;;  %v3318_v60 = vld [vmem:[%s5878_s8 + $0x10] sm:$0xff] }
 0xf0d   : > { %4590 = vmatprep.mubr.msk.f32.mxu1 %vm478_vm0, %v2457_v28  ;;  %v3181_v35 = vmul.f32 %v4550_v11, %v3179_v8  ;;  %v2847_v17 = vpop.f32.mrb[33].mxu0  ;;  %v3322_v6 = vld [vmem:[%s5878_s8 + $0x30] sm:$0xff] }
 0xf0e   : > { %v3180_v0 = vmul.f32 %v3179_v8, %v2847_v17 }
 0xf0f   : > { %v3189_v27 = vadd.f32 %v3181_v35, %v5503_v13  ;;  %v3327_v35 = vld [vmem:[%s5878_s8 + $0x58] sm:$0xff] }
 0xf10   : > { %4591 = vmatmul.mubr.msk.f32.gmra.mrb[40].mxu1 %vm478_vm0, %v2458_v29  ;;  %v3188_v26 = vadd.f32 %v3180_v0, %v5507_v16  ;;  %v4553_v20 = vpop.f32.mrb[34].mxu0  ;;  %v2484_v29 = vld [vmem:[%s5875_s5 + $0x238] sm:$0xff]  ;;  %v3218_v0 = vsub.s32 4, %v5429_v44 }
 0xf11   : > { %4593 = vmatprep.mubr.msk.f32.mxu1 %vm478_vm0, %v2459_v30  ;;  %v3183_v24 = vmul.f32 %v4553_v20, %v3179_v8  ;;  %v2857_v25 = vpop.f32.mrb[35].mxu0 }
 0xf12   : > { %v3182_v28 = vmul.f32 %v3179_v8, %v2857_v25  ;;  %v3219_v20 = vrot.slane %v5448_v51, %v3218_v0 }
 0xf13   : > { %v3191_v13 = vadd.f32 %v3183_v24, %v5518_v21 }
 0xf14   : > { %4594 = vmatmul.mubr.msk.f32.gmra.mrb[42].mxu1 %vm478_vm0, %v2460_v32  ;;  %v3190_v16 = vadd.f32 %v3182_v28, %v5521_v22  ;;  %v4556_v30 = vpop.f32.mrb[36].mxu0 }
 0xf15   : > { %4596 = vmatprep.mubr.msk.f32.mxu1 %vm478_vm0, %v2461_v31  ;;  %v3185_v32 = vmul.f32 %v4556_v30, %v3179_v8  ;;  %v2867_v31 = vpop.f32.mrb[37].mxu0 }
 0xf18   : > { %4597 = vmatmul.mubr.msk.f32.gmra.mrb[44].mxu1 %vm478_vm0, %v2462_v33  ;;  %v3184_v33 = vmul.f32 %v3179_v8, %v2867_v31 }
 0xf19   : > { %4599 = vmatprep.mubr.msk.f32.mxu1 %vm478_vm0, %v2463_v34  ;;  %v3193_v34 = vadd.f32 %v3185_v32, %v3173_v61  ;;  %v3316_v61 = vld [vmem:[%s5878_s8] sm:$0xff] }
 0xf1c   : > { %4600 = vmatmul.mubr.msk.f32.gmra.mrb[46].mxu1 %vm478_vm0, %v2464_v37  ;;  %v3198_v37 = vsub.s32 3, %v5429_v44 }
 0xf1d   : > { %4602 = vmatprep.mubr.msk.f32.mxu1 %vm478_vm0, %v2465_v38  ;;  %v3192_v38 = vadd.f32 %v3184_v33, %v3172_v63  ;;  %v3319_v63 = vld [vmem:[%s5878_s8 + $0x18] sm:$0xff] }
 0xf1e   : > { %v4812_v2 = vpack.c.bf16 %v3319_v63, %v3318_v60 }
 0xf20   : > { %4603 = vmatmul.mubr.msk.f32.gmra.mrb[48].mxu1 %vm478_vm0, %v2466_v39  ;;  %v4559_v39 = vpop.f32.mrb[38].mxu0 }
 0xf21   : > { %4605 = vmatprep.mubr.msk.f32.mxu1 %vm478_vm0, %v2467_v40  ;;  %v3187_v21 = vmul.f32 %v4559_v39, %v3179_v8  ;;  %v2877_v40 = vpop.f32.mrb[39].mxu0 }
 0xf24   : > { %4606 = vmatmul.mubr.msk.f32.gmra.mrb[50].mxu1 %vm478_vm0, %v2468_v10  ;;  %v3186_v10 = vmul.f32 %v3179_v8, %v2877_v40 }
 0xf25   : > { %4608 = vmatprep.mubr.msk.f32.mxu1 %vm478_vm0, %v2469_v41  ;;  %v3195_v41 = vadd.f32 %v3187_v21, %v3175_v7  ;;  %v3323_v7 = vld [vmem:[%s5878_s8 + $0x38] sm:$0xff] }
 0xf26   : > { %v4820_v8 = vpack.c.bf16 %v3323_v7, %v3322_v6 }
 0xf28   : > { %4609 = vmatmul.mubr.msk.f32.gmra.mrb[52].mxu1 %vm478_vm0, %v2470_v42  ;;  %v3199_v42 = vrot.slane %v5448_v51, %v3198_v37 }
 0xf29   : > { %4611 = vmatprep.mubr.msk.f32.mxu1 %vm478_vm0, %v2471_v43  ;;  %v3194_v43 = vadd.f32 %v3186_v10, %v3174_v9  ;;  %v3325_v9 = vld [vmem:[%s5878_s8 + $0x48] sm:$0xff] }
 0xf2c   : > { %4612 = vmatmul.mubr.msk.f32.gmra.mrb[54].mxu1 %vm478_vm0, %v2472_v12  ;;  %v4562_v12 = vpop.f32.mrb[40].mxu0 }
 0xf2d   : > { %4614 = vmatprep.mubr.msk.f32.mxu1 %vm478_vm0, %v2473_v45  ;;  %v3201_v22 = vmul.f32 %v4562_v12, %v3199_v42  ;;  %v2887_v45 = vpop.f32.mrb[41].mxu0  ;;  %v3238_v12 = vsub.s32 5, %v5429_v44 }
 0xf2e   : > { %v3200_v46 = vmul.f32 %v3199_v42, %v2887_v45 }
 0xf30   : > { %4615 = vmatmul.mubr.msk.f32.gmra.mrb[56].mxu1 %vm478_vm0, %v2474_v47  ;;  %v3209_v47 = vadd.f32 %v3201_v22, %v3189_v27  ;;  %v3208_v15 = vadd.f32 %v3200_v46, %v3188_v26 }
 0xf31   : > { %4617 = vmatprep.mubr.msk.f32.mxu1 %vm478_vm0, %v2475_v48  ;;  %v4565_v48 = vpop.f32.mrb[42].mxu0 }
 0xf32   : > { %v3203_v49 = vmul.f32 %v4565_v48, %v3199_v42  ;;  %v2897_v50 = vpop.f32.mrb[43].mxu0 }
 0xf33   : > { %v4568_v55 = vpop.f32.mrb[44].mxu0 }
 0xf34   : > { %4618 = vmatmul.mubr.msk.f32.gmra.mrb[58].mxu1 %vm478_vm0, %v2476_v18  ;;  %v3202_v18 = vmul.f32 %v3199_v42, %v2897_v50  ;;  %v3211_v52 = vadd.f32 %v3203_v49, %v3191_v13  ;;  %v2907_v57 = vpop.f32.mrb[45].mxu0 }
 0xf35   : > { %4620 = vmatprep.mubr.msk.f32.mxu1 %vm478_vm0, %v2477_v56  ;;  %v3205_v56 = vmul.f32 %v4568_v55, %v3199_v42  ;;  %v3204_v36 = vmul.f32 %v3199_v42, %v2907_v57 }
 0xf36   : > { %v3210_v54 = vadd.f32 %v3202_v18, %v3190_v16 }
 0xf37   : > { %v3213_v58 = vadd.f32 %v3205_v56, %v3193_v34  ;;  %v3212_v59 = vadd.f32 %v3204_v36, %v3192_v38 }
 0xf38   : > { %4621 = vmatmul.mubr.msk.f32.gmra.mrb[60].mxu1 %vm478_vm0, %v2478_v53  ;;  %v4808_v53 = vpack.c.bf16 %v3317_v62, %v3316_v61 }
 0xf39   : > { %4623 = vmatprep.mubr.msk.f32.mxu1 %vm478_vm0, %v2479_v3  ;;  %v3320_v3 = vld [vmem:[%s5878_s8 + $0x20] sm:$0xff] }
 0xf3a   : > { %4809 = vmatprep.subr.bf16.mxu0 %v4808_v53  ;;  %v4816_v5 = vpack.c.bf16 %v3321_v4, %v3320_v3 }
 0xf3b   : > { %4811 = vmatpush3.bf16.msra.mxu0 %v4808_v53 }
 0xf3c   : > { %4624 = vmatmul.mubr.msk.f32.gmra.mrb[62].mxu1 %vm478_vm0, %v2480_v1  ;;  %4813 = vmatprep.subr.bf16.mxu0 %v4812_v2  ;;  %v3324_v1 = vld [vmem:[%s5878_s8 + $0x40] sm:$0xff] }
 0xf3d   : > { %4626 = vmatprep.mubr.msk.f32.mxu1 %vm478_vm0, %v2481_v14  ;;  %v4824_v11 = vpack.c.bf16 %v3325_v9, %v3324_v1  ;;  %v3326_v14 = vld [vmem:[%s5878_s8 + $0x50] sm:$0xff] }
 0xf3e   : > { %v4828_v17 = vpack.c.bf16 %v3327_v35, %v3326_v14 }
 0xf3f   : > { %4815 = vmatpush3.bf16.msra.mxu0 %v4812_v2  ;;  %v3258_v2 = vsub.s32 6, %v5429_v44 }
 0xf40   : > { %4627 = vmatmul.mubr.msk.f32.gmra.mrb[64].mxu1 %vm478_vm0, %v2482_v19  ;;  %4817 = vmatprep.subr.bf16.mxu0 %v4816_v5 }
 0xf41   : > { %4629 = vmatprep.mubr.msk.f32.mxu1 %vm478_vm0, %v2483_v23  ;;  %v3259_v1 = vrot.slane %v5448_v51, %v3258_v2 }
 0xf43   : > { %4819 = vmatpush3.bf16.msra.mxu0 %v4816_v5 }
 0xf44   : > { %4630 = vmatmul.mubr.msk.f32.gmra.mrb[66].mxu1 %vm478_vm0, %v2484_v29  ;;  %4821 = vmatprep.subr.bf16.mxu0 %v4820_v8 }
 0xf47   : > { %4823 = vmatpush3.bf16.msra.mxu0 %v4820_v8 }
 0xf48   : > { %4825 = vmatprep.subr.bf16.mxu0 %v4824_v11 }
 0xf4b   : > { %4827 = vmatpush3.bf16.msra.mxu0 %v4824_v11 }
 0xf4c   : > { %4829 = vmatprep.subr.bf16.mxu0 %v4828_v17 }
 0xf4f   : > { %4831 = vmatpush3.bf16.msra.mxu0 %v4828_v17 }
 0xfc7   : > { %v4571_v27 = vpop.f32.mrb[26].mxu1 }
 0xfc8   : > { %v3207_v19 = vmul.f32 %v4571_v27, %v3199_v42  ;;  %v2917_v26 = vpop.f32.mrb[27].mxu1 }
 0xfc9   : > { %v3206_v23 = vmul.f32 %v3199_v42, %v2917_v26 }
 0xfca   : > { %v3215_v24 = vadd.f32 %v3207_v19, %v3195_v41 }
 0xfcb   : > { %v3214_v25 = vadd.f32 %v3206_v23, %v3194_v43  ;;  %v4574_v28 = vpop.f32.mrb[28].mxu1 }
 0xfcc   : > { %v3221_v13 = vmul.f32 %v4574_v28, %v3219_v20  ;;  %v2927_v29 = vpop.f32.mrb[29].mxu1 }
 0xfcd   : > { %v3220_v16 = vmul.f32 %v3219_v20, %v2927_v29 }
 0xfce   : > { %v3229_v30 = vadd.f32 %v3221_v13, %v3209_v47  ;;  %v3239_v47 = vrot.slane %v5448_v51, %v3238_v12 }
 0xfcf   : > { %v3228_v32 = vadd.f32 %v3220_v16, %v3208_v15  ;;  %v4577_v31 = vpop.f32.mrb[30].mxu1 }
 0xfd0   : > { %v3223_v33 = vmul.f32 %v4577_v31, %v3219_v20  ;;  %v2937_v34 = vpop.f32.mrb[31].mxu1 }
 0xfd1   : > { %v3222_v37 = vmul.f32 %v3219_v20, %v2937_v34 }
 0xfd2   : > { %v3231_v38 = vadd.f32 %v3223_v33, %v3211_v52 }
 0xfd3   : > { %v3230_v39 = vadd.f32 %v3222_v37, %v3210_v54  ;;  %v4580_v21 = vpop.f32.mrb[32].mxu1 }
 0xfd4   : > { %v3225_v40 = vmul.f32 %v4580_v21, %v3219_v20  ;;  %v2947_v10 = vpop.f32.mrb[33].mxu1 }
 0xfd5   : > { %v3224_v42 = vmul.f32 %v3219_v20, %v2947_v10 }
 0xfd6   : > { %v3233_v41 = vadd.f32 %v3225_v40, %v3213_v58 }
 0xfd7   : > { %v3232_v43 = vadd.f32 %v3224_v42, %v3212_v59  ;;  %v4583_v22 = vpop.f32.mrb[34].mxu1 }
 0xfd8   : > { %v3227_v45 = vmul.f32 %v4583_v22, %v3219_v20  ;;  %v2957_v46 = vpop.f32.mrb[35].mxu1 }
 0xfd9   : > { %v3226_v15 = vmul.f32 %v3219_v20, %v2957_v46 }
 0xfda   : > { %v3235_v48 = vadd.f32 %v3227_v45, %v3215_v24 }
 0xfdb   : > { %v3234_v49 = vadd.f32 %v3226_v15, %v3214_v25  ;;  %v4586_v50 = vpop.f32.mrb[36].mxu1 }
 0xfdc   : > { %v3241_v18 = vmul.f32 %v4586_v50, %v3239_v47  ;;  %v2967_v52 = vpop.f32.mrb[37].mxu1 }
 0xfdd   : > { %v3240_v54 = vmul.f32 %v3239_v47, %v2967_v52 }
 0xfde   : > { %v3249_v55 = vadd.f32 %v3241_v18, %v3229_v30 }
 0xfdf   : > { %v3248_v56 = vadd.f32 %v3240_v54, %v3228_v32  ;;  %v4589_v57 = vpop.f32.mrb[38].mxu1  ;;  %v3278_v32 = vsub.s32 7, %v5429_v44 }
 0xfe0   : > { %v3243_v36 = vmul.f32 %v4589_v57, %v3239_v47  ;;  %v2977_v61 = vpop.f32.mrb[39].mxu1 }
 0xfe1   : > { %v3242_v62 = vmul.f32 %v3239_v47, %v2977_v61  ;;  %v3279_v21 = vrot.slane %v5448_v51, %v3278_v32 }
 0xfe2   : > { %v3251_v58 = vadd.f32 %v3243_v36, %v3231_v38 }
 0xfe3   : > { %v3250_v59 = vadd.f32 %v3242_v62, %v3230_v39  ;;  %v4592_v53 = vpop.f32.mrb[40].mxu1 }
 0xfe4   : > { %v3245_v60 = vmul.f32 %v4592_v53, %v3239_v47  ;;  %v2987_v63 = vpop.f32.mrb[41].mxu1 }
 0xfe5   : > { %v3244_v3 = vmul.f32 %v3239_v47, %v2987_v63 }
 0xfe6   : > { %v3253_v4 = vadd.f32 %v3245_v60, %v3233_v41 }
 0xfe7   : > { %v3252_v5 = vadd.f32 %v3244_v3, %v3232_v43  ;;  %v4595_v6 = vpop.f32.mrb[42].mxu1 }
 0xfe8   : > { %v3247_v7 = vmul.f32 %v4595_v6, %v3239_v47  ;;  %v2997_v8 = vpop.f32.mrb[43].mxu1 }
 0xfe9   : > { %v3246_v9 = vmul.f32 %v3239_v47, %v2997_v8 }
 0xfea   : > { %v3255_v11 = vadd.f32 %v3247_v7, %v3235_v48 }
 0xfeb   : > { %v3254_v14 = vadd.f32 %v3246_v9, %v3234_v49  ;;  %v4598_v35 = vpop.f32.mrb[44].mxu1 }
 0xfec   : > { %v3261_v17 = vmul.f32 %v4598_v35, %v3259_v1  ;;  %v3007_v0 = vpop.f32.mrb[45].mxu1 }
 0xfed   : > { %v3260_v27 = vmul.f32 %v3259_v1, %v3007_v0 }
 0xfee   : > { %v3269_v19 = vadd.f32 %v3261_v17, %v3249_v55 }
 0xfef   : > { %v3268_v26 = vadd.f32 %v3260_v27, %v3248_v56  ;;  %v4601_v20 = vpop.f32.mrb[46].mxu1 }
 0xff0   : > { %v3263_v23 = vmul.f32 %v4601_v20, %v3259_v1  ;;  %v3017_v24 = vpop.f32.mrb[47].mxu1 }
 0xff1   : > { %v3262_v25 = vmul.f32 %v3259_v1, %v3017_v24 }
 0xff2   : > { %v3271_v28 = vadd.f32 %v3263_v23, %v3251_v58  ;;  %v4095_v58 = vld [vmem:[%s5876_s6 + $0x8] ss:$0 sm:$0xff] }
 0xff3   : > { %v3270_v13 = vadd.f32 %v3262_v25, %v3250_v59  ;;  %v4604_v29 = vpop.f32.mrb[48].mxu1 }
 0xff4   : > { %v3265_v16 = vmul.f32 %v4604_v29, %v3259_v1  ;;  %v3027_v30 = vpop.f32.mrb[49].mxu1 }
 0xff5   : > { %v3264_v31 = vmul.f32 %v3259_v1, %v3027_v30 }
 0xff6   : > { %v3273_v33 = vadd.f32 %v3265_v16, %v3253_v4 }
 0xff7   : > { %v3272_v34 = vadd.f32 %v3264_v31, %v3252_v5  ;;  %v4607_v37 = vpop.f32.mrb[50].mxu1 }
 0xff8   : > { %v3267_v38 = vmul.f32 %v4607_v37, %v3259_v1  ;;  %v3037_v39 = vpop.f32.mrb[51].mxu1 }
 0xff9   : > { %v3266_v40 = vmul.f32 %v3259_v1, %v3037_v39 }
 0xffa   : > { %v3275_v10 = vadd.f32 %v3267_v38, %v3255_v11 }
 0xffb   : > { %v3274_v12 = vadd.f32 %v3266_v40, %v3254_v14  ;;  %v4610_v42 = vpop.f32.mrb[52].mxu1 }
 0xffc   : > { %v3281_v41 = vmul.f32 %v4610_v42, %v3279_v21  ;;  %v3047_v43 = vpop.f32.mrb[53].mxu1 }
 0xffd   : > { %v3280_v22 = vmul.f32 %v3279_v21, %v3047_v43 }
 0xffe   : > { %v3289_v45 = vadd.f32 %v3281_v41, %v3269_v19 }
 0xfff   : > { %v3288_v46 = vadd.f32 %v3280_v22, %v3268_v26  ;;  %v4613_v47 = vpop.f32.mrb[54].mxu1 }
0x1000   : > { %v3283_v15 = vmul.f32 %v4613_v47, %v3279_v21  ;;  %v3057_v44 = vpop.f32.mrb[55].mxu1 }
0x1001   : > { %v3282_v48 = vmul.f32 %v3279_v21, %v3057_v44 }
0x1002   : > { %v3291_v49 = vadd.f32 %v3283_v15, %v3271_v28 }
0x1003   : > { %v3290_v50 = vadd.f32 %v3282_v48, %v3270_v13  ;;  %v4616_v18 = vpop.f32.mrb[56].mxu1  ;;  %v4096_v13 = vld [vmem:[%s5879_s9] ss:$0 sm:$0xff] }
0x1004   : > { %v3285_v52 = vmul.f32 %v4616_v18, %v3279_v21  ;;  %v3067_v54 = vpop.f32.mrb[57].mxu1 }
0x1005   : > { %v3284_v55 = vmul.f32 %v3279_v21, %v3067_v54 }
0x1006   : > { %v3293_v51 = vadd.f32 %v3285_v52, %v3273_v33 }
0x1007   : > { %v3292_v56 = vadd.f32 %v3284_v55, %v3272_v34  ;;  %v4619_v57 = vpop.f32.mrb[58].mxu1 }
0x1008   : > { %v3287_v36 = vmul.f32 %v4619_v57, %v3279_v21  ;;  %v3077_v61 = vpop.f32.mrb[59].mxu1 }
0x1009   : > { %v3286_v62 = vmul.f32 %v3279_v21, %v3077_v61 }
0x100a   : > { %v3295_v59 = vadd.f32 %v3287_v36, %v3275_v10 }
0x100b   : > { %v3294_v53 = vadd.f32 %v3286_v62, %v3274_v12  ;;  %v4622_v60 = vpop.f32.mrb[60].mxu1 }
0x100c   : > { %v3301_v63 = vmul.f32 %v4622_v60, %v4095_v58  ;;  %v3087_v2 = vpop.f32.mrb[61].mxu1 }
0x100d   : > { %v3300_v3 = vmul.f32 %v4095_v58, %v3087_v2 }
0x100e   : > { %v3309_v4 = vadd.f32 %v3301_v63, %v3289_v45 }
0x100f   : > { %v3308_v5 = vadd.f32 %v3300_v3, %v3288_v46  ;;  %v4625_v6 = vpop.f32.mrb[62].mxu1 }
0x1010   : > { %v3303_v7 = vmul.f32 %v4625_v6, %v4095_v58  ;;  %v3097_v8 = vpop.f32.mrb[63].mxu1 }
0x1011   : > { %v3302_v1 = vmul.f32 %v4095_v58, %v3097_v8  ;;  %4656 = vmatprep.mubr.msk.f32.mxu0 %vm3335_vm7, %v3308_v5 }
0x1012   : > { %v3311_v9 = vadd.f32 %v3303_v7, %v3291_v49  ;;  %4657 = vmatmul.mubr.msk.f32.vlgmr.msra.gmra.mrb[46].mxu0 %vm3335_vm7, %v3309_v4 }
0x1013   : > { %v3310_v11 = vadd.f32 %v3302_v1, %v3290_v50  ;;  %v4628_v14 = vpop.f32.mrb[64].mxu1  ;;  %v3561_v1 = vld [vmem:[%s5880_s10] sm:$0xff] }
0x1014   : > { %v3305_v35 = vmul.f32 %v4628_v14, %v4095_v58  ;;  %v3107_v17 = vpop.f32.mrb[65].mxu1  ;;  %v3563_v14 = vld [vmem:[%s5880_s10 + $0x10] sm:$0xff] }
0x1015   : > { %v3304_v0 = vmul.f32 %v4095_v58, %v3107_v17  ;;  %4659 = vmatprep.mubr.msk.f32.mxu0 %vm3335_vm7, %v3310_v11 }
0x1016   : > { %v3313_v27 = vadd.f32 %v3305_v35, %v3293_v51  ;;  %4660 = vmatmul.mubr.msk.f32.gmra.mrb[48].mxu0 %vm3335_vm7, %v3311_v9  ;;  %v3562_v9 = vld [vmem:[%s5880_s10 + $0x8] sm:$0xff]  ;;  %v3564_v35 = vld [vmem:[%s5880_s10 + $0x18] sm:$0xff] }
0x1017   : > { %v3312_v19 = vadd.f32 %v3304_v0, %v3292_v56  ;;  %v4631_v26 = vpop.f32.mrb[66].mxu1  ;;  %v4832_v11 = vpack.c.bf16 %v3562_v9, %v3561_v1  ;;  %v4836_v17 = vpack.c.bf16 %v3564_v35, %v3563_v14  ;;  %v3742_v0 = vld [vmem:[%s5881_s11] sm:$0xff] }
0x1018   : > { %v3307_v20 = vmul.f32 %v4631_v26, %v4095_v58  ;;  %v3117_v23 = vpop.f32.mrb[67].mxu1 }
0x1019   : > { %v3306_v24 = vmul.f32 %v4095_v58, %v3117_v23  ;;  %4662 = vmatprep.mubr.msk.f32.mxu0 %vm3335_vm7, %v3312_v19  ;;  %4833 = vmatprep.subr.bf16.mxu0 %v4832_v11  ;;  %v3744_v19 = vld [vmem:[%s5881_s11 + $0x10] sm:$0xff] }
0x101a   : > { %v3315_v25 = vadd.f32 %v3307_v20, %v3295_v59  ;;  %4663 = vmatmul.mubr.msk.f32.gmra.mrb[50].mxu0 %vm3335_vm7, %v3313_v27  ;;  %v3743_v27 = vld [vmem:[%s5881_s11 + $0x8] sm:$0xff]  ;;  %v3745_v20 = vld [vmem:[%s5881_s11 + $0x18] sm:$0xff] }
0x101b   : > { %v3314_v28 = vadd.f32 %v3306_v24, %v3294_v53  ;;  %4835 = vmatpush3.bf16.msra.mxu0 %v4832_v11  ;;  %v4840_v26 = vpack.c.bf16 %v3743_v27, %v3742_v0  ;;  %v4844_v23 = vpack.c.bf16 %v3745_v20, %v3744_v19 }
0x101c   : > { %4837 = vmatprep.subr.bf16.mxu0 %v4836_v17 }
0x101d   : > { %4665 = vmatprep.mubr.msk.f32.mxu0 %vm3335_vm7, %v3314_v28  ;;  %4841 = vmatprep.subr.bf16.mxu1 %v4840_v26 }
0x101e   : > { %4666 = vmatmul.mubr.msk.f32.gmra.mrb[52].mxu0 %vm3335_vm7, %v3315_v25  ;;  %4843 = vmatpush3.bf16.msra.mxu1 %v4840_v26 }
0x101f   : > { %4839 = vmatpush3.bf16.msra.mxu0 %v4836_v17  ;;  %4845 = vmatprep.subr.bf16.mxu1 %v4844_v23 }
0x1022   : > { %4847 = vmatpush3.bf16.msra.mxu1 %v4844_v23 }
0x10e5   : > { %v4658_v29 = vpop.f32.mrb[46].mxu0 }
0x10e6   : > { %v3426_v16 = vpop.f32.mrb[47].mxu0  ;;  %v5734_v33 = vadd.f32 %v4658_v29, %v4096_v13 }
0x10e7   : > { %v5730_v30 = vadd.f32 %v4096_v13, %v3426_v16 }
0x10e9   : > { %3473 = vrot.lane.b32.xlu1 %v5730_v30, %s4986_s18  ;;  %v4661_v32 = vpop.f32.mrb[48].mxu0 }
0x10ea   : > { %v3436_v31 = vpop.f32.mrb[49].mxu0  ;;  %v5742_v39 = vadd.f32 %v4661_v32, %v4096_v13 }
0x10eb   : > { %v5736_v34 = vadd.f32 %v4096_v13, %v3436_v31 }
0x10ed   : > { %3475 = vrot.lane.b32.xlu1 %v5734_v33, %s4986_s18  ;;  %3477 = vrot.lane.b32.xlu0 %v5736_v34, %s4986_s18  ;;  %v4664_v37 = vpop.f32.mrb[50].mxu0 }
0x10ee   : > { %v3446_v38 = vpop.f32.mrb[51].mxu0  ;;  %v3452_v12 = vadd.f32 %v4664_v37, %v4096_v13 }
0x10ef   : > { %v5744_v21 = vadd.f32 %v4096_v13, %v3446_v38 }
0x10f1   : > { %3479 = vrot.lane.b32.xlu1 %v5742_v39, %s4986_s18  ;;  %3481 = vrot.lane.b32.xlu0 %v5744_v21, %s4986_s18  ;;  %v4667_v40 = vpop.f32.mrb[52].mxu0 }
0x10f2   : > { %v3456_v10 = vpop.f32.mrb[53].mxu0  ;;  %v3462_v41 = vadd.f32 %v4667_v40, %v4096_v13 }
0x10f3   : > { %v3457_v42 = vadd.f32 %v4096_v13, %v3456_v10 }
0x10f5   : > { %3483 = vrot.lane.b32.xlu1 %v3452_v12, %s4986_s18  ;;  %3485 = vrot.lane.b32.xlu0 %v3457_v42, %s4986_s18 }
0x10f9   : > { %3487 = vrot.lane.b32.xlu1 %v3462_v41, %s4986_s18 }
0x115b   : > { %v3474_v43 = vpop.permute.xlu1 %3473 }
0x115c   : > { %v3497_v22 = vmul.f32 %v3474_v43, %v5730_v30 }
0x115e   : > { %v5754_v45 = vmul.f32 0.35355338, %v3497_v22 }
0x115f   : > { %v3476_v46 = vpop.permute.xlu1 %3475  ;;  %v3478_v47 = vpop.permute.xlu0 %3477 }
0x1160   : > { %v3498_v15 = vmul.f32 %v3476_v46, %v5734_v33  ;;  %v3499_v44 = vmul.f32 %v3478_v47, %v5736_v34  ;;  %v3513_v48 = vsel %vm564_vm1, %v5754_v45, -inf }
0x1161   : > { %3514 = vmax.xlane.f32.xlu0 %v3513_v48 }
0x1162   : > { %v5760_v49 = vmul.f32 0.35355338, %v3498_v15  ;;  %v5762_v50 = vmul.f32 0.35355338, %v3499_v44 }
0x1163   : > { %v3480_v18 = vpop.permute.xlu1 %3479  ;;  %v3482_v52 = vpop.permute.xlu0 %3481 }
0x1164   : > { %v3500_v54 = vmul.f32 %v3480_v18, %v5742_v39  ;;  %v3501_v55 = vmul.f32 %v3482_v52, %v5744_v21  ;;  %v3516_v51 = vsel %vm564_vm1, %v5760_v49, -inf  ;;  %v3519_v56 = vsel %vm564_vm1, %v5762_v50, -inf }
0x1165   : > { %3517 = vmax.xlane.f32.xlu1 %v3516_v51  ;;  %3520 = vmax.xlane.f32.xlu0 %v3519_v56 }
0x1166   : > { %v5770_v57 = vmul.f32 0.35355338, %v3500_v54  ;;  %v5772_v36 = vmul.f32 0.35355338, %v3501_v55 }
0x1167   : > { %v3484_v61 = vpop.permute.xlu1 %3483  ;;  %v3486_v62 = vpop.permute.xlu0 %3485 }
0x1168   : > { %v3502_v58 = vmul.f32 %v3484_v61, %v3452_v12  ;;  %v3503_v59 = vmul.f32 %v3486_v62, %v3457_v42  ;;  %v3525_v53 = vsel %vm564_vm1, %v5772_v36, -inf  ;;  %v3522_v60 = vsel %vm564_vm1, %v5770_v57, -inf }
0x1169   : > { %3526 = vmax.xlane.f32.xlu1 %v3525_v53  ;;  %3523 = vmax.xlane.f32.xlu0 %v3522_v60 }
0x116a   : > { %v5778_v63 = vmul.f32 0.35355338, %v3502_v58  ;;  %v5780_v2 = vmul.f32 0.35355338, %v3503_v59 }
0x116b   : > { %v3488_v3 = vpop.permute.xlu1 %3487 }
0x116c   : > { %v3504_v4 = vmul.f32 %v3488_v3, %v3462_v41  ;;  %v3528_v5 = vsel %vm564_vm1, %v5778_v63, -inf  ;;  %v3531_v6 = vsel %vm564_vm1, %v5780_v2, -inf }
0x116d   : > { %3529 = vmax.xlane.f32.xlu0 %v3528_v5  ;;  %3532 = vmax.xlane.f32.xlu1 %v3531_v6 }
0x116e   : > { %v5786_v7 = vmul.f32 0.35355338, %v3504_v4 }
0x1170   : > { %v3534_v8 = vsel %vm564_vm1, %v5786_v7, -inf }
0x1171   : > { %3535 = vmax.xlane.f32.xlu0 %v3534_v8 }
0x117e   : > { %3710 = vrot.lane.b32.xlu1 %v5730_v30, %s4985_s17 }
0x1182   : > { %3714 = vrot.lane.b32.xlu1 %v5736_v34, %s4985_s17 }
0x1186   : > { %3716 = vrot.lane.b32.xlu1 %v5742_v39, %s4985_s17 }
0x1187   : > { %3712 = vrot.lane.b32.xlu0 %v5734_v33, %s4985_s17 }
0x118a   : > { %3720 = vrot.lane.b32.xlu1 %v3452_v12, %s4985_s17 }
0x118b   : > { %3718 = vrot.lane.b32.xlu0 %v5744_v21, %s4985_s17 }
0x118e   : > { %3724 = vrot.lane.b32.xlu1 %v3462_v41, %s4985_s17 }
0x118f   : > { %3722 = vrot.lane.b32.xlu0 %v3457_v42, %s4985_s17 }
0x11ee   : > { %v3515_v24 = vpop.xlane.xlu0 %3514 }
0x11ef   : > { %v3537_v25 = vsub.f32 %v5754_v45, %v3515_v24 }
0x11f1   : > { %v3545_v28 = vmul.f32 1.442695, %v3537_v25 }
0x11f2   : > { %v3518_v13 = vpop.xlane.xlu1 %3517  ;;  %v3521_v29 = vpop.xlane.xlu0 %3520 }
0x11f3   : > { %4945 = vpow2.f32 %v3545_v28  ;;  %v3538_v16 = vsub.f32 %v5760_v49, %v3518_v13  ;;  %v3539_v30 = vsub.f32 %v5762_v50, %v3521_v29 }
0x11f5   : > { %v3547_v32 = vmul.f32 1.442695, %v3538_v16  ;;  %v3549_v31 = vmul.f32 1.442695, %v3539_v30 }
0x11f6   : > { %v3527_v33 = vpop.xlane.xlu1 %3526  ;;  %v3524_v34 = vpop.xlane.xlu0 %3523 }
0x11f7   : > { %4947 = vpow2.f32 %v3547_v32  ;;  %v3541_v37 = vsub.f32 %v5772_v36, %v3527_v33  ;;  %v3540_v38 = vsub.f32 %v5770_v57, %v3524_v34 }
0x11f8   : > { %4949 = vpow2.f32 %v3549_v31  ;;  %v4121_v31 = vld [vmem:[%s5883_s13] ss:$0 sm:$0xff] }
0x11f9   : > { %v3553_v39 = vmul.f32 1.442695, %v3541_v37  ;;  %v3551_v21 = vmul.f32 1.442695, %v3540_v38 }
0x11fa   : > { %v3533_v40 = vpop.xlane.xlu1 %3532  ;;  %v3530_v10 = vpop.xlane.xlu0 %3529 }
0x11fb   : > { %4951 = vpow2.f32 %v3553_v39  ;;  %v3543_v12 = vsub.f32 %v5780_v2, %v3533_v40  ;;  %v3542_v42 = vsub.f32 %v5778_v63, %v3530_v10 }
0x11fc   : > { %4953 = vpow2.f32 %v3551_v21 }
0x11fd   : > { %v4946_v41 = vpop.eup %4945  ;;  %v3557_v43 = vmul.f32 1.442695, %v3543_v12  ;;  %v3555_v22 = vmul.f32 1.442695, %v3542_v42 }
0x11fe   : > { %4676 = vmatprep.mubr.msk.f32.mxu0 %vm564_vm1, %v4946_v41  ;;  %v3536_v45 = vpop.xlane.xlu0 %3535  ;;  %v3711_v51 = vpop.permute.xlu1 %3710 }
0x11ff   : > { %4955 = vpow2.f32 %v3557_v43  ;;  %v3544_v46 = vsub.f32 %v5786_v7, %v3536_v45 }
0x1200   : > { %4957 = vpow2.f32 %v3555_v22 }
0x1201   : > { %v4948_v47 = vpop.eup %4947  ;;  %v3559_v15 = vmul.f32 1.442695, %v3544_v46 }
0x1202   : > { %v4950_v44 = vpop.eup %4949  ;;  %4677 = vmatmul.mubr.msk.f32.vlgmr.msra.gmra.mrb[54].mxu0 %vm564_vm1, %v4948_v47  ;;  %v3715_v61 = vpop.permute.xlu1 %3714 }
0x1203   : > { %4959 = vpow2.f32 %v3559_v15  ;;  %4679 = vmatprep.mubr.msk.f32.mxu0 %vm564_vm1, %v4950_v44  ;;  %v3713_v3 = vpop.permute.xlu0 %3712 }
0x1205   : > { %v4952_v48 = vpop.eup %4951 }
0x1206   : > { %v4954_v49 = vpop.eup %4953  ;;  %v3717_v6 = vpop.permute.xlu1 %3716 }
0x1207   : > { %4680 = vmatmul.mubr.msk.f32.gmra.mrb[56].mxu0 %vm564_vm1, %v4954_v49  ;;  %v3719_v17 = vpop.permute.xlu0 %3718 }
0x1208   : > { %4682 = vmatprep.mubr.msk.f32.mxu0 %vm564_vm1, %v4952_v48 }
0x1209   : > { %v4956_v50 = vpop.eup %4955 }
0x120a   : > { %v4958_v18 = vpop.eup %4957  ;;  %v3721_v19 = vpop.permute.xlu1 %3720 }
0x120b   : > { %4683 = vmatmul.mubr.msk.f32.gmra.mrb[58].mxu0 %vm564_vm1, %v4958_v18  ;;  %v3723_v29 = vpop.permute.xlu0 %3722 }
0x120c   : > { %4685 = vmatprep.mubr.msk.f32.mxu0 %vm564_vm1, %v4956_v50 }
0x120d   : > { %v4960_v52 = vpop.eup %4959 }
0x120e   : > { %v3725_v16 = vpop.permute.xlu1 %3724 }
0x120f   : > { %4686 = vmatmul.mubr.msk.f32.gmra.mrb[60].mxu0 %vm564_vm1, %v4960_v52 }
0x12d5   : > { %v4678_v54 = vpop.f32.mrb[54].mxu0 }
0x12d6   : > { %4961 = vrcp.f32 %v4678_v54  ;;  %v3655_v55 = vpop.f32.mrb[55].mxu0 }
0x12d7   : > { %4963 = vrcp.f32 %v3655_v55 }
0x12da   : > { %v4681_v56 = vpop.f32.mrb[56].mxu0 }
0x12db   : > { %4965 = vrcp.f32 %v4681_v56  ;;  %v3665_v57 = vpop.f32.mrb[57].mxu0 }
0x12dc   : > { %4967 = vrcp.f32 %v3665_v57 }
0x12de   : > { %v4684_v36 = vpop.f32.mrb[58].mxu0 }
0x12df   : > { %4969 = vrcp.f32 %v4684_v36  ;;  %v3675_v62 = vpop.f32.mrb[59].mxu0 }
0x12e0   : > { %v4962_v58 = vpop.eup %4961  ;;  %4971 = vrcp.f32 %v3675_v62 }
0x12e1   : > { %v4964_v59 = vpop.eup %4963  ;;  %v3703_v53 = vmul.f32 %v4962_v58, %v4948_v47 }
0x12e2   : > { %v4687_v60 = vpop.f32.mrb[60].mxu0  ;;  %v3702_v63 = vmul.f32 %v4964_v59, %v4946_v41 }
0x12e3   : > { %4973 = vrcp.f32 %v4687_v60  ;;  %v3685_v2 = vpop.f32.mrb[61].mxu0  ;;  %v3735_v7 = vmul.f32 %v3713_v3, %v3703_v53 }
0x12e4   : > { %4975 = vrcp.f32 %v3685_v2  ;;  %v3734_v4 = vmul.f32 %v3711_v51, %v3702_v63 }
0x12e5   : > { %v4966_v5 = vpop.eup %4965 }
0x12e6   : > { %v4968_v8 = vpop.eup %4967  ;;  %4696 = vmatprep.mubr.msk.f32.mxu1 %vm564_vm1, %v3734_v4  ;;  %v3705_v1 = vmul.f32 %v4966_v5, %v4954_v49 }
0x12e7   : > { %4697 = vmatmul.mubr.msk.f32.vlgmr.msra.gmra.mrb[18].mxu1 %vm564_vm1, %v3735_v7  ;;  %v3704_v9 = vmul.f32 %v4968_v8, %v4950_v44 }
0x12e8   : > { %v3737_v0 = vmul.f32 %v3717_v6, %v3705_v1 }
0x12e9   : > { %v4970_v11 = vpop.eup %4969  ;;  %v3736_v14 = vmul.f32 %v3715_v61, %v3704_v9 }
0x12ea   : > { %v4972_v35 = vpop.eup %4971  ;;  %v3707_v27 = vmul.f32 %v4970_v11, %v4958_v18 }
0x12eb   : > { %4699 = vmatprep.mubr.msk.f32.mxu1 %vm564_vm1, %v3736_v14  ;;  %v3706_v26 = vmul.f32 %v4972_v35, %v4952_v48 }
0x12ec   : > { %4700 = vmatmul.mubr.msk.f32.gmra.mrb[20].mxu1 %vm564_vm1, %v3737_v0  ;;  %v3739_v25 = vmul.f32 %v3721_v19, %v3707_v27 }
0x12ed   : > { %v4974_v20 = vpop.eup %4973  ;;  %v3738_v23 = vmul.f32 %v3719_v17, %v3706_v26 }
0x12ee   : > { %v4976_v24 = vpop.eup %4975  ;;  %v3709_v28 = vmul.f32 %v4974_v20, %v4960_v52 }
0x12ef   : > { %4702 = vmatprep.mubr.msk.f32.mxu1 %vm564_vm1, %v3738_v23  ;;  %v3708_v13 = vmul.f32 %v4976_v24, %v4956_v50 }
0x12f0   : > { %4703 = vmatmul.mubr.msk.f32.gmra.mrb[22].mxu1 %vm564_vm1, %v3739_v25  ;;  %v3741_v32 = vmul.f32 %v3725_v16, %v3709_v28 }
0x12f1   : > { %v3740_v30 = vmul.f32 %v3723_v29, %v3708_v13 }
0x12f3   : > { %4705 = vmatprep.mubr.msk.f32.mxu1 %vm564_vm1, %v3740_v30 }
0x12f4   : > { %4706 = vmatmul.mubr.msk.f32.gmra.mrb[24].mxu1 %vm564_vm1, %v3741_v32 }
0x13ba   : > { %v4698_v33 = vpop.f32.mrb[18].mxu1 }
0x13bb   : > { %v3883_v34 = vadd.f32 %v4698_v33, %v4121_v31  ;;  %v3836_v37 = vpop.f32.mrb[19].mxu1 }
0x13bc   : > { %v3882_v38 = vadd.f32 %v4121_v31, %v3836_v37 }
0x13bd   : > { %3891 = vst.msk [vmem:[%s467_s21 + $0x8] sm:$0xff] %vm564_vm1, %v3883_v34 }
0x13be   : > { %3890 = vst.msk [vmem:[%s467_s21] sm:$0xff] %vm564_vm1, %v3882_v38 }
0x13bf   : > { %v4701_v39 = vpop.f32.mrb[20].mxu1 }
0x13c0   : > { %v3885_v21 = vadd.f32 %v4701_v39, %v4121_v31  ;;  %v3846_v40 = vpop.f32.mrb[21].mxu1 }
0x13c1   : > { %v3884_v10 = vadd.f32 %v4121_v31, %v3846_v40 }
0x13c2   : > { %3893 = vst.msk [vmem:[%s467_s21 + $0x18] sm:$0xff] %vm564_vm1, %v3885_v21 }
0x13c3   : > { %3892 = vst.msk [vmem:[%s467_s21 + $0x10] sm:$0xff] %vm564_vm1, %v3884_v10  ;;  %v4704_v12 = vpop.f32.mrb[22].mxu1 }
0x13c4   : > { %v3887_v42 = vadd.f32 %v4704_v12, %v4121_v31  ;;  %v3856_v41 = vpop.f32.mrb[23].mxu1 }
0x13c5   : > { %v3886_v43 = vadd.f32 %v4121_v31, %v3856_v41 }
0x13c6   : > { %3895 = vst.msk [vmem:[%s467_s21 + $0x28] sm:$0xff] %vm564_vm1, %v3887_v42 }
0x13c7   : > { %3894 = vst.msk [vmem:[%s467_s21 + $0x20] sm:$0xff] %vm564_vm1, %v3886_v43  ;;  %v4707_v22 = vpop.f32.mrb[24].mxu1 }
0x13c8   : > { %v3889_v45 = vadd.f32 %v4707_v22, %v4121_v31  ;;  %v3866_v46 = vpop.f32.mrb[25].mxu1 }
0x13c9   : > { %v3888_v47 = vadd.f32 %v4121_v31, %v3866_v46 }
0x13ca   : > { %3897 = vst.msk [vmem:[%s467_s21 + $0x38] sm:$0xff] %vm564_vm1, %v3889_v45 }
0x13cb   : > { %3896 = vst.msk [vmem:[%s467_s21 + $0x30] sm:$0xff] %vm564_vm1, %v3888_v47 }
0x13cc PF: > { %s24_s29 = sadd.s32 1, %s4983_s29  }
0x13cd   : > { %p21_p4 = scmp.ge.s32.totalorder %s24_s29, 4  }
0x13cf   :  { %23 = sbr.rel (!%p21_p4) target bundleno = 1 (0x1), region = 106 }

</bundles_post_ra>
